<compile_context>
chip_gen: v7x
topology: tpu7x:2x2x1
jax: 0.10.0
libtpu: 0.0.40
codegen_flags: <defaults>
</compile_context>

<pallas_src>
import numpy as np

import jax
import jax.numpy as jnp
from jax.experimental import pallas as pl
from jax.experimental.pallas import tpu as pltpu

MEAN = 144.07124
STD = 4.6154547


# ----------------------------------------------------------------------------
# Fused kernel: whole forward pass in one pallas_call
# ----------------------------------------------------------------------------
def _fused_forward_kernel(
        x_ref, state_ref,
        s1_ref, m1_ref, ss1_ref,
        s2_ref, m2_ref, ss2_ref,
        s3_ref, m3_ref, ss3_ref,
        s4_ref, m4_ref, ss4_ref,
        fcw_ref, fcb_ref,
        wh_ref, ws_ref, rb_ref,
        wpc_ref, bpc_ref, pvmask_ref,
        pv_ref, ns_ref):
    bf16 = jnp.bfloat16
    f32 = jnp.float32

    def conv_stage(act_bf, srow_ref, mk_ref, ss_ref):
        # y = sum_kh (Srow_kh @ X) @ Mk_kh ; then folded-BN affine + ReLU.
        z = None
        for kh in range(3):
            rows = jnp.dot(srow_ref[kh], act_bf,
                           preferred_element_type=f32).astype(bf16)  # exact gather
            part = jnp.dot(rows, mk_ref[kh], preferred_element_type=f32)
            z = part if z is None else z + part
        z = z * ss_ref[0:1, :] + ss_ref[1:2, :]
        return jnp.maximum(z, 0.0).astype(bf16)

    # input normalization (fused), then 4 conv stages
    act = ((x_ref[...] - MEAN) * (1.0 / STD)).astype(bf16)   # (N*80, 80)
    act = conv_stage(act, s1_ref, m1_ref, ss1_ref)           # (N*40, 40*8)
    act = conv_stage(act, s2_ref, m2_ref, ss2_ref)           # (N*20, 20*16)
    act = conv_stage(act, s3_ref, m3_ref, ss3_ref)           # (N*10, 10*32)
    act = conv_stage(act, s4_ref, m4_ref, ss4_ref)           # (5*N, 5*64), rows in (i, n) order

    n = state_ref.shape[0]
    # FC over the NHWC-flattened feature, consumed block-wise (no reshape):
    hidden = jnp.dot(act[0:n, :], fcw_ref[0], preferred_element_type=f32)
    for i in range(1, 5):
        hidden = hidden + jnp.dot(act[i * n:(i + 1) * n, :], fcw_ref[i],
                                  preferred_element_type=f32)
    hidden = jnp.maximum(hidden + fcb_ref[...], 0.0)          # (N, G)

    # rnn: tanh(concat([hidden, state]) @ Wr^T + br) == hidden@Wh + state@Ws + br
    z = (jnp.dot(hidden, wh_ref[...], preferred_element_type=f32)
         + jnp.dot(state_ref[...], ws_ref[...], preferred_element_type=f32)
         + rb_ref[...])
    ns = jnp.tanh(z)
    ns_ref[...] = ns

    # merged policy/critic head: column 0 = policy (sigmoid), column 1 = critic
    logits = jnp.dot(ns, wpc_ref[...], preferred_element_type=f32) + bpc_ref[...]
    sig = 1.0 / (1.0 + jnp.exp(-logits))
    m = pvmask_ref[...]
    pv_ref[...] = sig * m + logits * (1.0 - m)


def model_forward(prep, x_nchw, state):
    N, C, H, W = x_nchw.shape                 # C == 1
    G = state.shape[1]
    x2d = x_nchw.reshape(N * H, W)            # NCHW with C=1 -> (N*H, W), free reshape
    n_in = 2 + len(prep)
    pv, ns = pl.pallas_call(
        _fused_forward_kernel,
        out_shape=(jax.ShapeDtypeStruct((N, 2), jnp.float32),
                   jax.ShapeDtypeStruct((N, G), jnp.float32)),
        in_specs=[pl.BlockSpec(memory_space=pltpu.MemorySpace.VMEM)] * n_in,
        out_specs=(pl.BlockSpec(memory_space=pltpu.MemorySpace.VMEM),
                   pl.BlockSpec(memory_space=pltpu.MemorySpace.VMEM)),
    )(x2d, state, *prep)
    return pv[:, 0], pv[:, 1], ns


# ----------------------------------------------------------------------------
# Parameters (torch-layout, deterministic synthetic init)
# ----------------------------------------------------------------------------
def init_params(key, gru_sz):
    ks = jax.random.split(key, 8)

    def conv_layer(k, cin, cout):
        k1, k2, k3, k4, k5, k6 = jax.random.split(k, 6)
        return dict(
            w=jax.random.normal(k1, (cout, cin, 3, 3), jnp.float32) / jnp.sqrt(9.0 * cin),
            b=0.1 * jax.random.normal(k2, (cout,), jnp.float32),
            gamma=1.0 + 0.1 * jax.random.normal(k3, (cout,), jnp.float32),
            beta=0.1 * jax.random.normal(k4, (cout,), jnp.float32),
            mean=0.1 * jax.random.normal(k5, (cout,), jnp.float32),
            var=0.5 + jnp.abs(jax.random.normal(k6, (cout,), jnp.float32)),
        )

    def lin(k, dout, din):
        k1, k2 = jax.random.split(k)
        s = 1.0 / jnp.sqrt(din)
        return (s * jax.random.normal(k1, (dout, din), jnp.float32),
                s * jax.random.normal(k2, (dout,), jnp.float32))

    c = 8
    params = {
        "conv1": conv_layer(ks[0], 1, c),
        "conv2": conv_layer(ks[1], c, 2 * c),
        "conv3": conv_layer(ks[2], 2 * c, 4 * c),
        "conv4": conv_layer(ks[3], 4 * c, 8 * c),
    }
    params["fc_w"], params["fc_b"] = lin(ks[4], gru_sz, 8 * c * 5 * 5)   # (G, 1600)
    params["rnn_w"], params["rnn_b"] = lin(ks[5], gru_sz, 2 * gru_sz)    # (G, 2G)
    params["pol_w"], params["pol_b"] = lin(ks[6], 1, gru_sz)
    params["cri_w"], params["cri_b"] = lin(ks[7], 1, gru_sz)
    return params


# ----------------------------------------------------------------------------
# Host-side prep: build the constant matrices consumed by the fused kernel
# ----------------------------------------------------------------------------
def prepare_params(params, batch):
    ops = []
    H = 80
    for name in ("conv1", "conv2", "conv3", "conv4"):
        p = params[name]
        w = np.asarray(p["w"], np.float32)             # (Cout, Cin, 3, 3)
        cout, cin = w.shape[0], w.shape[1]
        Ho = H // 2

        # Row-tap selection (0/1), block-diagonal over the batch:
        #   srow[kh, n*Ho+i, n*H+h] = 1  iff  h == 2*i + kh - 1 is in range.
        srow = np.zeros((3, Ho, H), np.float32)
        for kh in range(3):
            idx_i = np.arange(Ho)
            idx_h = 2 * idx_i + kh - 1
            ok = (idx_h >= 0) & (idx_h < H)
            srow[kh, idx_i[ok], idx_h[ok]] = 1.0
        srow_n = np.stack([np.kron(np.eye(batch, dtype=np.float32), srow[kh])
                           for kh in range(3)])
        if name == "conv4":
            # reorder output rows from (n, i) to (i, n) so the FC can consume
            # the flattened feature block-wise without an in-kernel reshape.
            perm = np.array([n * Ho + i for i in range(Ho) for n in range(batch)])
            srow_n = srow_n[:, perm, :]

        # Column taps + stride-2 + zero-padding + weights folded into Mk:
        #   mk[kh, w_in*Cin+c, j*Cout+o] = W[o, c, kh, kw] with w_in = 2j+kw-1.
        mk = np.zeros((3, H * cin, Ho * cout), np.float32)
        for kh in range(3):
            for kw in range(3):
                for j in range(Ho):
                    wi = 2 * j + kw - 1
                    if 0 <= wi < H:
                        mk[kh, wi * cin:(wi + 1) * cin,
                           j * cout:(j + 1) * cout] = w[:, :, kh, kw].T

        # conv-bias + eval-mode BatchNorm folded to per-channel affine, tiled.
        gamma = np.asarray(p["gamma"], np.float32)
        var = np.asarray(p["var"], np.float32)
        scale = gamma / np.sqrt(var + 1e-5)
        shift = (np.asarray(p["beta"], np.float32)
                 + scale * (np.asarray(p["b"], np.float32)
                            - np.asarray(p["mean"], np.float32)))
        ss = np.stack([np.tile(scale, Ho), np.tile(shift, Ho)]).astype(np.float32)

        ops += [jnp.asarray(srow_n, jnp.bfloat16),
                jnp.asarray(mk, jnp.bfloat16),
                jnp.asarray(ss, jnp.float32)]
        H = Ho

    G = int(params["fc_b"].shape[0])
    # fc_w rows are in torch NCHW-flatten order (o, i, j); permute to the
    # kernel's (i, j*64+o) blocks.
    fc_w = np.asarray(params["fc_w"], np.float32)        # (G, 64*5*5)
    fcw3 = fc_w.reshape(G, 64, 5, 5).transpose(2, 3, 1, 0).reshape(5, 5 * 64, G)
    ops.append(jnp.asarray(fcw3, jnp.bfloat16))
    ops.append(jnp.asarray(params["fc_b"], jnp.float32).reshape(1, G))

    rnn_w = np.asarray(params["rnn_w"], np.float32)      # (G, 2G)
    ops.append(jnp.asarray(rnn_w[:, :G].T, jnp.float32))  # acts on fc output
    ops.append(jnp.asarray(rnn_w[:, G:].T, jnp.float32))  # acts on prev state
    ops.append(jnp.asarray(params["rnn_b"], jnp.float32).reshape(1, G))

    # policy / critic merged into a single (G, 2) head.
    wpc = np.stack([np.asarray(params["pol_w"], np.float32)[0],
                    np.asarray(params["cri_w"], np.float32)[0]], axis=1)
    bpc = np.array([[float(params["pol_b"][0]), float(params["cri_b"][0])]], np.float32)
    ops.append(jnp.asarray(wpc, jnp.float32))
    ops.append(jnp.asarray(bpc, jnp.float32))
    ops.append(jnp.asarray([[1.0, 0.0]], jnp.float32))   # sigmoid only on column 0
    return tuple(ops)


# ----------------------------------------------------------------------------
# Pure-JAX reference (torch semantics), independent of the Pallas path
# ----------------------------------------------------------------------------
def reference_forward(params, x_nchw, state):
    h = (x_nchw - MEAN) / STD
    for name in ("conv1", "conv2", "conv3", "conv4"):
        p = params[name]
        h = jax.lax.conv_general_dilated(
            h, p["w"], window_strides=(2, 2), padding=[(1, 1), (1, 1)],
            dimension_numbers=("NCHW", "OIHW", "NCHW"),
            precision=jax.lax.Precision.HIGHEST)
        h = h + p["b"].reshape(1, -1, 1, 1)
        inv = (p["gamma"] / jnp.sqrt(p["var"] + 1e-5)).reshape(1, -1, 1, 1)
        h = (h - p["mean"].reshape(1, -1, 1, 1)) * inv + p["beta"].reshape(1, -1, 1, 1)
        h = jnp.maximum(h, 0.0)
    feat = h.reshape(h.shape[0], -1)                              # NCHW flatten
    hid = jnp.maximum(feat @ params["fc_w"].T + params["fc_b"], 0.0)
    cat = jnp.concatenate([hid, state], axis=1)
    ns = jnp.tanh(cat @ params["rnn_w"].T + params["rnn_b"])
    p_ = jax.nn.sigmoid((ns @ params["pol_w"].T + params["pol_b"]).reshape(-1))
    v = (ns @ params["cri_w"].T + params["cri_b"]).reshape(-1)
    return p_, v, ns


if __name__ == "__main__":
    # The architecture fixes the spatial size: four stride-2 convs
    # 80 -> 40 -> 20 -> 10 -> 5 and Linear expects 64*5*5 features.
    N, GRU = 2, 32
    key = jax.random.PRNGKey(0)
    kx, ks, kp = jax.random.split(key, 3)
    x = MEAN + STD * jax.random.normal(kx, (N, 1, 80, 80), jnp.float32)
    state = jax.random.normal(ks, (N, GRU), jnp.float32)
    params = init_params(kp, GRU)
    prep = prepare_params(params, N)

    fwd = jax.jit(model_forward)
    p, v, ns = jax.block_until_ready(fwd(prep, x, state))

    p_ref, v_ref, ns_ref = reference_forward(params, x, state)
    assert p.shape == (N,) and v.shape == (N,) and ns.shape == (N, GRU)
    assert jnp.allclose(p, p_ref, atol=5e-2, rtol=5e-2)
    assert jnp.allclose(v, v_ref, atol=5e-2, rtol=5e-2)
    assert jnp.allclose(ns, ns_ref, atol=5e-2, rtol=5e-2)
    print("KERNEL_OK")
</pallas_src>

<mosaic_0001>
module attributes {stable_mosaic.version = 11 : i64} {
  func.func @_fused_forward_kernel(%arg0: memref<160x80xf32, #tpu.memory_space<vmem>>, %arg1: memref<2x32xf32, #tpu.memory_space<vmem>>, %arg2: memref<3x80x160xbf16, #tpu.memory_space<vmem>>, %arg3: memref<3x80x320xbf16, #tpu.memory_space<vmem>>, %arg4: memref<2x320xf32, #tpu.memory_space<vmem>>, %arg5: memref<3x40x80xbf16, #tpu.memory_space<vmem>>, %arg6: memref<3x320x320xbf16, #tpu.memory_space<vmem>>, %arg7: memref<2x320xf32, #tpu.memory_space<vmem>>, %arg8: memref<3x20x40xbf16, #tpu.memory_space<vmem>>, %arg9: memref<3x320x320xbf16, #tpu.memory_space<vmem>>, %arg10: memref<2x320xf32, #tpu.memory_space<vmem>>, %arg11: memref<3x10x20xbf16, #tpu.memory_space<vmem>>, %arg12: memref<3x320x320xbf16, #tpu.memory_space<vmem>>, %arg13: memref<2x320xf32, #tpu.memory_space<vmem>>, %arg14: memref<5x320x32xbf16, #tpu.memory_space<vmem>>, %arg15: memref<1x32xf32, #tpu.memory_space<vmem>>, %arg16: memref<32x32xf32, #tpu.memory_space<vmem>>, %arg17: memref<32x32xf32, #tpu.memory_space<vmem>>, %arg18: memref<1x32xf32, #tpu.memory_space<vmem>>, %arg19: memref<32x2xf32, #tpu.memory_space<vmem>>, %arg20: memref<1x2xf32, #tpu.memory_space<vmem>>, %arg21: memref<1x2xf32, #tpu.memory_space<vmem>>, %arg22: memref<2x2xf32, #tpu.memory_space<vmem>>, %arg23: memref<2x32xf32, #tpu.memory_space<vmem>>) attributes {dimension_semantics = [], scalar_prefetch = 0 : i64, scratch_operands = 0 : i64, tpu.core_type = #tpu.core_type<tc>} {
    %c0 = arith.constant 0 : index
    %c0_0 = arith.constant 0 : index
    %0 = vector.load %arg0[%c0, %c0_0] : memref<160x80xf32, #tpu.memory_space<vmem>>, vector<160x80xf32>
    %cst = arith.constant 144.071243 : f32
    %1 = vector.broadcast %cst : f32 to vector<160x80xf32>
    %2 = arith.subf %0, %1 : vector<160x80xf32>
    %cst_1 = arith.constant 0.216663375 : f32
    %3 = vector.broadcast %cst_1 : f32 to vector<160x80xf32>
    %4 = arith.mulf %2, %3 : vector<160x80xf32>
    %5 = arith.truncf %4 : vector<160x80xf32> to vector<160x80xbf16>
    %c0_2 = arith.constant 0 : index
    %c0_3 = arith.constant 0 : index
    %c0_4 = arith.constant 0 : index
    %6 = vector.load %arg2[%c0_2, %c0_3, %c0_4] : memref<3x80x160xbf16, #tpu.memory_space<vmem>>, vector<1x80x160xbf16>
    %7 = vector.shape_cast %6 : vector<1x80x160xbf16> to vector<80x160xbf16>
    %cst_5 = arith.constant dense<0.000000e+00> : vector<80x80xf32>
    %8 = tpu.matmul %7, %5, %cst_5 {dimension_numbers = #tpu.dot_dimension_numbers<[1], [0], [0], [1], [0, 0, 1, 1], [], []>} : vector<80x160xbf16>, vector<160x80xbf16>, vector<80x80xf32> -> vector<80x80xf32>
    %9 = arith.truncf %8 : vector<80x80xf32> to vector<80x80xbf16>
    %c0_6 = arith.constant 0 : index
    %c0_7 = arith.constant 0 : index
    %c0_8 = arith.constant 0 : index
    %10 = vector.load %arg3[%c0_6, %c0_7, %c0_8] : memref<3x80x320xbf16, #tpu.memory_space<vmem>>, vector<1x80x320xbf16>
    %11 = vector.shape_cast %10 : vector<1x80x320xbf16> to vector<80x320xbf16>
    %cst_9 = arith.constant dense<0.000000e+00> : vector<80x320xf32>
    %12 = tpu.matmul %9, %11, %cst_9 {dimension_numbers = #tpu.dot_dimension_numbers<[1], [0], [0], [1], [0, 0, 1, 1], [], []>} : vector<80x80xbf16>, vector<80x320xbf16>, vector<80x320xf32> -> vector<80x320xf32>
    %c1 = arith.constant 1 : index
    %c0_10 = arith.constant 0 : index
    %c0_11 = arith.constant 0 : index
    %13 = vector.load %arg2[%c1, %c0_10, %c0_11] : memref<3x80x160xbf16, #tpu.memory_space<vmem>>, vector<1x80x160xbf16>
    %14 = vector.shape_cast %13 : vector<1x80x160xbf16> to vector<80x160xbf16>
    %cst_12 = arith.constant dense<0.000000e+00> : vector<80x80xf32>
    %15 = tpu.matmul %14, %5, %cst_12 {dimension_numbers = #tpu.dot_dimension_numbers<[1], [0], [0], [1], [0, 0, 1, 1], [], []>} : vector<80x160xbf16>, vector<160x80xbf16>, vector<80x80xf32> -> vector<80x80xf32>
    %16 = arith.truncf %15 : vector<80x80xf32> to vector<80x80xbf16>
    %c1_13 = arith.constant 1 : index
    %c0_14 = arith.constant 0 : index
    %c0_15 = arith.constant 0 : index
    %17 = vector.load %arg3[%c1_13, %c0_14, %c0_15] : memref<3x80x320xbf16, #tpu.memory_space<vmem>>, vector<1x80x320xbf16>
    %18 = vector.shape_cast %17 : vector<1x80x320xbf16> to vector<80x320xbf16>
    %cst_16 = arith.constant dense<0.000000e+00> : vector<80x320xf32>
    %19 = tpu.matmul %16, %18, %cst_16 {dimension_numbers = #tpu.dot_dimension_numbers<[1], [0], [0], [1], [0, 0, 1, 1], [], []>} : vector<80x80xbf16>, vector<80x320xbf16>, vector<80x320xf32> -> vector<80x320xf32>
    %20 = arith.addf %12, %19 : vector<80x320xf32>
    %c2 = arith.constant 2 : index
    %c0_17 = arith.constant 0 : index
    %c0_18 = arith.constant 0 : index
    %21 = vector.load %arg2[%c2, %c0_17, %c0_18] : memref<3x80x160xbf16, #tpu.memory_space<vmem>>, vector<1x80x160xbf16>
    %22 = vector.shape_cast %21 : vector<1x80x160xbf16> to vector<80x160xbf16>
    %cst_19 = arith.constant dense<0.000000e+00> : vector<80x80xf32>
    %23 = tpu.matmul %22, %5, %cst_19 {dimension_numbers = #tpu.dot_dimension_numbers<[1], [0], [0], [1], [0, 0, 1, 1], [], []>} : vector<80x160xbf16>, vector<160x80xbf16>, vector<80x80xf32> -> vector<80x80xf32>
    %24 = arith.truncf %23 : vector<80x80xf32> to vector<80x80xbf16>
    %c2_20 = arith.constant 2 : index
    %c0_21 = arith.constant 0 : index
    %c0_22 = arith.constant 0 : index
    %25 = vector.load %arg3[%c2_20, %c0_21, %c0_22] : memref<3x80x320xbf16, #tpu.memory_space<vmem>>, vector<1x80x320xbf16>
    %26 = vector.shape_cast %25 : vector<1x80x320xbf16> to vector<80x320xbf16>
    %cst_23 = arith.constant dense<0.000000e+00> : vector<80x320xf32>
    %27 = tpu.matmul %24, %26, %cst_23 {dimension_numbers = #tpu.dot_dimension_numbers<[1], [0], [0], [1], [0, 0, 1, 1], [], []>} : vector<80x80xbf16>, vector<80x320xbf16>, vector<80x320xf32> -> vector<80x320xf32>
    %28 = arith.addf %20, %27 : vector<80x320xf32>
    %c0_24 = arith.constant 0 : index
    %c0_25 = arith.constant 0 : index
    %29 = vector.load %arg4[%c0_24, %c0_25] : memref<2x320xf32, #tpu.memory_space<vmem>>, vector<1x320xf32>
    %30 = vector.broadcast %29 : vector<1x320xf32> to vector<80x320xf32>
    %31 = arith.mulf %28, %30 : vector<80x320xf32>
    %c1_26 = arith.constant 1 : index
    %c0_27 = arith.constant 0 : index
    %32 = vector.load %arg4[%c1_26, %c0_27] : memref<2x320xf32, #tpu.memory_space<vmem>>, vector<1x320xf32>
    %33 = vector.broadcast %32 : vector<1x320xf32> to vector<80x320xf32>
    %34 = arith.addf %31, %33 : vector<80x320xf32>
    %cst_28 = arith.constant 0.000000e+00 : f32
    %35 = vector.broadcast %cst_28 : f32 to vector<80x320xf32>
    %36 = arith.maximumf %34, %35 : vector<80x320xf32>
    %37 = arith.truncf %36 : vector<80x320xf32> to vector<80x320xbf16>
    %c0_29 = arith.constant 0 : index
    %c0_30 = arith.constant 0 : index
    %c0_31 = arith.constant 0 : index
    %38 = vector.load %arg5[%c0_29, %c0_30, %c0_31] : memref<3x40x80xbf16, #tpu.memory_space<vmem>>, vector<1x40x80xbf16>
    %39 = vector.shape_cast %38 : vector<1x40x80xbf16> to vector<40x80xbf16>
    %cst_32 = arith.constant dense<0.000000e+00> : vector<40x320xf32>
    %40 = tpu.matmul %39, %37, %cst_32 {dimension_numbers = #tpu.dot_dimension_numbers<[1], [0], [0], [1], [0, 0, 1, 1], [], []>} : vector<40x80xbf16>, vector<80x320xbf16>, vector<40x320xf32> -> vector<40x320xf32>
    %41 = arith.truncf %40 : vector<40x320xf32> to vector<40x320xbf16>
    %c0_33 = arith.constant 0 : index
    %c0_34 = arith.constant 0 : index
    %c0_35 = arith.constant 0 : index
    %42 = vector.load %arg6[%c0_33, %c0_34, %c0_35] : memref<3x320x320xbf16, #tpu.memory_space<vmem>>, vector<1x320x320xbf16>
    %43 = vector.shape_cast %42 : vector<1x320x320xbf16> to vector<320x320xbf16>
    %cst_36 = arith.constant dense<0.000000e+00> : vector<40x320xf32>
    %44 = tpu.matmul %41, %43, %cst_36 {dimension_numbers = #tpu.dot_dimension_numbers<[1], [0], [0], [1], [0, 0, 1, 1], [], []>} : vector<40x320xbf16>, vector<320x320xbf16>, vector<40x320xf32> -> vector<40x320xf32>
    %c1_37 = arith.constant 1 : index
    %c0_38 = arith.constant 0 : index
    %c0_39 = arith.constant 0 : index
    %45 = vector.load %arg5[%c1_37, %c0_38, %c0_39] : memref<3x40x80xbf16, #tpu.memory_space<vmem>>, vector<1x40x80xbf16>
    %46 = vector.shape_cast %45 : vector<1x40x80xbf16> to vector<40x80xbf16>
    %cst_40 = arith.constant dense<0.000000e+00> : vector<40x320xf32>
    %47 = tpu.matmul %46, %37, %cst_40 {dimension_numbers = #tpu.dot_dimension_numbers<[1], [0], [0], [1], [0, 0, 1, 1], [], []>} : vector<40x80xbf16>, vector<80x320xbf16>, vector<40x320xf32> -> vector<40x320xf32>
    %48 = arith.truncf %47 : vector<40x320xf32> to vector<40x320xbf16>
    %c1_41 = arith.constant 1 : index
    %c0_42 = arith.constant 0 : index
    %c0_43 = arith.constant 0 : index
    %49 = vector.load %arg6[%c1_41, %c0_42, %c0_43] : memref<3x320x320xbf16, #tpu.memory_space<vmem>>, vector<1x320x320xbf16>
    %50 = vector.shape_cast %49 : vector<1x320x320xbf16> to vector<320x320xbf16>
    %cst_44 = arith.constant dense<0.000000e+00> : vector<40x320xf32>
    %51 = tpu.matmul %48, %50, %cst_44 {dimension_numbers = #tpu.dot_dimension_numbers<[1], [0], [0], [1], [0, 0, 1, 1], [], []>} : vector<40x320xbf16>, vector<320x320xbf16>, vector<40x320xf32> -> vector<40x320xf32>
    %52 = arith.addf %44, %51 : vector<40x320xf32>
    %c2_45 = arith.constant 2 : index
    %c0_46 = arith.constant 0 : index
    %c0_47 = arith.constant 0 : index
    %53 = vector.load %arg5[%c2_45, %c0_46, %c0_47] : memref<3x40x80xbf16, #tpu.memory_space<vmem>>, vector<1x40x80xbf16>
    %54 = vector.shape_cast %53 : vector<1x40x80xbf16> to vector<40x80xbf16>
    %cst_48 = arith.constant dense<0.000000e+00> : vector<40x320xf32>
    %55 = tpu.matmul %54, %37, %cst_48 {dimension_numbers = #tpu.dot_dimension_numbers<[1], [0], [0], [1], [0, 0, 1, 1], [], []>} : vector<40x80xbf16>, vector<80x320xbf16>, vector<40x320xf32> -> vector<40x320xf32>
    %56 = arith.truncf %55 : vector<40x320xf32> to vector<40x320xbf16>
    %c2_49 = arith.constant 2 : index
    %c0_50 = arith.constant 0 : index
    %c0_51 = arith.constant 0 : index
    %57 = vector.load %arg6[%c2_49, %c0_50, %c0_51] : memref<3x320x320xbf16, #tpu.memory_space<vmem>>, vector<1x320x320xbf16>
    %58 = vector.shape_cast %57 : vector<1x320x320xbf16> to vector<320x320xbf16>
    %cst_52 = arith.constant dense<0.000000e+00> : vector<40x320xf32>
    %59 = tpu.matmul %56, %58, %cst_52 {dimension_numbers = #tpu.dot_dimension_numbers<[1], [0], [0], [1], [0, 0, 1, 1], [], []>} : vector<40x320xbf16>, vector<320x320xbf16>, vector<40x320xf32> -> vector<40x320xf32>
    %60 = arith.addf %52, %59 : vector<40x320xf32>
    %c0_53 = arith.constant 0 : index
    %c0_54 = arith.constant 0 : index
    %61 = vector.load %arg7[%c0_53, %c0_54] : memref<2x320xf32, #tpu.memory_space<vmem>>, vector<1x320xf32>
    %62 = vector.broadcast %61 : vector<1x320xf32> to vector<40x320xf32>
    %63 = arith.mulf %60, %62 : vector<40x320xf32>
    %c1_55 = arith.constant 1 : index
    %c0_56 = arith.constant 0 : index
    %64 = vector.load %arg7[%c1_55, %c0_56] : memref<2x320xf32, #tpu.memory_space<vmem>>, vector<1x320xf32>
    %65 = vector.broadcast %64 : vector<1x320xf32> to vector<40x320xf32>
    %66 = arith.addf %63, %65 : vector<40x320xf32>
    %cst_57 = arith.constant 0.000000e+00 : f32
    %67 = vector.broadcast %cst_57 : f32 to vector<40x320xf32>
    %68 = arith.maximumf %66, %67 : vector<40x320xf32>
    %69 = arith.truncf %68 : vector<40x320xf32> to vector<40x320xbf16>
    %c0_58 = arith.constant 0 : index
    %c0_59 = arith.constant 0 : index
    %c0_60 = arith.constant 0 : index
    %70 = vector.load %arg8[%c0_58, %c0_59, %c0_60] : memref<3x20x40xbf16, #tpu.memory_space<vmem>>, vector<1x20x40xbf16>
    %71 = vector.shape_cast %70 : vector<1x20x40xbf16> to vector<20x40xbf16>
    %cst_61 = arith.constant dense<0.000000e+00> : vector<20x320xf32>
    %72 = tpu.matmul %71, %69, %cst_61 {dimension_numbers = #tpu.dot_dimension_numbers<[1], [0], [0], [1], [0, 0, 1, 1], [], []>} : vector<20x40xbf16>, vector<40x320xbf16>, vector<20x320xf32> -> vector<20x320xf32>
    %73 = arith.truncf %72 : vector<20x320xf32> to vector<20x320xbf16>
    %c0_62 = arith.constant 0 : index
    %c0_63 = arith.constant 0 : index
    %c0_64 = arith.constant 0 : index
    %74 = vector.load %arg9[%c0_62, %c0_63, %c0_64] : memref<3x320x320xbf16, #tpu.memory_space<vmem>>, vector<1x320x320xbf16>
    %75 = vector.shape_cast %74 : vector<1x320x320xbf16> to vector<320x320xbf16>
    %cst_65 = arith.constant dense<0.000000e+00> : vector<20x320xf32>
    %76 = tpu.matmul %73, %75, %cst_65 {dimension_numbers = #tpu.dot_dimension_numbers<[1], [0], [0], [1], [0, 0, 1, 1], [], []>} : vector<20x320xbf16>, vector<320x320xbf16>, vector<20x320xf32> -> vector<20x320xf32>
    %c1_66 = arith.constant 1 : index
    %c0_67 = arith.constant 0 : index
    %c0_68 = arith.constant 0 : index
    %77 = vector.load %arg8[%c1_66, %c0_67, %c0_68] : memref<3x20x40xbf16, #tpu.memory_space<vmem>>, vector<1x20x40xbf16>
    %78 = vector.shape_cast %77 : vector<1x20x40xbf16> to vector<20x40xbf16>
    %cst_69 = arith.constant dense<0.000000e+00> : vector<20x320xf32>
    %79 = tpu.matmul %78, %69, %cst_69 {dimension_numbers = #tpu.dot_dimension_numbers<[1], [0], [0], [1], [0, 0, 1, 1], [], []>} : vector<20x40xbf16>, vector<40x320xbf16>, vector<20x320xf32> -> vector<20x320xf32>
    %80 = arith.truncf %79 : vector<20x320xf32> to vector<20x320xbf16>
    %c1_70 = arith.constant 1 : index
    %c0_71 = arith.constant 0 : index
    %c0_72 = arith.constant 0 : index
    %81 = vector.load %arg9[%c1_70, %c0_71, %c0_72] : memref<3x320x320xbf16, #tpu.memory_space<vmem>>, vector<1x320x320xbf16>
    %82 = vector.shape_cast %81 : vector<1x320x320xbf16> to vector<320x320xbf16>
    %cst_73 = arith.constant dense<0.000000e+00> : vector<20x320xf32>
    %83 = tpu.matmul %80, %82, %cst_73 {dimension_numbers = #tpu.dot_dimension_numbers<[1], [0], [0], [1], [0, 0, 1, 1], [], []>} : vector<20x320xbf16>, vector<320x320xbf16>, vector<20x320xf32> -> vector<20x320xf32>
    %84 = arith.addf %76, %83 : vector<20x320xf32>
    %c2_74 = arith.constant 2 : index
    %c0_75 = arith.constant 0 : index
    %c0_76 = arith.constant 0 : index
    %85 = vector.load %arg8[%c2_74, %c0_75, %c0_76] : memref<3x20x40xbf16, #tpu.memory_space<vmem>>, vector<1x20x40xbf16>
    %86 = vector.shape_cast %85 : vector<1x20x40xbf16> to vector<20x40xbf16>
    %cst_77 = arith.constant dense<0.000000e+00> : vector<20x320xf32>
    %87 = tpu.matmul %86, %69, %cst_77 {dimension_numbers = #tpu.dot_dimension_numbers<[1], [0], [0], [1], [0, 0, 1, 1], [], []>} : vector<20x40xbf16>, vector<40x320xbf16>, vector<20x320xf32> -> vector<20x320xf32>
    %88 = arith.truncf %87 : vector<20x320xf32> to vector<20x320xbf16>
    %c2_78 = arith.constant 2 : index
    %c0_79 = arith.constant 0 : index
    %c0_80 = arith.constant 0 : index
    %89 = vector.load %arg9[%c2_78, %c0_79, %c0_80] : memref<3x320x320xbf16, #tpu.memory_space<vmem>>, vector<1x320x320xbf16>
    %90 = vector.shape_cast %89 : vector<1x320x320xbf16> to vector<320x320xbf16>
    %cst_81 = arith.constant dense<0.000000e+00> : vector<20x320xf32>
    %91 = tpu.matmul %88, %90, %cst_81 {dimension_numbers = #tpu.dot_dimension_numbers<[1], [0], [0], [1], [0, 0, 1, 1], [], []>} : vector<20x320xbf16>, vector<320x320xbf16>, vector<20x320xf32> -> vector<20x320xf32>
    %92 = arith.addf %84, %91 : vector<20x320xf32>
    %c0_82 = arith.constant 0 : index
    %c0_83 = arith.constant 0 : index
    %93 = vector.load %arg10[%c0_82, %c0_83] : memref<2x320xf32, #tpu.memory_space<vmem>>, vector<1x320xf32>
    %94 = vector.broadcast %93 : vector<1x320xf32> to vector<20x320xf32>
    %95 = arith.mulf %92, %94 : vector<20x320xf32>
    %c1_84 = arith.constant 1 : index
    %c0_85 = arith.constant 0 : index
    %96 = vector.load %arg10[%c1_84, %c0_85] : memref<2x320xf32, #tpu.memory_space<vmem>>, vector<1x320xf32>
    %97 = vector.broadcast %96 : vector<1x320xf32> to vector<20x320xf32>
    %98 = arith.addf %95, %97 : vector<20x320xf32>
    %cst_86 = arith.constant 0.000000e+00 : f32
    %99 = vector.broadcast %cst_86 : f32 to vector<20x320xf32>
    %100 = arith.maximumf %98, %99 : vector<20x320xf32>
    %101 = arith.truncf %100 : vector<20x320xf32> to vector<20x320xbf16>
    %c0_87 = arith.constant 0 : index
    %c0_88 = arith.constant 0 : index
    %c0_89 = arith.constant 0 : index
    %102 = vector.load %arg11[%c0_87, %c0_88, %c0_89] : memref<3x10x20xbf16, #tpu.memory_space<vmem>>, vector<1x10x20xbf16>
    %103 = vector.shape_cast %102 : vector<1x10x20xbf16> to vector<10x20xbf16>
    %cst_90 = arith.constant dense<0.000000e+00> : vector<10x320xf32>
    %104 = tpu.matmul %103, %101, %cst_90 {dimension_numbers = #tpu.dot_dimension_numbers<[1], [0], [0], [1], [0, 0, 1, 1], [], []>} : vector<10x20xbf16>, vector<20x320xbf16>, vector<10x320xf32> -> vector<10x320xf32>
    %105 = arith.truncf %104 : vector<10x320xf32> to vector<10x320xbf16>
    %c0_91 = arith.constant 0 : index
    %c0_92 = arith.constant 0 : index
    %c0_93 = arith.constant 0 : index
    %106 = vector.load %arg12[%c0_91, %c0_92, %c0_93] : memref<3x320x320xbf16, #tpu.memory_space<vmem>>, vector<1x320x320xbf16>
    %107 = vector.shape_cast %106 : vector<1x320x320xbf16> to vector<320x320xbf16>
    %cst_94 = arith.constant dense<0.000000e+00> : vector<10x320xf32>
    %108 = tpu.matmul %105, %107, %cst_94 {dimension_numbers = #tpu.dot_dimension_numbers<[1], [0], [0], [1], [0, 0, 1, 1], [], []>} : vector<10x320xbf16>, vector<320x320xbf16>, vector<10x320xf32> -> vector<10x320xf32>
    %c1_95 = arith.constant 1 : index
    %c0_96 = arith.constant 0 : index
    %c0_97 = arith.constant 0 : index
    %109 = vector.load %arg11[%c1_95, %c0_96, %c0_97] : memref<3x10x20xbf16, #tpu.memory_space<vmem>>, vector<1x10x20xbf16>
    %110 = vector.shape_cast %109 : vector<1x10x20xbf16> to vector<10x20xbf16>
    %cst_98 = arith.constant dense<0.000000e+00> : vector<10x320xf32>
    %111 = tpu.matmul %110, %101, %cst_98 {dimension_numbers = #tpu.dot_dimension_numbers<[1], [0], [0], [1], [0, 0, 1, 1], [], []>} : vector<10x20xbf16>, vector<20x320xbf16>, vector<10x320xf32> -> vector<10x320xf32>
    %112 = arith.truncf %111 : vector<10x320xf32> to vector<10x320xbf16>
    %c1_99 = arith.constant 1 : index
    %c0_100 = arith.constant 0 : index
    %c0_101 = arith.constant 0 : index
    %113 = vector.load %arg12[%c1_99, %c0_100, %c0_101] : memref<3x320x320xbf16, #tpu.memory_space<vmem>>, vector<1x320x320xbf16>
    %114 = vector.shape_cast %113 : vector<1x320x320xbf16> to vector<320x320xbf16>
    %cst_102 = arith.constant dense<0.000000e+00> : vector<10x320xf32>
    %115 = tpu.matmul %112, %114, %cst_102 {dimension_numbers = #tpu.dot_dimension_numbers<[1], [0], [0], [1], [0, 0, 1, 1], [], []>} : vector<10x320xbf16>, vector<320x320xbf16>, vector<10x320xf32> -> vector<10x320xf32>
    %116 = arith.addf %108, %115 : vector<10x320xf32>
    %c2_103 = arith.constant 2 : index
    %c0_104 = arith.constant 0 : index
    %c0_105 = arith.constant 0 : index
    %117 = vector.load %arg11[%c2_103, %c0_104, %c0_105] : memref<3x10x20xbf16, #tpu.memory_space<vmem>>, vector<1x10x20xbf16>
    %118 = vector.shape_cast %117 : vector<1x10x20xbf16> to vector<10x20xbf16>
    %cst_106 = arith.constant dense<0.000000e+00> : vector<10x320xf32>
    %119 = tpu.matmul %118, %101, %cst_106 {dimension_numbers = #tpu.dot_dimension_numbers<[1], [0], [0], [1], [0, 0, 1, 1], [], []>} : vector<10x20xbf16>, vector<20x320xbf16>, vector<10x320xf32> -> vector<10x320xf32>
    %120 = arith.truncf %119 : vector<10x320xf32> to vector<10x320xbf16>
    %c2_107 = arith.constant 2 : index
    %c0_108 = arith.constant 0 : index
    %c0_109 = arith.constant 0 : index
    %121 = vector.load %arg12[%c2_107, %c0_108, %c0_109] : memref<3x320x320xbf16, #tpu.memory_space<vmem>>, vector<1x320x320xbf16>
    %122 = vector.shape_cast %121 : vector<1x320x320xbf16> to vector<320x320xbf16>
    %cst_110 = arith.constant dense<0.000000e+00> : vector<10x320xf32>
    %123 = tpu.matmul %120, %122, %cst_110 {dimension_numbers = #tpu.dot_dimension_numbers<[1], [0], [0], [1], [0, 0, 1, 1], [], []>} : vector<10x320xbf16>, vector<320x320xbf16>, vector<10x320xf32> -> vector<10x320xf32>
    %124 = arith.addf %116, %123 : vector<10x320xf32>
    %c0_111 = arith.constant 0 : index
    %c0_112 = arith.constant 0 : index
    %125 = vector.load %arg13[%c0_111, %c0_112] : memref<2x320xf32, #tpu.memory_space<vmem>>, vector<1x320xf32>
    %126 = vector.broadcast %125 : vector<1x320xf32> to vector<10x320xf32>
    %127 = arith.mulf %124, %126 : vector<10x320xf32>
    %c1_113 = arith.constant 1 : index
    %c0_114 = arith.constant 0 : index
    %128 = vector.load %arg13[%c1_113, %c0_114] : memref<2x320xf32, #tpu.memory_space<vmem>>, vector<1x320xf32>
    %129 = vector.broadcast %128 : vector<1x320xf32> to vector<10x320xf32>
    %130 = arith.addf %127, %129 : vector<10x320xf32>
    %cst_115 = arith.constant 0.000000e+00 : f32
    %131 = vector.broadcast %cst_115 : f32 to vector<10x320xf32>
    %132 = arith.maximumf %130, %131 : vector<10x320xf32>
    %133 = arith.truncf %132 : vector<10x320xf32> to vector<10x320xbf16>
    %134 = vector.extract_strided_slice %133 {offsets = [0, 0], sizes = [2, 320], strides = [1, 1]} : vector<10x320xbf16> to vector<2x320xbf16>
    %c0_116 = arith.constant 0 : index
    %c0_117 = arith.constant 0 : index
    %c0_118 = arith.constant 0 : index
    %135 = vector.load %arg14[%c0_116, %c0_117, %c0_118] : memref<5x320x32xbf16, #tpu.memory_space<vmem>>, vector<1x320x32xbf16>
    %136 = vector.shape_cast %135 : vector<1x320x32xbf16> to vector<320x32xbf16>
    %cst_119 = arith.constant dense<0.000000e+00> : vector<2x32xf32>
    %137 = tpu.matmul %134, %136, %cst_119 {dimension_numbers = #tpu.dot_dimension_numbers<[1], [0], [0], [1], [0, 0, 1, 1], [], []>} : vector<2x320xbf16>, vector<320x32xbf16>, vector<2x32xf32> -> vector<2x32xf32>
    %138 = vector.extract_strided_slice %133 {offsets = [2, 0], sizes = [2, 320], strides = [1, 1]} : vector<10x320xbf16> to vector<2x320xbf16>
    %c1_120 = arith.constant 1 : index
    %c0_121 = arith.constant 0 : index
    %c0_122 = arith.constant 0 : index
    %139 = vector.load %arg14[%c1_120, %c0_121, %c0_122] : memref<5x320x32xbf16, #tpu.memory_space<vmem>>, vector<1x320x32xbf16>
    %140 = vector.shape_cast %139 : vector<1x320x32xbf16> to vector<320x32xbf16>
    %cst_123 = arith.constant dense<0.000000e+00> : vector<2x32xf32>
    %141 = tpu.matmul %138, %140, %cst_123 {dimension_numbers = #tpu.dot_dimension_numbers<[1], [0], [0], [1], [0, 0, 1, 1], [], []>} : vector<2x320xbf16>, vector<320x32xbf16>, vector<2x32xf32> -> vector<2x32xf32>
    %142 = arith.addf %137, %141 : vector<2x32xf32>
    %143 = vector.extract_strided_slice %133 {offsets = [4, 0], sizes = [2, 320], strides = [1, 1]} : vector<10x320xbf16> to vector<2x320xbf16>
    %c2_124 = arith.constant 2 : index
    %c0_125 = arith.constant 0 : index
    %c0_126 = arith.constant 0 : index
    %144 = vector.load %arg14[%c2_124, %c0_125, %c0_126] : memref<5x320x32xbf16, #tpu.memory_space<vmem>>, vector<1x320x32xbf16>
    %145 = vector.shape_cast %144 : vector<1x320x32xbf16> to vector<320x32xbf16>
    %cst_127 = arith.constant dense<0.000000e+00> : vector<2x32xf32>
    %146 = tpu.matmul %143, %145, %cst_127 {dimension_numbers = #tpu.dot_dimension_numbers<[1], [0], [0], [1], [0, 0, 1, 1], [], []>} : vector<2x320xbf16>, vector<320x32xbf16>, vector<2x32xf32> -> vector<2x32xf32>
    %147 = arith.addf %142, %146 : vector<2x32xf32>
    %148 = vector.extract_strided_slice %133 {offsets = [6, 0], sizes = [2, 320], strides = [1, 1]} : vector<10x320xbf16> to vector<2x320xbf16>
    %c3 = arith.constant 3 : index
    %c0_128 = arith.constant 0 : index
    %c0_129 = arith.constant 0 : index
    %149 = vector.load %arg14[%c3, %c0_128, %c0_129] : memref<5x320x32xbf16, #tpu.memory_space<vmem>>, vector<1x320x32xbf16>
    %150 = vector.shape_cast %149 : vector<1x320x32xbf16> to vector<320x32xbf16>
    %cst_130 = arith.constant dense<0.000000e+00> : vector<2x32xf32>
    %151 = tpu.matmul %148, %150, %cst_130 {dimension_numbers = #tpu.dot_dimension_numbers<[1], [0], [0], [1], [0, 0, 1, 1], [], []>} : vector<2x320xbf16>, vector<320x32xbf16>, vector<2x32xf32> -> vector<2x32xf32>
    %152 = arith.addf %147, %151 : vector<2x32xf32>
    %153 = vector.extract_strided_slice %133 {offsets = [8, 0], sizes = [2, 320], strides = [1, 1]} : vector<10x320xbf16> to vector<2x320xbf16>
    %c4 = arith.constant 4 : index
    %c0_131 = arith.constant 0 : index
    %c0_132 = arith.constant 0 : index
    %154 = vector.load %arg14[%c4, %c0_131, %c0_132] : memref<5x320x32xbf16, #tpu.memory_space<vmem>>, vector<1x320x32xbf16>
    %155 = vector.shape_cast %154 : vector<1x320x32xbf16> to vector<320x32xbf16>
    %cst_133 = arith.constant dense<0.000000e+00> : vector<2x32xf32>
    %156 = tpu.matmul %153, %155, %cst_133 {dimension_numbers = #tpu.dot_dimension_numbers<[1], [0], [0], [1], [0, 0, 1, 1], [], []>} : vector<2x320xbf16>, vector<320x32xbf16>, vector<2x32xf32> -> vector<2x32xf32>
    %157 = arith.addf %152, %156 : vector<2x32xf32>
    %c0_134 = arith.constant 0 : index
    %c0_135 = arith.constant 0 : index
    %158 = vector.load %arg15[%c0_134, %c0_135] : memref<1x32xf32, #tpu.memory_space<vmem>>, vector<1x32xf32>
    %159 = vector.broadcast %158 : vector<1x32xf32> to vector<2x32xf32>
    %160 = arith.addf %157, %159 : vector<2x32xf32>
    %cst_136 = arith.constant 0.000000e+00 : f32
    %161 = vector.broadcast %cst_136 : f32 to vector<2x32xf32>
    %162 = arith.maximumf %160, %161 : vector<2x32xf32>
    %c0_137 = arith.constant 0 : index
    %c0_138 = arith.constant 0 : index
    %163 = vector.load %arg16[%c0_137, %c0_138] : memref<32x32xf32, #tpu.memory_space<vmem>>, vector<32x32xf32>
    %cst_139 = arith.constant dense<0.000000e+00> : vector<2x32xf32>
    %164 = tpu.matmul %162, %163, %cst_139 {dimension_numbers = #tpu.dot_dimension_numbers<[1], [0], [0], [1], [0, 0, 1, 1], [], []>} : vector<2x32xf32>, vector<32x32xf32>, vector<2x32xf32> -> vector<2x32xf32>
    %c0_140 = arith.constant 0 : index
    %c0_141 = arith.constant 0 : index
    %165 = vector.load %arg1[%c0_140, %c0_141] : memref<2x32xf32, #tpu.memory_space<vmem>>, vector<2x32xf32>
    %c0_142 = arith.constant 0 : index
    %c0_143 = arith.constant 0 : index
    %166 = vector.load %arg17[%c0_142, %c0_143] : memref<32x32xf32, #tpu.memory_space<vmem>>, vector<32x32xf32>
    %cst_144 = arith.constant dense<0.000000e+00> : vector<2x32xf32>
    %167 = tpu.matmul %165, %166, %cst_144 {dimension_numbers = #tpu.dot_dimension_numbers<[1], [0], [0], [1], [0, 0, 1, 1], [], []>} : vector<2x32xf32>, vector<32x32xf32>, vector<2x32xf32> -> vector<2x32xf32>
    %168 = arith.addf %164, %167 : vector<2x32xf32>
    %c0_145 = arith.constant 0 : index
    %c0_146 = arith.constant 0 : index
    %169 = vector.load %arg18[%c0_145, %c0_146] : memref<1x32xf32, #tpu.memory_space<vmem>>, vector<1x32xf32>
    %170 = vector.broadcast %169 : vector<1x32xf32> to vector<2x32xf32>
    %171 = arith.addf %168, %170 : vector<2x32xf32>
    %172 = math.tanh %171 : vector<2x32xf32>
    %c0_147 = arith.constant 0 : index
    %c0_148 = arith.constant 0 : index
    %173 = vector.load %arg23[%c0_147, %c0_148] : memref<2x32xf32, #tpu.memory_space<vmem>>, vector<2x32xf32>
    tpu.vector_store %arg23[%c0_147, %c0_148], %172 {strides = array<i32>} : memref<2x32xf32, #tpu.memory_space<vmem>>, vector<2x32xf32>,
    %c0_149 = arith.constant 0 : index
    %c0_150 = arith.constant 0 : index
    %174 = vector.load %arg19[%c0_149, %c0_150] : memref<32x2xf32, #tpu.memory_space<vmem>>, vector<32x2xf32>
    %cst_151 = arith.constant dense<0.000000e+00> : vector<2x2xf32>
    %175 = tpu.matmul %172, %174, %cst_151 {dimension_numbers = #tpu.dot_dimension_numbers<[1], [0], [0], [1], [0, 0, 1, 1], [], []>} : vector<2x32xf32>, vector<32x2xf32>, vector<2x2xf32> -> vector<2x2xf32>
    %c0_152 = arith.constant 0 : index
    %c0_153 = arith.constant 0 : index
    %176 = vector.load %arg20[%c0_152, %c0_153] : memref<1x2xf32, #tpu.memory_space<vmem>>, vector<1x2xf32>
    %177 = vector.broadcast %176 : vector<1x2xf32> to vector<2x2xf32>
    %178 = arith.addf %175, %177 : vector<2x2xf32>
    %cst_154 = arith.constant 0.000000e+00 : f32
    %179 = vector.broadcast %cst_154 : f32 to vector<2x2xf32>
    %180 = arith.subf %179, %178 : vector<2x2xf32>
    %181 = math.exp %180 : vector<2x2xf32>
    %cst_155 = arith.constant 1.000000e+00 : f32
    %182 = vector.broadcast %cst_155 : f32 to vector<2x2xf32>
    %183 = arith.addf %182, %181 : vector<2x2xf32>
    %cst_156 = arith.constant 1.000000e+00 : f32
    %184 = vector.broadcast %cst_156 : f32 to vector<2x2xf32>
    %185 = arith.divf %184, %183 : vector<2x2xf32>
    %c0_157 = arith.constant 0 : index
    %c0_158 = arith.constant 0 : index
    %186 = vector.load %arg21[%c0_157, %c0_158] : memref<1x2xf32, #tpu.memory_space<vmem>>, vector<1x2xf32>
    %187 = vector.broadcast %186 : vector<1x2xf32> to vector<2x2xf32>
    %188 = arith.mulf %185, %187 : vector<2x2xf32>
    %cst_159 = arith.constant 1.000000e+00 : f32
    %189 = vector.broadcast %cst_159 : f32 to vector<1x2xf32>
    %190 = arith.subf %189, %186 : vector<1x2xf32>
    %191 = vector.broadcast %190 : vector<1x2xf32> to vector<2x2xf32>
    %192 = arith.mulf %178, %191 : vector<2x2xf32>
    %193 = arith.addf %188, %192 : vector<2x2xf32>
    %c0_160 = arith.constant 0 : index
    %c0_161 = arith.constant 0 : index
    %194 = vector.load %arg22[%c0_160, %c0_161] : memref<2x2xf32, #tpu.memory_space<vmem>>, vector<2x2xf32>
    tpu.vector_store %arg22[%c0_160, %c0_161], %193 {strides = array<i32>} : memref<2x2xf32, #tpu.memory_space<vmem>>, vector<2x2xf32>,
    return
  }
}

</mosaic_0001>

<bundles_post_ra>
// kernel: model_forward.1
= control target key start
LH: loop header
LB: loop body
LE: loop exit
PB: predicated region body
PF: predicated region fallthrough
CT: control target
= control target key end

     0   :  { %s15298_s0 = inlined_call_operand.vmem [shape: f32[160,80], index: 0, kind: input, shape index: {}]   ;;  %s15299_s1 = inlined_call_operand.vmem [shape: f32[2,32], index: 1, kind: input, shape index: {}]   ;;  %s15300_s2 = inlined_call_operand.vmem [shape: bf16[3,80,160], index: 2, kind: input, shape index: {}]   ;;  %s15301_s3 = inlined_call_operand.vmem [shape: bf16[3,80,320], index: 3, kind: input, shape index: {}]   ;;  %s15302_s4 = inlined_call_operand.vmem [shape: f32[2,320], index: 4, kind: input, shape index: {}]   ;;  %s15303_s5 = inlined_call_operand.vmem [shape: bf16[3,40,80], index: 5, kind: input, shape index: {}]   ;;  %s15304_s6 = inlined_call_operand.hbm [shape: bf16[3,320,320], index: 6, kind: input, shape index: {}]   ;;  %s15305_s7 = inlined_call_operand.vmem [shape: f32[2,320], index: 7, kind: input, shape index: {}]   ;;  %s15306_s8 = inlined_call_operand.vmem [shape: bf16[3,20,40], index: 8, kind: input, shape index: {}]   ;;  %s15307_s9 = inlined_call_operand.hbm [shape: bf16[3,320,320], index: 9, kind: input, shape index: {}]   ;;  %s15308_s10 = inlined_call_operand.vmem [shape: f32[2,320], index: 10, kind: input, shape index: {}]   ;;  %s15309_s11 = inlined_call_operand.vmem [shape: bf16[3,10,20], index: 11, kind: input, shape index: {}]   ;;  %s15310_s12 = inlined_call_operand.hbm [shape: bf16[3,320,320], index: 12, kind: input, shape index: {}]   ;;  %s15311_s13 = inlined_call_operand.vmem [shape: f32[2,320], index: 13, kind: input, shape index: {}]   ;;  %s15312_s14 = inlined_call_operand.vmem [shape: bf16[5,320,32], index: 14, kind: input, shape index: {}]   ;;  %s15313_s15 = inlined_call_operand.vmem [shape: f32[1,32], index: 15, kind: input, shape index: {}]   ;;  %s15314_s16 = inlined_call_operand.vmem [shape: f32[32,32], index: 16, kind: input, shape index: {}]   ;;  %s15315_s17 = inlined_call_operand.vmem [shape: f32[32,32], index: 17, kind: input, shape index: {}]   ;;  %s15316_s18 = inlined_call_operand.vmem [shape: f32[1,32], index: 18, kind: input, shape index: {}]   ;;  %s15317_s19 = inlined_call_operand.vmem [shape: f32[32,2], index: 19, kind: input, shape index: {}]   ;;  %s15318_s20 = inlined_call_operand.vmem [shape: f32[1,2], index: 20, kind: input, shape index: {}]   ;;  %s15319_s21 = inlined_call_operand.vmem [shape: f32[1,2], index: 21, kind: input, shape index: {}]   ;;  %s15320_s22 = inlined_call_operand.vmem [shape: f32[2,2], index: 22, kind: output, shape index: {0}]   ;;  %s15321_s23 = inlined_call_operand.hbm [shape: f32[2,32], index: 23, kind: output, shape index: {1}]  }
   0x1   :  { %15329 = sst [smem:[#allocation12_spill]] %s15298_s0 }
   0x2   :  { %15330 = sst [smem:[#allocation13_spill]] %s15299_s1 }
   0x3   :  { %15331 = sst [smem:[#allocation14_spill]] %s15300_s2 }
   0x4   :  { %15332 = sst [smem:[#allocation15_spill]] %s15301_s3 }
   0x5   :  { %15333 = sst [smem:[#allocation16_spill]] %s15302_s4 }
   0x6   :  { %15334 = sst [smem:[#allocation17_spill]] %s15303_s5 }
   0x7   :  { %15335 = sst [smem:[#allocation18_spill]] %s15304_s6 }
   0x8   :  { %15336 = sst [smem:[#allocation19_spill]] %s15305_s7 }
   0x9   :  { %29 = vsyncpa [#allocation3], 0 }
   0xa   :  { %30 = vsyncpa [#allocation6], 0 }
   0xb   :  { %31 = vsyncpa [#allocation4], 0  ;;  %s13460_s4 = smov [#allocation5]   ;;  %s13461_s24 = smov [#allocation2]  }
   0xc   :  { %s65_s30 = sshll.u32 %s13460_s4, 4  ;;  %s49_s25 = sshll.u32 %s13461_s24, 4  ;;  %s66_s30 = int_to_ptr.vmem [resolvable:$true] %s65_s30  ;;  %s13590_s25 = int_to_ptr.vmem [resolvable:$true] %s49_s25 }
   0xd   :  { %s13366_s26 = scalar_lea.hbm %s15307_s9, 23040 }
   0xe   :  { %p13367_p0 = scmp.ne.s32.totalorder %s15307_s9, %s13366_s26  ;;  %p13370_p1 = scmp.lt.u32.totalorder %s13366_s26, %s15307_s9 }
  0x10   :  { %p13372_p2 = pnand %p13370_p1, %p13367_p0 }
  0x12   :  { %13375 = shalt.err (!%p13372_p2)
}
  0x13   :  { %s13376_s28 = scalar_lea.vmem %s66_s30, 23040  ;;  %p13381_p4 = scmp.lt.s32.totalorder %s66_s30, %s66_s30 }
  0x14   :  { %p13377_p3 = scmp.ne.s32.totalorder %s66_s30, %s13376_s28  ;;  %p13382_p5 = scmp.lt.s32.totalorder %s13376_s28, %s13376_s28 }
  0x16   :  { %p13383_p6 = por %p13382_p5, %p13381_p4 }
  0x18   :  { %p13384_p7 = pnand %p13383_p6, %p13377_p3 }
  0x1a   :  { %13387 = shalt.err (!%p13384_p7)
}
  0x1b   :  { %s13462_s29 = smov 192   ;;  %s13463_s3 = smov 12  }
  0x1c   :  { %71 = dma.hbm_to_vmem [thread:$0]  %s15307_s9, 23040, %s66_s30, [#allocation6], %s13462_s29, %s13462_s29, %s13463_s3  }
  0x1d   :  { %s15337_s1 = sld [smem:[#allocation18_spill]] }
  0x23   :  { %s13388_s26 = scalar_lea.hbm %s15337_s1, 23040 }
  0x24   :  { %p13389_p8 = scmp.ne.s32.totalorder %s15337_s1, %s13388_s26  ;;  %p13392_p9 = scmp.lt.u32.totalorder %s13388_s26, %s15337_s1 }
  0x26   :  { %p13394_p10 = pnand %p13392_p9, %p13389_p8 }
  0x28   :  { %13397 = shalt.err (!%p13394_p10)
}
  0x29   :  { %s13398_s28 = scalar_lea.vmem %s13590_s25, 23040  ;;  %p13403_p12 = scmp.lt.s32.totalorder %s13590_s25, %s13590_s25 }
  0x2a   :  { %p13399_p11 = scmp.ne.s32.totalorder %s13590_s25, %s13398_s28  ;;  %p13404_p13 = scmp.lt.s32.totalorder %s13398_s28, %s13398_s28 }
  0x2c   :  { %p13405_p0 = por %p13404_p13, %p13403_p12 }
  0x2e   :  { %p13406_p1 = pnand %p13405_p0, %p13399_p11 }
  0x30   :  { %13409 = shalt.err (!%p13406_p1)
}
  0x31   :  { %55 = dma.hbm_to_vmem [thread:$0]  %s15337_s1, 23040, %s13590_s25, [#allocation3], %s13462_s29, %s13462_s29, %s13463_s3  }
  0x32   :  { %s13464_s0 = smov [#allocation7]   ;;  %s13410_s26 = scalar_lea.hbm %s15310_s12, 23040 }
  0x33   :  { %s81_s4 = sshll.u32 %s13464_s0, 4  ;;  %p13411_p2 = scmp.ne.s32.totalorder %s15310_s12, %s13410_s26  ;;  %s82_s4 = int_to_ptr.vmem [resolvable:$true] %s81_s4 }
  0x34   :  { %p13414_p3 = scmp.lt.u32.totalorder %s13410_s26, %s15310_s12 }
  0x36   :  { %p13416_p4 = pnand %p13414_p3, %p13411_p2 }
  0x38   :  { %13419 = shalt.err (!%p13416_p4)
}
  0x39   :  { %s13420_s28 = scalar_lea.vmem %s82_s4, 23040  ;;  %p13425_p6 = scmp.lt.s32.totalorder %s82_s4, %s82_s4 }
  0x3a   :  { %p13421_p5 = scmp.ne.s32.totalorder %s82_s4, %s13420_s28  ;;  %p13426_p7 = scmp.lt.s32.totalorder %s13420_s28, %s13420_s28 }
  0x3c   :  { %p13427_p8 = por %p13426_p7, %p13425_p6 }
  0x3e   :  { %p13428_p9 = pnand %p13427_p8, %p13421_p5 }
  0x40   :  { %13431 = shalt.err (!%p13428_p9)
}
  0x41   :  { %87 = dma.hbm_to_vmem [thread:$0]  %s15310_s12, 23040, %s82_s4, [#allocation6], %s13462_s29, %s13462_s29, %s13463_s3  }
  0x42   :  { %13454 = dma.done.wait [#allocation3], 23040  }
  0x43   :  { %13455 = vsyncadd [#allocation3], 4294944256 }
  0x44   :  { %13456 = dma.done.wait [#allocation6], 46080  }
  0x45   :  { %13457 = vsyncadd [#allocation6], 4294921216  ;;  %v13465_v0 = vmov 0   ;;  %s15338_s0 = sld [smem:[#allocation12_spill]]  ;;  %vm241_vm0 = vcmask 261120   ;;  %s15339_s25 = sld [smem:[#allocation14_spill]] }
  0x46   :  { %426 = vmatprep.subr.bf16.mxu1 %v13465_v0  ;;  %257 = vmatprep.subr.bf16.mxu0 %v13465_v0  ;;  %s15340_s1 = sld [smem:[#allocation15_spill]]  ;;  %vm13467_vm1 = vmmov 0   ;;  %vm605_vm2 = vcmask 654336   ;;  %s15341_s4 = sld [smem:[#allocation16_spill]]  ;;  %vm2407_vm3 = vcmask 523264   ;;  %vm4127_vm4 = vcmask 326656  }
  0x47   :  { %s15342_s28 = sld [smem:[#allocation17_spill]]  ;;  %s15343_s5 = sld [smem:[#allocation19_spill]]  ;;  %vm4134_vm5 = vcmask 1043456   ;;  %vm6397_vm6 = vcmask 1041408   ;;  %vm6393_vm7 = vcmask 162816   ;;  %vm9885_vm8 = vcmask 254976  }
  0x48   :  { %s15344_s9 = sld [smem:[#allocation13_spill]] }
  0x4b   :  { %v116_v1 = vld [vmem:[%s15338_s0] sm:$0xff]  ;;  %v117_v2 = vld [vmem:[%s15338_s0 + $0x8] sm:$0xff]  ;;  %v118_v3 = vld [vmem:[%s15338_s0 + $0x10] sm:$0xff] }
  0x4c   :  { %v10016_v4 = vadd.f32 -144.07124, %v116_v1  ;;  %v10017_v5 = vadd.f32 -144.07124, %v117_v2  ;;  %v119_v6 = vld [vmem:[%s15338_s0 + $0x18] sm:$0xff]  ;;  %v120_v7 = vld [vmem:[%s15338_s0 + $0x20] sm:$0xff] }
  0x4d   :  { %v10018_v8 = vadd.f32 -144.07124, %v118_v3  ;;  %v10019_v9 = vadd.f32 -144.07124, %v119_v6  ;;  %v121_v10 = vld [vmem:[%s15338_s0 + $0x28] sm:$0xff]  ;;  %v122_v11 = vld [vmem:[%s15338_s0 + $0x30] sm:$0xff] }
  0x4e   :  { %v156_v12 = vmul.f32 0.21666338, %v10016_v4  ;;  %v157_v13 = vmul.f32 0.21666338, %v10017_v5  ;;  %v10020_v14 = vadd.f32 -144.07124, %v120_v7 }
  0x4f   :  { %v158_v15 = vmul.f32 0.21666338, %v10018_v8  ;;  %v159_v16 = vmul.f32 0.21666338, %v10019_v9  ;;  %v10021_v17 = vadd.f32 -144.07124, %v121_v10 }
  0x50   :  { %v13665_v18 = vpack.c.bf16 %v157_v13, %v156_v12  ;;  %v123_v19 = vld [vmem:[%s15338_s0 + $0x38] sm:$0xff]  ;;  %v160_v20 = vmul.f32 0.21666338, %v10020_v14  ;;  %v10022_v21 = vadd.f32 -144.07124, %v122_v11  ;;  %v124_v25 = vld [vmem:[%s15338_s0 + $0x40] sm:$0xff] }
  0x51   :  { %v13671_v22 = vpack.c.bf16 %v159_v16, %v158_v15  ;;  %v161_v23 = vmul.f32 0.21666338, %v10021_v17  ;;  %v10023_v24 = vadd.f32 -144.07124, %v123_v19  ;;  %v125_v26 = vld [vmem:[%s15338_s0 + $0x48] sm:$0xff]  ;;  %v126_v28 = vld [vmem:[%s15338_s0 + $0x50] sm:$0xff] }
  0x52   :  { %427 = vmatpush1.bf16.msra.mxu1 %v13665_v18  ;;  %258 = vmatpush1.bf16.msra.mxu0 %v13665_v18  ;;  %v10024_v27 = vadd.f32 -144.07124, %v124_v25  ;;  %v162_v30 = vmul.f32 0.21666338, %v10022_v21  ;;  %v10025_v32 = vadd.f32 -144.07124, %v125_v26 }
  0x53   :  { %428 = vmatprep.subr.bf16.mxu1 %v13465_v0  ;;  %259 = vmatprep.subr.bf16.mxu0 %v13465_v0  ;;  %v13686_v29 = vpack.c.bf16 %v161_v23, %v160_v20  ;;  %v163_v31 = vmul.f32 0.21666338, %v10023_v24  ;;  %v127_v33 = vld [vmem:[%s15338_s0 + $0x58] sm:$0xff]  ;;  %v10026_v35 = vadd.f32 -144.07124, %v126_v28  ;;  %v128_v36 = vld [vmem:[%s15338_s0 + $0x60] sm:$0xff] }
  0x54   :  { %v164_v34 = vmul.f32 0.21666338, %v10024_v27  ;;  %v165_v38 = vmul.f32 0.21666338, %v10025_v32  ;;  %v10027_v39 = vadd.f32 -144.07124, %v127_v33 }
  0x55   :  { %v13698_v37 = vpack.c.bf16 %v163_v31, %v162_v30  ;;  %v129_v40 = vld [vmem:[%s15338_s0 + $0x68] sm:$0xff]  ;;  %v10028_v41 = vadd.f32 -144.07124, %v128_v36  ;;  %v12419_v42 = vld [vmem:[%s15339_s25 + $0x54] ss:$8 sps:$4 sm:$0xff]   ;;  %v132_v52 = vld [vmem:[%s15338_s0 + $0x80] sm:$0xff] }
  0x56   :  { %429 = vmatpush1.bf16.msra.mxu1 %v13671_v22  ;;  %260 = vmatpush1.bf16.msra.mxu0 %v13671_v22  ;;  %v166_v43 = vmul.f32 0.21666338, %v10026_v35  ;;  %v130_v44 = vld [vmem:[%s15338_s0 + $0x70] sm:$0xff]  ;;  %v13713_v45 = vpack.c.bf16 %v165_v38, %v164_v34  ;;  %v167_v46 = vmul.f32 0.21666338, %v10027_v39  ;;  %v131_v48 = vld [vmem:[%s15338_s0 + $0x78] sm:$0xff] }
  0x57   :  { %430 = vmatprep.subr.bf16.mxu1 %v13465_v0  ;;  %261 = vmatprep.subr.bf16.mxu0 %v13465_v0  ;;  %v10029_v47 = vadd.f32 -144.07124, %v129_v40  ;;  %v168_v49 = vmul.f32 0.21666338, %v10028_v41  ;;  %v10030_v50 = vadd.f32 -144.07124, %v130_v44 }
  0x58   :  { %10071 = vmatprep.mubr.msk.bf16.mxu1 %vm241_vm0, %v12419_v42  ;;  %v10031_v51 = vadd.f32 -144.07124, %v131_v48  ;;  %v13726_v53 = vpack.c.bf16 %v167_v46, %v166_v43  ;;  %v133_v55 = vld [vmem:[%s15338_s0 + $0x88] sm:$0xff]  ;;  %v10032_v58 = vadd.f32 -144.07124, %v132_v52  ;;  %v134_v59 = vld [vmem:[%s15338_s0 + $0x90] sm:$0xff] }
  0x59   :  { %v169_v54 = vmul.f32 0.21666338, %v10029_v47  ;;  %v12434_v56 = vld [vmem:[%s15339_s25 + $0x4] ss:$8 sps:$4 sm:$0xff]   ;;  %v170_v57 = vmul.f32 0.21666338, %v10030_v50 }
  0x5a   :  { %431 = vmatpush1.bf16.msra.mxu1 %v13686_v29  ;;  %262 = vmatpush1.bf16.msra.mxu0 %v13686_v29  ;;  %v171_v61 = vmul.f32 0.21666338, %v10031_v51  ;;  %v10033_v62 = vadd.f32 -144.07124, %v133_v55  ;;  %v135_v63 = vld [vmem:[%s15338_s0 + $0x98] sm:$0xff]  ;;  %v13466_v19 = vmov 0.0  }
  0x5b   :  { %432 = vmatprep.subr.bf16.mxu1 %v13465_v0  ;;  %263 = vmatprep.subr.bf16.mxu0 %v13465_v0  ;;  %v13742_v60 = vpack.c.bf16 %v169_v54, %v168_v49  ;;  %v172_v1 = vmul.f32 0.21666338, %v10032_v58  ;;  %v10034_v2 = vadd.f32 -144.07124, %v134_v59  ;;  %v10035_v5 = vadd.f32 -144.07124, %v135_v63 }
  0x5c   :  { %10046 = vmatprep.mubr.msk.bf16.mxu0 %vm241_vm0, %v12434_v56  ;;  %v13751_v3 = vpack.c.bf16 %v171_v61, %v170_v57  ;;  %v173_v4 = vmul.f32 0.21666338, %v10033_v62  ;;  %v12449_v10 = vld [vmem:[%s15340_s1 + $0x7c] ss:$12 sps:$4 sm:$0xff]   ;;  %v12417_v11 = vld [vmem:[%s15339_s25 + $0x50] ss:$8 sps:$4 sm:$0xff]  }
  0x5d   :  { %v174_v6 = vmul.f32 0.21666338, %v10034_v2  ;;  %v175_v8 = vmul.f32 0.21666338, %v10035_v5  ;;  %v12420_v12 = vld [vmem:[%s15339_s25 + $0x64] ss:$8 sps:$4 sm:$0xff]  }
  0x5e   :  { %433 = vmatpush1.bf16.msra.mxu1 %v13698_v37  ;;  %264 = vmatpush1.bf16.msra.mxu0 %v13698_v37  ;;  %v13757_v7 = vpack.c.bf16 %v173_v4, %v172_v1  ;;  %v12432_v13 = vld [vmem:[%s15339_s25] ss:$8 sps:$4 sm:$0xff]   ;;  %v12435_v14 = vld [vmem:[%s15339_s25 + $0x14] ss:$8 sps:$4 sm:$0xff]   ;;  %v12447_v15 = vld [vmem:[%s15340_s1 + $0x78] ss:$12 sps:$4 sm:$0xff]  }
  0x5f   :  { %434 = vmatprep.subr.bf16.mxu1 %v13465_v0  ;;  %265 = vmatprep.subr.bf16.mxu0 %v13465_v0  ;;  %v13763_v9 = vpack.c.bf16 %v175_v8, %v174_v6  ;;  %v12452_v16 = vld [vmem:[%s15340_s1 + $0x94] ss:$12 sps:$4 sm:$0xff]   ;;  %v12450_v20 = vld [vmem:[%s15340_s1 + $0x90] ss:$12 sps:$4 sm:$0xff]   ;;  %v12456_v21 = vld [vmem:[%s15340_s1 + $0xac] ss:$12 sps:$4 sm:$0xff]  }
  0x60   :  { %v12453_v17 = vld [vmem:[%s15340_s1 + $0x80] ss:$12 sps:$4 sm:$0xff]   ;;  %v12457_v23 = vld [vmem:[%s15340_s1 + $0x98] ss:$12 sps:$4 sm:$0xff]   ;;  %v12423_v25 = vld [vmem:[%s15339_s25 + $0x74] ss:$8 sps:$4 sm:$0xff]  }
  0x61   :  { %v12422_v24 = vld [vmem:[%s15339_s25 + $0x60] ss:$8 sps:$4 sm:$0xff]   ;;  %v12437_v26 = vld [vmem:[%s15339_s25 + $0x10] ss:$8 sps:$4 sm:$0xff]   ;;  %v12438_v27 = vld [vmem:[%s15339_s25 + $0x24] ss:$8 sps:$4 sm:$0xff]  }
  0x62   :  { %435 = vmatpush1.bf16.msra.mxu1 %v13713_v45  ;;  %266 = vmatpush1.bf16.msra.mxu0 %v13713_v45  ;;  %v12454_v28 = vld [vmem:[%s15340_s1 + $0xa8] ss:$12 sps:$4 sm:$0xff]   ;;  %v12458_v30 = vld [vmem:[%s15340_s1 + $0xb0] ss:$12 sps:$4 sm:$0xff]   ;;  %v12459_v32 = vld [vmem:[%s15340_s1 + $0xc0] ss:$12 sps:$4 sm:$0xff]  }
  0x63   :  { %436 = vmatprep.subr.bf16.mxu1 %v13465_v0  ;;  %267 = vmatprep.subr.bf16.mxu0 %v13465_v0  ;;  %v12461_v31 = vld [vmem:[%s15340_s1 + $0xc4] ss:$12 sps:$4 sm:$0xff]   ;;  %v12462_v33 = vld [vmem:[%s15340_s1 + $0xc8] ss:$12 sps:$4 sm:$0xff]   ;;  %v12466_v48 = vld [vmem:[%s15340_s1 + $0xe0] ss:$12 sps:$4 sm:$0xff]  }
  0x64   :  { %v12425_v34 = vld [vmem:[%s15339_s25 + $0x70] ss:$8 sps:$4 sm:$0xff]   ;;  %v12426_v35 = vld [vmem:[%s15339_s25 + $0x84] ss:$8 sps:$4 sm:$0xff]   ;;  %v12440_v36 = vld [vmem:[%s15339_s25 + $0x20] ss:$8 sps:$4 sm:$0xff]  }
  0x65   :  { %v12441_v38 = vld [vmem:[%s15339_s25 + $0x34] ss:$8 sps:$4 sm:$0xff]   ;;  %v12428_v39 = vld [vmem:[%s15339_s25 + $0x80] ss:$8 sps:$4 sm:$0xff]   ;;  %v12443_v41 = vld [vmem:[%s15339_s25 + $0x30] ss:$8 sps:$4 sm:$0xff]  }
  0x66   :  { %437 = vmatpush1.bf16.msra.mxu1 %v13726_v53  ;;  %268 = vmatpush1.bf16.msra.mxu0 %v13726_v53  ;;  %v12429_v40 = vld [vmem:[%s15339_s25 + $0x94] ss:$8 sps:$4 sm:$0xff]   ;;  %v12444_v42 = vld [vmem:[%s15339_s25 + $0x44] ss:$8 sps:$4 sm:$0xff]   ;;  %v12431_v43 = vld [vmem:[%s15339_s25 + $0x90] ss:$8 sps:$4 sm:$0xff]  }
  0x67   :  { %438 = vmatprep.subr.bf16.mxu1 %v13465_v0  ;;  %269 = vmatprep.subr.bf16.mxu0 %v13465_v0  ;;  %v12446_v44 = vld [vmem:[%s15339_s25 + $0x40] ss:$8 sps:$4 sm:$0xff]   ;;  %v12463_v47 = vld [vmem:[%s15340_s1 + $0xd8] ss:$12 sps:$4 sm:$0xff]  }
  0x68   :  { %v12465_v46 = vld [vmem:[%s15340_s1 + $0xdc] ss:$12 sps:$4 sm:$0xff]   ;;  %v12469_v49 = vld [vmem:[%s15340_s1 + $0x4] ss:$12 sps:$4 sm:$0xff]   ;;  %v12467_v52 = vld [vmem:[%s15340_s1] ss:$12 sps:$4 sm:$0xff]  }
  0x69   :  { %v12473_v54 = vld [vmem:[%s15340_s1 + $0x8] ss:$12 sps:$4 sm:$0xff]   ;;  %v12470_v2 = vld [vmem:[%s15340_s1 + $0x18] ss:$12 sps:$4 sm:$0xff]   ;;  %v12477_v4 = vld [vmem:[%s15340_s1 + $0x20] ss:$12 sps:$4 sm:$0xff]  }
  0x6a   :  { %439 = vmatpush1.bf16.msra.mxu1 %v13742_v60  ;;  %270 = vmatpush1.bf16.msra.mxu0 %v13742_v60  ;;  %v12472_v57 = vld [vmem:[%s15340_s1 + $0x1c] ss:$12 sps:$4 sm:$0xff]   ;;  %v12476_v5 = vld [vmem:[%s15340_s1 + $0x34] ss:$12 sps:$4 sm:$0xff]  }
  0x6b   :  { %440 = vmatprep.subr.bf16.mxu1 %v13465_v0  ;;  %271 = vmatprep.subr.bf16.mxu0 %v13465_v0 }
  0x6e   :  { %441 = vmatpush1.bf16.msra.mxu1 %v13751_v3  ;;  %272 = vmatpush1.bf16.msra.mxu0 %v13751_v3 }
  0x6f   :  { %442 = vmatprep.subr.bf16.mxu1 %v13465_v0  ;;  %273 = vmatprep.subr.bf16.mxu0 %v13465_v0 }
  0x72   :  { %443 = vmatpush1.bf16.msra.mxu1 %v13757_v7  ;;  %274 = vmatpush1.bf16.msra.mxu0 %v13757_v7 }
  0x73   :  { %444 = vmatprep.subr.bf16.mxu1 %v13465_v0  ;;  %275 = vmatprep.subr.bf16.mxu0 %v13465_v0 }
  0x76   :  { %445 = vmatpush1.bf16.msra.mxu1 %v13763_v9  ;;  %276 = vmatpush1.bf16.msra.mxu0 %v13763_v9 }
  0x77   :  { %11681 = vmatprep.subr.bf16.mxu1 %v13466_v19  ;;  %621 = vmatprep.subr.bf16.mxu0 %v12449_v10  ;;  %v12474_v10 = vld [vmem:[%s15340_s1 + $0x30] ss:$12 sps:$4 sm:$0xff]  }
  0x79   :  { %459 = vmatmul.mubr.bf16.vlgmr.msra.gmra.mrb[0].mxu1 %v12417_v11  ;;  %290 = vmatmul.mubr.bf16.vlgmr.msra.gmra.mrb[0].mxu0 %v12432_v13  ;;  %v12478_v11 = vld [vmem:[%s15340_s1 + $0x38] ss:$12 sps:$4 sm:$0xff]  }
  0x7a   :  { %10072 = vmatprep.mubr.msk.bf16.mxu1 %vm241_vm0, %v12420_v12  ;;  %10047 = vmatprep.mubr.msk.bf16.mxu0 %vm241_vm0, %v12435_v14  ;;  %v12481_v14 = vld [vmem:[%s15340_s1 + $0x4c] ss:$12 sps:$4 sm:$0xff]  }
  0x7b   :  { %622 = vmatpush1.bf16.msra.mxu0 %v12447_v15  ;;  %11682 = vmatpush3.bf16.msra.mxu1 %v12453_v17 }
  0x7c   :  { %623 = vmatprep.subr.bf16.mxu0 %v12452_v16  ;;  %11683 = vmatprep.subr.bf16.mxu1 %v13466_v19 }
  0x7f   :  { %624 = vmatpush1.bf16.msra.mxu0 %v12450_v20  ;;  %11684 = vmatpush3.bf16.msra.mxu1 %v12457_v23 }
  0x80   :  { %625 = vmatprep.subr.bf16.mxu0 %v12456_v21  ;;  %11685 = vmatprep.subr.bf16.mxu1 %v13466_v19 }
  0x81   :  { %467 = vmatmul.mubr.bf16.gmra.mrb[4].mxu1 %v12422_v24  ;;  %298 = vmatmul.mubr.bf16.gmra.mrb[4].mxu0 %v12437_v26  ;;  %v12479_v24 = vld [vmem:[%s15340_s1 + $0x48] ss:$12 sps:$4 sm:$0xff]   ;;  %v12485_v26 = vld [vmem:[%s15340_s1 + $0x64] ss:$12 sps:$4 sm:$0xff]  }
  0x82   :  { %10073 = vmatprep.mubr.msk.bf16.mxu1 %vm241_vm0, %v12423_v25  ;;  %10048 = vmatprep.mubr.msk.bf16.mxu0 %vm241_vm0, %v12438_v27  ;;  %v12482_v25 = vld [vmem:[%s15340_s1 + $0x50] ss:$12 sps:$4 sm:$0xff]  }
  0x83   :  { %626 = vmatpush1.bf16.msra.mxu0 %v12454_v28  ;;  %11686 = vmatpush3.bf16.msra.mxu1 %v12458_v30  ;;  %v12483_v30 = vld [vmem:[%s15340_s1 + $0x60] ss:$12 sps:$4 sm:$0xff]  }
  0x84   :  { %627 = vmatprep.subr.bf16.mxu0 %v12461_v31  ;;  %11687 = vmatprep.subr.bf16.mxu1 %v13466_v19  ;;  %v12486_v31 = vld [vmem:[%s15340_s1 + $0x68] ss:$12 sps:$4 sm:$0xff]  }
  0x87   :  { %628 = vmatpush1.bf16.msra.mxu0 %v12459_v32  ;;  %11688 = vmatpush3.bf16.msra.mxu1 %v12462_v33 }
  0x88   :  { %11689 = vmatprep.subr.bf16.mxu1 %v13466_v19  ;;  %629 = vmatprep.subr.bf16.mxu0 %v12465_v46 }
  0x89   :  { %475 = vmatmul.mubr.bf16.gmra.mrb[8].mxu1 %v12425_v34  ;;  %306 = vmatmul.mubr.bf16.gmra.mrb[8].mxu0 %v12440_v36 }
  0x8a   :  { %10074 = vmatprep.mubr.msk.bf16.mxu1 %vm241_vm0, %v12426_v35  ;;  %10049 = vmatprep.mubr.msk.bf16.mxu0 %vm241_vm0, %v12441_v38 }
  0x8b   :  { %630 = vmatpush1.bf16.msra.mxu0 %v12463_v47  ;;  %11690 = vmatpush3.bf16.msra.mxu1 %v12466_v48 }
  0x8c   :  { %11711 = vmatprep.subr.bf16.mxu1 %v13466_v19  ;;  %872 = vmatprep.subr.bf16.mxu0 %v12469_v49 }
  0x91   :  { %483 = vmatmul.mubr.bf16.gmra.mrb[12].mxu1 %v12428_v39  ;;  %314 = vmatmul.mubr.bf16.gmra.mrb[12].mxu0 %v12443_v41 }
  0x92   :  { %10075 = vmatprep.mubr.msk.bf16.mxu1 %vm241_vm0, %v12429_v40  ;;  %10050 = vmatprep.mubr.msk.bf16.mxu0 %vm241_vm0, %v12444_v42 }
  0x99   :  { %491 = vmatmul.mubr.bf16.gmra.mrb[16].mxu1 %v12431_v43  ;;  %322 = vmatmul.mubr.bf16.gmra.mrb[16].mxu0 %v12446_v44 }
  0x9a   :  { %653 = vmatprep.mubr.bf16.mxu0 %v13465_v0  ;;  %11691 = vmatprep.mubr.msk.bf16.mxu1 %vm13467_vm1, %v13466_v19 }
 0x14c   :  { %v460_v50 = vpop.f32.mrb[0].mxu1  ;;  %v291_v55 = vpop.f32.mrb[0].mxu0 }
 0x14d   :  { %v462_v51 = vpop.f32.mrb[1].mxu1  ;;  %v293_v58 = vpop.f32.mrb[1].mxu0 }
 0x14e   :  { %v463_v56 = vpop.f32.mrb[2].mxu1  ;;  %v294_v62 = vpop.f32.mrb[2].mxu0 }
 0x14f   :  { %v499_v59 = vpack.c.bf16 %v463_v56, %v460_v50  ;;  %v465_v61 = vpop.f32.mrb[3].mxu1  ;;  %v13898_v63 = vpack.c.bf16 %v294_v62, %v291_v55  ;;  %v296_v1 = vpop.f32.mrb[3].mxu0 }
 0x151   :  { %10111 = vmatmul.mubr.msk.bf16.vlgmr.msra.gmra.mrb[20].mxu0 %vm605_vm2, %v499_v59  ;;  %11692 = vmatmul.mubr.msk.bf16.vlgmr.msra.gmra.mrb[20].mxu1 %vm605_vm2, %v499_v59 }
 0x152   :  { %663 = vmatprep.mubr.bf16.mxu0 %v13465_v0  ;;  %11695 = vmatprep.mubr.msk.bf16.mxu1 %vm13467_vm1, %v13466_v19 }
 0x153   :  { %873 = vmatpush1.bf16.msra.mxu0 %v12467_v52  ;;  %11712 = vmatpush3.bf16.msra.mxu1 %v12473_v54 }
 0x154   :  { %v468_v6 = vpop.f32.mrb[4].mxu1  ;;  %874 = vmatprep.subr.bf16.mxu0 %v12472_v57  ;;  %11713 = vmatprep.subr.bf16.mxu1 %v13466_v19  ;;  %v299_v12 = vpop.f32.mrb[4].mxu0 }
 0x155   :  { %v470_v8 = vpop.f32.mrb[5].mxu1  ;;  %v301_v15 = vpop.f32.mrb[5].mxu0 }
 0x156   :  { %v471_v13 = vpop.f32.mrb[6].mxu1  ;;  %v302_v20 = vpop.f32.mrb[6].mxu0  ;;  %v12516_v8 = vld [vmem:[%s15340_s1 + $0x13c] ss:$12 sps:$4 sm:$0xff]  }
 0x157   :  { %v500_v16 = vpack.c.bf16 %v471_v13, %v468_v6  ;;  %v473_v17 = vpop.f32.mrb[7].mxu1  ;;  %875 = vmatpush1.bf16.msra.mxu0 %v12470_v2  ;;  %11714 = vmatpush3.bf16.msra.mxu1 %v12477_v4  ;;  %v13925_v21 = vpack.c.bf16 %v302_v20, %v299_v12  ;;  %v304_v23 = vpop.f32.mrb[7].mxu0  ;;  %v12508_v2 = vld [vmem:[%s15340_s1 + $0xf8] ss:$12 sps:$4 sm:$0xff]   ;;  %v12512_v4 = vld [vmem:[%s15340_s1 + $0x110] ss:$12 sps:$4 sm:$0xff]  }
 0x158   :  { %876 = vmatprep.subr.bf16.mxu0 %v12476_v5  ;;  %11715 = vmatprep.subr.bf16.mxu1 %v13466_v19  ;;  %v12492_v5 = vld [vmem:[%s15339_s25 + $0xb0] ss:$8 sps:$4 sm:$0xff]   ;;  %v12509_v6 = vld [vmem:[%s15340_s1 + $0x120] ss:$12 sps:$4 sm:$0xff]   ;;  %v12496_v12 = vld [vmem:[%s15339_s25 + $0xd4] ss:$8 sps:$4 sm:$0xff]  }
 0x159   :  { %10112 = vmatmul.mubr.msk.bf16.gmra.mrb[24].mxu0 %vm605_vm2, %v500_v16  ;;  %11696 = vmatmul.mubr.msk.bf16.gmra.mrb[24].mxu1 %vm605_vm2, %v500_v16  ;;  %v12498_v13 = vld [vmem:[%s15339_s25 + $0xd0] ss:$8 sps:$4 sm:$0xff]   ;;  %v12501_v15 = vld [vmem:[%s15339_s25 + $0xe0] ss:$8 sps:$4 sm:$0xff]  }
 0x15a   :  { %673 = vmatprep.mubr.bf16.mxu0 %v13465_v0  ;;  %11699 = vmatprep.mubr.msk.bf16.mxu1 %vm13467_vm1, %v13466_v19  ;;  %v12520_v16 = vld [vmem:[%s15340_s1 + $0x154] ss:$12 sps:$4 sm:$0xff]   ;;  %v12518_v17 = vld [vmem:[%s15340_s1 + $0x150] ss:$12 sps:$4 sm:$0xff]   ;;  %v12521_v20 = vld [vmem:[%s15340_s1 + $0x158] ss:$12 sps:$4 sm:$0xff]  }
 0x15b   :  { %877 = vmatpush1.bf16.msra.mxu0 %v12474_v10  ;;  %11716 = vmatpush3.bf16.msra.mxu1 %v12478_v11  ;;  %v12514_v10 = vld [vmem:[%s15340_s1 + $0x138] ss:$12 sps:$4 sm:$0xff]   ;;  %v12495_v11 = vld [vmem:[%s15339_s25 + $0xc0] ss:$8 sps:$4 sm:$0xff]  }
 0x15c   :  { %v476_v27 = vpop.f32.mrb[8].mxu1  ;;  %878 = vmatprep.subr.bf16.mxu0 %v12481_v14  ;;  %11717 = vmatprep.subr.bf16.mxu1 %v13466_v19  ;;  %v307_v32 = vpop.f32.mrb[8].mxu0  ;;  %v12499_v14 = vld [vmem:[%s15339_s25 + $0xe4] ss:$8 sps:$4 sm:$0xff]  }
 0x15d   :  { %v478_v28 = vpop.f32.mrb[9].mxu1  ;;  %v309_v34 = vpop.f32.mrb[9].mxu0 }
 0x15e   :  { %v479_v33 = vpop.f32.mrb[10].mxu1  ;;  %v310_v38 = vpop.f32.mrb[10].mxu0 }
 0x15f   :  { %v501_v35 = vpack.c.bf16 %v479_v33, %v476_v27  ;;  %v481_v36 = vpop.f32.mrb[11].mxu1  ;;  %879 = vmatpush1.bf16.msra.mxu0 %v12479_v24  ;;  %11718 = vmatpush3.bf16.msra.mxu1 %v12482_v25  ;;  %v13949_v39 = vpack.c.bf16 %v310_v38, %v307_v32  ;;  %v312_v40 = vpop.f32.mrb[11].mxu0 }
 0x160   :  { %880 = vmatprep.subr.bf16.mxu0 %v12485_v26  ;;  %11719 = vmatprep.subr.bf16.mxu1 %v13466_v19 }
 0x161   :  { %10113 = vmatmul.mubr.msk.bf16.gmra.mrb[28].mxu0 %vm605_vm2, %v501_v35  ;;  %11700 = vmatmul.mubr.msk.bf16.gmra.mrb[28].mxu1 %vm605_vm2, %v501_v35 }
 0x162   :  { %683 = vmatprep.mubr.bf16.mxu0 %v13465_v0  ;;  %11703 = vmatprep.mubr.msk.bf16.mxu1 %vm13467_vm1, %v13466_v19 }
 0x163   :  { %881 = vmatpush1.bf16.msra.mxu0 %v12483_v30  ;;  %11720 = vmatpush3.bf16.msra.mxu1 %v12486_v31 }
 0x164   :  { %v484_v41 = vpop.f32.mrb[12].mxu1  ;;  %1099 = vmatprep.subr.bf16.mxu0 %v13465_v0  ;;  %11741 = vmatprep.subr.bf16.mxu1 %v13466_v19  ;;  %v315_v43 = vpop.f32.mrb[12].mxu0 }
 0x165   :  { %v486_v42 = vpop.f32.mrb[13].mxu1  ;;  %v317_v46 = vpop.f32.mrb[13].mxu0 }
 0x166   :  { %v487_v44 = vpop.f32.mrb[14].mxu1  ;;  %v318_v49 = vpop.f32.mrb[14].mxu0 }
 0x167   :  { %v502_v47 = vpack.c.bf16 %v487_v44, %v484_v41  ;;  %v489_v48 = vpop.f32.mrb[15].mxu1  ;;  %v333_v50 = vpack.c.bf16 %v318_v49, %v315_v43  ;;  %v320_v51 = vpop.f32.mrb[15].mxu0 }
 0x169   :  { %10114 = vmatmul.mubr.msk.bf16.gmra.mrb[32].mxu0 %vm605_vm2, %v502_v47  ;;  %11704 = vmatmul.mubr.msk.bf16.gmra.mrb[32].mxu1 %vm605_vm2, %v502_v47 }
 0x16a   :  { %693 = vmatprep.mubr.bf16.mxu0 %v13465_v0  ;;  %11707 = vmatprep.mubr.msk.bf16.mxu1 %vm13467_vm1, %v13466_v19 }
 0x16c   :  { %v492_v52 = vpop.f32.mrb[16].mxu1  ;;  %v323_v55 = vpop.f32.mrb[16].mxu0 }
 0x16d   :  { %v494_v54 = vpop.f32.mrb[17].mxu1  ;;  %v325_v57 = vpop.f32.mrb[17].mxu0 }
 0x16e   :  { %v495_v56 = vpop.f32.mrb[18].mxu1  ;;  %v326_v61 = vpop.f32.mrb[18].mxu0  ;;  %v10216_v57 = vld [vmem:[%s15341_s4 + $0x1] ss:$2 sm:$0x7] }
 0x16f   :  { %v503_v58 = vpack.c.bf16 %v495_v56, %v492_v52  ;;  %v497_v59 = vpop.f32.mrb[19].mxu1  ;;  %v334_v62 = vpack.c.bf16 %v326_v61, %v323_v55  ;;  %v328_v1 = vpop.f32.mrb[19].mxu0  ;;  %v1479_v55 = vld [vmem:[%s15341_s4] ss:$2 sm:$0x7] }
 0x171   :  { %10115 = vmatmul.mubr.msk.bf16.gmra.mrb[36].mxu0 %vm605_vm2, %v503_v58  ;;  %11708 = vmatmul.mubr.msk.bf16.gmra.mrb[36].mxu1 %vm605_vm2, %v503_v58 }
 0x172   :  { %904 = vmatprep.mubr.bf16.mxu0 %v13465_v0  ;;  %11721 = vmatprep.mubr.msk.bf16.mxu1 %vm13467_vm1, %v13466_v19 }
 0x179   :  { %10136 = vmatmul.mubr.msk.bf16.vlgmr.msra.gmra.mrb[20].mxu0 %vm605_vm2, %v13898_v63  ;;  %11722 = vmatmul.mubr.msk.bf16.vlgmr.msra.gmra.mrb[20].mxu1 %vm605_vm2, %v13898_v63  ;;  %v12511_v63 = vld [vmem:[%s15340_s1 + $0x124] ss:$12 sps:$4 sm:$0xff]  }
 0x17a   :  { %1100 = vmatpush1.bf16.msra.mxu0 %v13665_v18  ;;  %914 = vmatprep.mubr.bf16.mxu0 %v13465_v0  ;;  %v12513_v18 = vld [vmem:[%s15340_s1 + $0x128] ss:$12 sps:$4 sm:$0xff]  }
 0x17b   :  { %1101 = vmatprep.subr.bf16.mxu0 %v13465_v0  ;;  %11725 = vmatprep.mubr.msk.bf16.mxu1 %vm13467_vm1, %v13466_v19 }
 0x17c   :  { %11742 = vmatpush3.bf16.msra.mxu1 %v12508_v2 }
 0x17d   :  { %11743 = vmatprep.subr.bf16.mxu1 %v13466_v19 }
 0x17e   :  { %1102 = vmatpush1.bf16.msra.mxu0 %v13671_v22  ;;  %v12517_v22 = vld [vmem:[%s15340_s1 + $0x140] ss:$12 sps:$4 sm:$0xff]  }
 0x17f   :  { %1103 = vmatprep.subr.bf16.mxu0 %v13465_v0 }
 0x180   :  { %11744 = vmatpush3.bf16.msra.mxu1 %v12512_v4 }
 0x181   :  { %10137 = vmatmul.mubr.msk.bf16.gmra.mrb[24].mxu0 %vm605_vm2, %v13925_v21  ;;  %11726 = vmatmul.mubr.msk.bf16.gmra.mrb[24].mxu1 %vm605_vm2, %v13925_v21 }
 0x182   :  { %1104 = vmatpush1.bf16.msra.mxu0 %v13686_v29  ;;  %924 = vmatprep.mubr.bf16.mxu0 %v13465_v0  ;;  %v12489_v29 = vld [vmem:[%s15339_s25 + $0xa4] ss:$8 sps:$4 sm:$0xff]  }
 0x183   :  { %1105 = vmatprep.subr.bf16.mxu0 %v13465_v0  ;;  %11729 = vmatprep.mubr.msk.bf16.mxu1 %vm13467_vm1, %v13466_v19 }
 0x184   :  { %11745 = vmatprep.subr.bf16.mxu1 %v13466_v19 }
 0x185   :  { %11746 = vmatpush3.bf16.msra.mxu1 %v12513_v18 }
 0x186   :  { %1106 = vmatpush1.bf16.msra.mxu0 %v13698_v37  ;;  %11747 = vmatprep.subr.bf16.mxu1 %v13466_v19  ;;  %v12504_v37 = vld [vmem:[%s15340_s1 + $0xf4] ss:$12 sps:$4 sm:$0xff]  }
 0x187   :  { %1107 = vmatprep.subr.bf16.mxu0 %v13465_v0 }
 0x189   :  { %10138 = vmatmul.mubr.msk.bf16.gmra.mrb[28].mxu0 %vm605_vm2, %v13949_v39  ;;  %11730 = vmatmul.mubr.msk.bf16.gmra.mrb[28].mxu1 %vm605_vm2, %v13949_v39 }
 0x18a   :  { %1108 = vmatpush1.bf16.msra.mxu0 %v13713_v45  ;;  %934 = vmatprep.mubr.bf16.mxu0 %v13465_v0  ;;  %v12487_v45 = vld [vmem:[%s15339_s25 + $0xa0] ss:$8 sps:$4 sm:$0xff]  }
 0x18b   :  { %1109 = vmatprep.subr.bf16.mxu0 %v13465_v0  ;;  %11733 = vmatprep.mubr.msk.bf16.mxu1 %vm13467_vm1, %v13466_v19 }
 0x18c   :  { %11748 = vmatpush3.bf16.msra.mxu1 %v12517_v22 }
 0x18d   :  { %11749 = vmatprep.subr.bf16.mxu1 %v13466_v19 }
 0x18e   :  { %1110 = vmatpush1.bf16.msra.mxu0 %v13726_v53  ;;  %v12490_v53 = vld [vmem:[%s15339_s25 + $0xb4] ss:$8 sps:$4 sm:$0xff]  }
 0x18f   :  { %1111 = vmatprep.subr.bf16.mxu0 %v13465_v0 }
 0x190   :  { %11750 = vmatpush3.bf16.msra.mxu1 %v12521_v20 }
 0x191   :  { %10139 = vmatmul.mubr.msk.bf16.gmra.mrb[32].mxu0 %vm605_vm2, %v333_v50  ;;  %11734 = vmatmul.mubr.msk.bf16.gmra.mrb[32].mxu1 %vm605_vm2, %v333_v50  ;;  %v1481_v50 = vlaneseq }
 0x192   :  { %1112 = vmatpush1.bf16.msra.mxu0 %v13742_v60  ;;  %944 = vmatprep.mubr.bf16.mxu0 %v13465_v0  ;;  %v12502_v60 = vld [vmem:[%s15340_s1 + $0xf0] ss:$12 sps:$4 sm:$0xff]  }
 0x193   :  { %1113 = vmatprep.subr.bf16.mxu0 %v13465_v0  ;;  %11737 = vmatprep.mubr.msk.bf16.mxu1 %vm13467_vm1, %v13466_v19  ;;  %v1482_v51 = vshrl.u32 %v1481_v50, 7 }
 0x195   :  { %v14126_v52 = vsub.s32 0, %v1482_v51  ;;  %v14128_v54 = vsub.s32 2, %v1482_v51  ;;  %v14133_v56 = vsub.s32 1, %v1482_v51 }
 0x196   :  { %1114 = vmatpush1.bf16.msra.mxu0 %v13751_v3  ;;  %v12507_v3 = vld [vmem:[%s15340_s1 + $0x10c] ss:$12 sps:$4 sm:$0xff]  }
 0x197   :  { %1115 = vmatprep.subr.bf16.mxu0 %v13465_v0  ;;  %v14139_v58 = vrot.slane %v1479_v55, %v14126_v52  ;;  %v14142_v59 = vrot.slane %v1479_v55, %v14128_v54  ;;  %v14145_v61 = vrot.slane %v1479_v55, %v14133_v56  ;;  %v14151_v1 = vrot.slane %v10216_v57, %v14128_v54 }
 0x198   :  { %v14154_v18 = vrot.slane %v10216_v57, %v14133_v56 }
 0x199   :  { %10140 = vmatmul.mubr.msk.bf16.gmra.mrb[36].mxu0 %vm605_vm2, %v334_v62  ;;  %11738 = vmatmul.mubr.msk.bf16.gmra.mrb[36].mxu1 %vm605_vm2, %v334_v62  ;;  %v14148_v62 = vrot.slane %v10216_v57, %v14126_v52 }
 0x19a   :  { %1116 = vmatpush1.bf16.msra.mxu0 %v13757_v7  ;;  %10166 = vmatprep.mubr.msk.bf16.mxu0 %vm241_vm0, %v12489_v29  ;;  %v12505_v7 = vld [vmem:[%s15340_s1 + $0x108] ss:$12 sps:$4 sm:$0xff]  }
 0x19b   :  { %1117 = vmatprep.subr.bf16.mxu0 %v13465_v0  ;;  %11751 = vmatprep.mubr.msk.bf16.mxu1 %vm13467_vm1, %v13466_v19 }
 0x19e   :  { %1118 = vmatpush1.bf16.msra.mxu0 %v13763_v9  ;;  %v12493_v9 = vld [vmem:[%s15339_s25 + $0xc4] ss:$8 sps:$4 sm:$0xff]  }
 0x19f   :  { %1293 = vmatprep.subr.bf16.mxu0 %v12504_v37 }
 0x1a1   :  { %1132 = vmatmul.mubr.bf16.vlgmr.msra.gmra.mrb[40].mxu0 %v12487_v45 }
 0x1a2   :  { %10167 = vmatprep.mubr.msk.bf16.mxu0 %vm241_vm0, %v12490_v53  ;;  %1294 = vmatpush1.bf16.msra.mxu0 %v12502_v60 }
 0x1a3   :  { %1295 = vmatprep.subr.bf16.mxu0 %v12507_v3 }
 0x1a6   :  { %1296 = vmatpush1.bf16.msra.mxu0 %v12505_v7 }
 0x1a7   :  { %1297 = vmatprep.subr.bf16.mxu0 %v12511_v63 }
 0x1a9   :  { %1140 = vmatmul.mubr.bf16.gmra.mrb[44].mxu0 %v12492_v5 }
 0x1aa   :  { %10168 = vmatprep.mubr.msk.bf16.mxu0 %vm241_vm0, %v12493_v9  ;;  %1298 = vmatpush1.bf16.msra.mxu0 %v12509_v6 }
 0x1ab   :  { %1299 = vmatprep.subr.bf16.mxu0 %v12516_v8 }
 0x1ae   :  { %1300 = vmatpush1.bf16.msra.mxu0 %v12514_v10 }
 0x1af   :  { %1301 = vmatprep.subr.bf16.mxu0 %v12520_v16 }
 0x1b1   :  { %1148 = vmatmul.mubr.bf16.gmra.mrb[48].mxu0 %v12495_v11 }
 0x1b2   :  { %10169 = vmatprep.mubr.msk.bf16.mxu0 %vm241_vm0, %v12496_v12  ;;  %1302 = vmatpush1.bf16.msra.mxu0 %v12518_v17 }
 0x1b9   :  { %1156 = vmatmul.mubr.bf16.gmra.mrb[52].mxu0 %v12498_v13 }
 0x1ba   :  { %10170 = vmatprep.mubr.msk.bf16.mxu0 %vm241_vm0, %v12499_v14 }
 0x1c1   :  { %1164 = vmatmul.mubr.bf16.gmra.mrb[56].mxu0 %v12501_v15 }
 0x1c2   :  { %1325 = vmatprep.mubr.bf16.mxu0 %v13465_v0 }
 0x274   :  { %v1133_v21 = vpop.f32.mrb[40].mxu0 }
 0x275   :  { %v1135_v23 = vpop.f32.mrb[41].mxu0 }
 0x276   :  { %v1136_v24 = vpop.f32.mrb[42].mxu0 }
 0x277   :  { %v1172_v25 = vpack.c.bf16 %v1136_v24, %v1133_v21  ;;  %v1138_v26 = vpop.f32.mrb[43].mxu0 }
 0x279   :  { %10206 = vmatmul.mubr.msk.bf16.vlgmr.msra.gmra.mrb[20].mxu0 %vm605_vm2, %v1172_v25  ;;  %11752 = vmatmul.mubr.msk.bf16.vlgmr.msra.gmra.mrb[20].mxu1 %vm605_vm2, %v1172_v25 }
 0x27a   :  { %1335 = vmatprep.mubr.bf16.mxu0 %v13465_v0  ;;  %11755 = vmatprep.mubr.msk.bf16.mxu1 %vm13467_vm1, %v13466_v19 }
 0x27c   :  { %v1141_v27 = vpop.f32.mrb[44].mxu0 }
 0x27d   :  { %v1143_v28 = vpop.f32.mrb[45].mxu0 }
 0x27e   :  { %v1144_v30 = vpop.f32.mrb[46].mxu0 }
 0x27f   :  { %v1173_v31 = vpack.c.bf16 %v1144_v30, %v1141_v27  ;;  %v1146_v32 = vpop.f32.mrb[47].mxu0 }
 0x281   :  { %10207 = vmatmul.mubr.msk.bf16.gmra.mrb[24].mxu0 %vm605_vm2, %v1173_v31  ;;  %11756 = vmatmul.mubr.msk.bf16.gmra.mrb[24].mxu1 %vm605_vm2, %v1173_v31 }
 0x282   :  { %1345 = vmatprep.mubr.bf16.mxu0 %v13465_v0  ;;  %11759 = vmatprep.mubr.msk.bf16.mxu1 %vm13467_vm1, %v13466_v19 }
 0x284   :  { %v1149_v33 = vpop.f32.mrb[48].mxu0 }
 0x285   :  { %v1151_v34 = vpop.f32.mrb[49].mxu0 }
 0x286   :  { %v1152_v35 = vpop.f32.mrb[50].mxu0 }
 0x287   :  { %v1174_v36 = vpack.c.bf16 %v1152_v35, %v1149_v33  ;;  %v1154_v38 = vpop.f32.mrb[51].mxu0 }
 0x289   :  { %10208 = vmatmul.mubr.msk.bf16.gmra.mrb[28].mxu0 %vm605_vm2, %v1174_v36  ;;  %11760 = vmatmul.mubr.msk.bf16.gmra.mrb[28].mxu1 %vm605_vm2, %v1174_v36 }
 0x28a   :  { %1355 = vmatprep.mubr.bf16.mxu0 %v13465_v0  ;;  %11763 = vmatprep.mubr.msk.bf16.mxu1 %vm13467_vm1, %v13466_v19 }
 0x28c   :  { %v1157_v39 = vpop.f32.mrb[52].mxu0 }
 0x28d   :  { %v1159_v40 = vpop.f32.mrb[53].mxu0 }
 0x28e   :  { %v1160_v41 = vpop.f32.mrb[54].mxu0 }
 0x28f   :  { %v1175_v42 = vpack.c.bf16 %v1160_v41, %v1157_v39  ;;  %v1162_v43 = vpop.f32.mrb[55].mxu0 }
 0x291   :  { %10209 = vmatmul.mubr.msk.bf16.gmra.mrb[32].mxu0 %vm605_vm2, %v1175_v42  ;;  %11764 = vmatmul.mubr.msk.bf16.gmra.mrb[32].mxu1 %vm605_vm2, %v1175_v42 }
 0x292   :  { %1365 = vmatprep.mubr.bf16.mxu0 %v13465_v0  ;;  %11767 = vmatprep.mubr.msk.bf16.mxu1 %vm13467_vm1, %v13466_v19 }
 0x294   :  { %v1165_v44 = vpop.f32.mrb[56].mxu0 }
 0x295   :  { %v1167_v46 = vpop.f32.mrb[57].mxu0 }
 0x296   :  { %v1168_v47 = vpop.f32.mrb[58].mxu0 }
 0x297   :  { %v1176_v48 = vpack.c.bf16 %v1168_v47, %v1165_v44  ;;  %v1170_v49 = vpop.f32.mrb[59].mxu0 }
 0x299   :  { %10210 = vmatmul.mubr.msk.bf16.gmra.mrb[36].mxu0 %vm605_vm2, %v1176_v48  ;;  %11768 = vmatmul.mubr.msk.bf16.gmra.mrb[36].mxu1 %vm605_vm2, %v1176_v48 }
 0x29a   :  { %1678 = vmatprep.mubr.bf16.mxu1 %v13465_v0  ;;  %1912 = vmatprep.mubr.bf16.mxu0 %v13465_v0 }
 0x34c   :  { %v1327_v2 = vpop.f32.mrb[20].mxu0  ;;  %v1410_v4 = vpop.f32.mrb[20].mxu1 }
 0x34d   :  { %v1496_v22 = vmul.f32 %v14139_v58, %v1327_v2  ;;  %v1498_v29 = vmul.f32 %v14142_v59, %v1410_v4  ;;  %v1329_v37 = vpop.f32.mrb[21].mxu0  ;;  %v11753_v45 = vpop.f32.mrb[21].mxu1 }
 0x34e   :  { %v1497_v53 = vmul.f32 %v14145_v61, %v1329_v37  ;;  %v1331_v60 = vpop.f32.mrb[22].mxu0  ;;  %v1413_v3 = vpop.f32.mrb[22].mxu1 }
 0x34f   :  { %v1544_v7 = vadd.f32 %v14148_v62, %v1496_v22  ;;  %v1546_v63 = vadd.f32 %v14151_v1, %v1498_v29  ;;  %v1499_v5 = vmul.f32 %v14139_v58, %v1331_v60  ;;  %v1501_v9 = vmul.f32 %v14142_v59, %v1413_v3  ;;  %v1333_v6 = vpop.f32.mrb[23].mxu0  ;;  %v11754_v8 = vpop.f32.mrb[23].mxu1 }
 0x350   :  { %v1545_v10 = vadd.f32 %v14154_v18, %v1497_v53  ;;  %v1500_v11 = vmul.f32 %v14145_v61, %v1333_v6 }
 0x351   :  { %v1547_v12 = vadd.f32 %v14148_v62, %v1499_v5  ;;  %v1549_v13 = vadd.f32 %v14151_v1, %v1501_v9  ;;  %v1574_v15 = vmax.f32 %v1544_v7, 0.0  ;;  %v1576_v16 = vmax.f32 %v1546_v63, 0.0 }
 0x352   :  { %v1548_v14 = vadd.f32 %v14154_v18, %v1500_v11  ;;  %v1575_v21 = vmax.f32 %v1545_v10, 0.0 }
 0x353   :  { %v1577_v17 = vmax.f32 %v1547_v12, 0.0  ;;  %v1579_v20 = vmax.f32 %v1549_v13, 0.0 }
 0x354   :  { %v1578_v23 = vmax.f32 %v1548_v14, 0.0  ;;  %v1337_v24 = vpop.f32.mrb[24].mxu0  ;;  %v1418_v25 = vpop.f32.mrb[24].mxu1 }
 0x355   :  { %v14168_v26 = vpack.c.bf16 %v1577_v17, %v1574_v15  ;;  %v14170_v27 = vpack.c.bf16 %v1579_v20, %v1576_v16  ;;  %v1502_v28 = vmul.f32 %v14139_v58, %v1337_v24  ;;  %v1504_v30 = vmul.f32 %v14142_v59, %v1418_v25  ;;  %v1339_v31 = vpop.f32.mrb[25].mxu0  ;;  %v11757_v32 = vpop.f32.mrb[25].mxu1 }
 0x356   :  { %v1503_v33 = vmul.f32 %v14145_v61, %v1339_v31  ;;  %v1341_v34 = vpop.f32.mrb[26].mxu0  ;;  %v1421_v35 = vpop.f32.mrb[26].mxu1  ;;  %v14175_v36 = vpack.c.bf16 %v1578_v23, %v1575_v21 }
 0x357   :  { %v1550_v38 = vadd.f32 %v14148_v62, %v1502_v28  ;;  %v1552_v39 = vadd.f32 %v14151_v1, %v1504_v30  ;;  %v1505_v40 = vmul.f32 %v14139_v58, %v1341_v34  ;;  %v1507_v41 = vmul.f32 %v14142_v59, %v1421_v35  ;;  %v1343_v42 = vpop.f32.mrb[27].mxu0  ;;  %v11758_v43 = vpop.f32.mrb[27].mxu1 }
 0x358   :  { %v1551_v44 = vadd.f32 %v14154_v18, %v1503_v33  ;;  %v1506_v46 = vmul.f32 %v14145_v61, %v1343_v42  ;;  %1646 = vmatprep.subr.bf16.mxu1 %v14175_v36  ;;  %1880 = vmatprep.subr.bf16.mxu0 %v14175_v36 }
 0x359   :  { %v1553_v47 = vadd.f32 %v14148_v62, %v1505_v40  ;;  %v1555_v48 = vadd.f32 %v14151_v1, %v1507_v41  ;;  %1647 = vmatpush1.bf16.msra.mxu1 %v14168_v26  ;;  %1881 = vmatpush1.bf16.msra.mxu0 %v14168_v26  ;;  %v1580_v50 = vmax.f32 %v1550_v38, 0.0  ;;  %v1582_v51 = vmax.f32 %v1552_v39, 0.0 }
 0x35a   :  { %v1554_v49 = vadd.f32 %v14154_v18, %v1506_v46  ;;  %v1581_v2 = vmax.f32 %v1551_v44, 0.0 }
 0x35b   :  { %v1583_v55 = vmax.f32 %v1553_v47, 0.0  ;;  %v1585_v57 = vmax.f32 %v1555_v48, 0.0 }
 0x35c   :  { %v1584_v4 = vmax.f32 %v1554_v49, 0.0  ;;  %v1347_v22 = vpop.f32.mrb[28].mxu0  ;;  %v1426_v29 = vpop.f32.mrb[28].mxu1 }
 0x35d   :  { %v14190_v37 = vpack.c.bf16 %v1583_v55, %v1580_v50  ;;  %v14192_v45 = vpack.c.bf16 %v1585_v57, %v1582_v51  ;;  %v1508_v53 = vmul.f32 %v14139_v58, %v1347_v22  ;;  %v1510_v60 = vmul.f32 %v14142_v59, %v1426_v29  ;;  %v1349_v3 = vpop.f32.mrb[29].mxu0  ;;  %v11761_v7 = vpop.f32.mrb[29].mxu1 }
 0x35e   :  { %v1509_v63 = vmul.f32 %v14145_v61, %v1349_v3  ;;  %v1351_v5 = vpop.f32.mrb[30].mxu0  ;;  %v1429_v9 = vpop.f32.mrb[30].mxu1  ;;  %v14197_v6 = vpack.c.bf16 %v1584_v4, %v1581_v2 }
 0x35f   :  { %v1556_v8 = vadd.f32 %v14148_v62, %v1508_v53  ;;  %v1558_v10 = vadd.f32 %v14151_v1, %v1510_v60  ;;  %v1511_v11 = vmul.f32 %v14139_v58, %v1351_v5  ;;  %v1513_v12 = vmul.f32 %v14142_v59, %v1429_v9  ;;  %v1353_v13 = vpop.f32.mrb[31].mxu0  ;;  %v11762_v14 = vpop.f32.mrb[31].mxu1 }
 0x360   :  { %v1557_v15 = vadd.f32 %v14154_v18, %v1509_v63  ;;  %v1512_v16 = vmul.f32 %v14145_v61, %v1353_v13  ;;  %1648 = vmatprep.subr.bf16.mxu1 %v14197_v6  ;;  %1882 = vmatprep.subr.bf16.mxu0 %v14197_v6 }
 0x361   :  { %v1559_v17 = vadd.f32 %v14148_v62, %v1511_v11  ;;  %v1561_v20 = vadd.f32 %v14151_v1, %v1513_v12  ;;  %1649 = vmatpush1.bf16.msra.mxu1 %v14190_v37  ;;  %1883 = vmatpush1.bf16.msra.mxu0 %v14190_v37  ;;  %v1586_v23 = vmax.f32 %v1556_v8, 0.0  ;;  %v1588_v24 = vmax.f32 %v1558_v10, 0.0 }
 0x362   :  { %v1560_v21 = vadd.f32 %v14154_v18, %v1512_v16  ;;  %v1587_v30 = vmax.f32 %v1557_v15, 0.0 }
 0x363   :  { %v1589_v25 = vmax.f32 %v1559_v17, 0.0  ;;  %v1591_v28 = vmax.f32 %v1561_v20, 0.0 }
 0x364   :  { %v1590_v31 = vmax.f32 %v1560_v21, 0.0  ;;  %v1357_v32 = vpop.f32.mrb[32].mxu0  ;;  %v1434_v33 = vpop.f32.mrb[32].mxu1 }
 0x365   :  { %v14212_v34 = vpack.c.bf16 %v1589_v25, %v1586_v23  ;;  %v14214_v35 = vpack.c.bf16 %v1591_v28, %v1588_v24  ;;  %v1514_v38 = vmul.f32 %v14139_v58, %v1357_v32  ;;  %v1516_v39 = vmul.f32 %v14142_v59, %v1434_v33  ;;  %v1359_v40 = vpop.f32.mrb[33].mxu0  ;;  %v11765_v41 = vpop.f32.mrb[33].mxu1 }
 0x366   :  { %v1515_v42 = vmul.f32 %v14145_v61, %v1359_v40  ;;  %v1361_v43 = vpop.f32.mrb[34].mxu0  ;;  %v1437_v44 = vpop.f32.mrb[34].mxu1  ;;  %v14219_v46 = vpack.c.bf16 %v1590_v31, %v1587_v30 }
 0x367   :  { %v1562_v47 = vadd.f32 %v14148_v62, %v1514_v38  ;;  %v1564_v48 = vadd.f32 %v14151_v1, %v1516_v39  ;;  %v1517_v49 = vmul.f32 %v14139_v58, %v1361_v43  ;;  %v1519_v50 = vmul.f32 %v14142_v59, %v1437_v44  ;;  %v1363_v51 = vpop.f32.mrb[35].mxu0  ;;  %v11766_v55 = vpop.f32.mrb[35].mxu1 }
 0x368   :  { %v1563_v57 = vadd.f32 %v14154_v18, %v1515_v42  ;;  %v1518_v2 = vmul.f32 %v14145_v61, %v1363_v51  ;;  %1650 = vmatprep.subr.bf16.mxu1 %v14219_v46  ;;  %1884 = vmatprep.subr.bf16.mxu0 %v14219_v46  ;;  %v12531_v51 = vld [vmem:[#allocation2 + $0x1f8] ss:$12 sps:$4 sm:$0xff]   ;;  %v12523_v55 = vld [vmem:[%s15342_s28 + $0x8] sm:$0xff]  }
 0x369   :  { %v1565_v4 = vadd.f32 %v14148_v62, %v1517_v49  ;;  %v1567_v22 = vadd.f32 %v14151_v1, %v1519_v50  ;;  %1651 = vmatpush1.bf16.msra.mxu1 %v14212_v34  ;;  %1885 = vmatpush1.bf16.msra.mxu0 %v14212_v34  ;;  %v1592_v53 = vmax.f32 %v1562_v47, 0.0  ;;  %v1594_v60 = vmax.f32 %v1564_v48, 0.0  ;;  %v12528_v49 = vld [vmem:[#allocation2 + $0x1e0] ss:$12 sps:$4 sm:$0xff]   ;;  %v12533_v50 = vld [vmem:[#allocation2 + $0x1fc] ss:$12 sps:$4 sm:$0xff]  }
 0x36a   :  { %v1566_v29 = vadd.f32 %v14154_v18, %v1518_v2  ;;  %v1593_v63 = vmax.f32 %v1563_v57, 0.0  ;;  %v14288_v57 = vld [vmem:[%s15342_s28 + $0x1c] sm:$0xff]  }
 0x36b   :  { %v1595_v3 = vmax.f32 %v1565_v4, 0.0  ;;  %v1597_v7 = vmax.f32 %v1567_v22, 0.0  ;;  %v12536_v2 = vld [vmem:[#allocation2 + $0x214] ss:$12 sps:$4 sm:$0xff]   ;;  %v12534_v4 = vld [vmem:[#allocation2 + $0x210] ss:$12 sps:$4 sm:$0xff]  }
 0x36c   :  { %v1596_v5 = vmax.f32 %v1566_v29, 0.0  ;;  %v1367_v9 = vpop.f32.mrb[36].mxu0  ;;  %v1442_v8 = vpop.f32.mrb[36].mxu1  ;;  %v12539_v22 = vld [vmem:[#allocation2 + $0x22c] ss:$12 sps:$4 sm:$0xff]  }
 0x36d   :  { %v14234_v10 = vpack.c.bf16 %v1595_v3, %v1592_v53  ;;  %v14236_v11 = vpack.c.bf16 %v1597_v7, %v1594_v60  ;;  %v1520_v12 = vmul.f32 %v14139_v58, %v1367_v9  ;;  %v1522_v13 = vmul.f32 %v14142_v59, %v1442_v8  ;;  %v1369_v14 = vpop.f32.mrb[37].mxu0  ;;  %v11769_v15 = vpop.f32.mrb[37].mxu1  ;;  %v12525_v29 = vld [vmem:[%s15342_s28 + $0x10] ss:$0 sps:$4 sm:$0xff]   ;;  %v14305_v53 = vld [vmem:[%s15342_s28 + $0x24] ss:$0 sps:$4 sm:$0xff]  }
 0x36e   :  { %v1521_v16 = vmul.f32 %v14145_v61, %v1369_v14  ;;  %v1371_v17 = vpop.f32.mrb[38].mxu0  ;;  %v1445_v20 = vpop.f32.mrb[38].mxu1  ;;  %v14241_v21 = vpack.c.bf16 %v1596_v5, %v1593_v63  ;;  %v12537_v60 = vld [vmem:[#allocation2 + $0x228] ss:$12 sps:$4 sm:$0xff]   ;;  %v12542_v3 = vld [vmem:[#allocation2 + $0x244] ss:$12 sps:$4 sm:$0xff]  }
 0x36f   :  { %v1568_v23 = vadd.f32 %v14148_v62, %v1520_v12  ;;  %v1570_v24 = vadd.f32 %v14151_v1, %v1522_v13  ;;  %v1523_v25 = vmul.f32 %v14139_v58, %v1371_v17  ;;  %v1525_v28 = vmul.f32 %v14142_v59, %v1445_v20  ;;  %v1373_v30 = vpop.f32.mrb[39].mxu0  ;;  %v11770_v31 = vpop.f32.mrb[39].mxu1  ;;  %v12540_v7 = vld [vmem:[#allocation2 + $0x240] ss:$12 sps:$4 sm:$0xff]   ;;  %v12545_v63 = vld [vmem:[#allocation2 + $0x25c] ss:$12 sps:$4 sm:$0xff]  }
 0x370   :  { %v1569_v32 = vadd.f32 %v14154_v18, %v1521_v16  ;;  %v1524_v33 = vmul.f32 %v14145_v61, %v1373_v30  ;;  %1652 = vmatprep.subr.bf16.mxu1 %v14241_v21  ;;  %1886 = vmatprep.subr.bf16.mxu0 %v14241_v21  ;;  %v12543_v5 = vld [vmem:[#allocation2 + $0x258] ss:$12 sps:$4 sm:$0xff]   ;;  %v12548_v9 = vld [vmem:[#allocation2 + $0x274] ss:$12 sps:$4 sm:$0xff]   ;;  %v12546_v8 = vld [vmem:[#allocation2 + $0x270] ss:$12 sps:$4 sm:$0xff]  }
 0x371   :  { %v1571_v38 = vadd.f32 %v14148_v62, %v1523_v25  ;;  %v1573_v39 = vadd.f32 %v14151_v1, %v1525_v28  ;;  %1653 = vmatpush1.bf16.msra.mxu1 %v14234_v10  ;;  %1887 = vmatpush1.bf16.msra.mxu0 %v14234_v10  ;;  %v1598_v59 = vmax.f32 %v1568_v23, 0.0  ;;  %v1600_v40 = vmax.f32 %v1570_v24, 0.0  ;;  %v12530_v62 = vld [vmem:[#allocation2 + $0x1e4] ss:$12 sps:$4 sm:$0xff]   ;;  %v12551_v12 = vld [vmem:[#allocation2 + $0x28c] ss:$12 sps:$4 sm:$0xff]  }
 0x372   :  { %v1572_v58 = vadd.f32 %v14154_v18, %v1524_v33  ;;  %v1599_v43 = vmax.f32 %v1569_v32, 0.0  ;;  %v12522_v1 = vld [vmem:[%s15342_s28] sm:$0xff]   ;;  %v14270_v18 = vld [vmem:[%s15342_s28 + $0x14] sm:$0xff]   ;;  %v12561_v16 = vld [vmem:[#allocation2 + $0x2bc] ss:$12 sps:$4 sm:$0xff]  }
 0x373   :  { %v1601_v41 = vmax.f32 %v1571_v38, 0.0  ;;  %v1603_v42 = vmax.f32 %v1573_v39, 0.0  ;;  %v12549_v13 = vld [vmem:[#allocation2 + $0x288] ss:$12 sps:$4 sm:$0xff]   ;;  %v12556_v14 = vld [vmem:[#allocation2 + $0x2a4] ss:$12 sps:$4 sm:$0xff]  }
 0x374   :  { %v1602_v61 = vmax.f32 %v1572_v58, 0.0  ;;  %v12554_v15 = vld [vmem:[#allocation2 + $0x2a0] ss:$12 sps:$4 sm:$0xff]   ;;  %v12552_v17 = vld [vmem:[#allocation2 + $0x2a8] ss:$12 sps:$4 sm:$0xff]  }
 0x375   :  { %v14256_v44 = vpack.c.bf16 %v1601_v41, %v1598_v59  ;;  %v14258_v47 = vpack.c.bf16 %v1603_v42, %v1600_v40  ;;  %v12559_v20 = vld [vmem:[#allocation2 + $0x2b8] ss:$12 sps:$4 sm:$0xff]   ;;  %v12553_v23 = vld [vmem:[#allocation2 + $0x1e8] ss:$12 sps:$4 sm:$0xff]   ;;  %v12557_v24 = vld [vmem:[#allocation2 + $0x2c0] ss:$12 sps:$4 sm:$0xff]  }
 0x376   :  { %v14260_v48 = vpack.c.bf16 %v1602_v61, %v1599_v43  ;;  %v12558_v25 = vld [vmem:[#allocation2 + $0x200] ss:$12 sps:$4 sm:$0xff]   ;;  %v12562_v28 = vld [vmem:[#allocation2 + $0x2d8] ss:$12 sps:$4 sm:$0xff]   ;;  %v12564_v32 = vld [vmem:[#allocation2 + $0x2d0] ss:$12 sps:$4 sm:$0xff]  }
 0x377   :  { %v12563_v30 = vld [vmem:[#allocation2 + $0x218] ss:$12 sps:$4 sm:$0xff]   ;;  %v12566_v31 = vld [vmem:[#allocation2 + $0x2d4] ss:$12 sps:$4 sm:$0xff]   ;;  %v12567_v33 = vld [vmem:[#allocation2 + $0x2f0] ss:$12 sps:$4 sm:$0xff]  }
 0x378   :  { %1654 = vmatprep.subr.bf16.mxu1 %v14260_v48  ;;  %1888 = vmatprep.subr.bf16.mxu0 %v14260_v48  ;;  %v12568_v38 = vld [vmem:[#allocation2 + $0x230] ss:$12 sps:$4 sm:$0xff]   ;;  %v12569_v39 = vld [vmem:[#allocation2 + $0x2e8] ss:$12 sps:$4 sm:$0xff]   ;;  %v12571_v58 = vld [vmem:[#allocation2 + $0x2ec] ss:$12 sps:$4 sm:$0xff]  }
 0x379   :  { %1655 = vmatpush1.bf16.msra.mxu1 %v14256_v44  ;;  %1889 = vmatpush1.bf16.msra.mxu0 %v14256_v44  ;;  %v12572_v59 = vld [vmem:[#allocation2 + $0x308] ss:$12 sps:$4 sm:$0xff]   ;;  %v12576_v41 = vld [vmem:[#allocation2 + $0x304] ss:$12 sps:$4 sm:$0xff]   ;;  %v12574_v42 = vld [vmem:[#allocation2 + $0x300] ss:$12 sps:$4 sm:$0xff]  }
 0x37a   :  { %11771 = vmatprep.subr.bf16.mxu1 %v13466_v19  ;;  %2417 = vmatprep.subr.bf16.mxu0 %v12530_v62  ;;  %v12573_v40 = vld [vmem:[#allocation2 + $0x248] ss:$12 sps:$4 sm:$0xff]   ;;  %v12577_v43 = vld [vmem:[#allocation2 + $0x320] ss:$12 sps:$4 sm:$0xff]   ;;  %v12579_v62 = vld [vmem:[#allocation2 + $0x318] ss:$12 sps:$4 sm:$0xff]  }
 0x37b   :  { %v12578_v61 = vld [vmem:[#allocation2 + $0x260] ss:$12 sps:$4 sm:$0xff]  }
 0x37c   :  { %10220 = vmatmul.mubr.msk.bf16.vlgmr.msra.gmra.mrb[40].mxu1 %vm605_vm2, %v12522_v1  ;;  %10234 = vmatmul.mubr.msk.bf16.vlgmr.msra.gmra.mrb[60].mxu0 %vm605_vm2, %v14270_v18 }
 0x37d   :  { %11772 = vmatpush3.bf16.msra.mxu1 %v14170_v27  ;;  %1688 = vmatprep.mubr.bf16.mxu1 %v13465_v0 }
 0x37e   :  { %11773 = vmatprep.subr.bf16.mxu1 %v13466_v19  ;;  %1922 = vmatprep.mubr.bf16.mxu0 %v13465_v0 }
 0x37f   :  { %2418 = vmatpush1.bf16.msra.mxu0 %v12528_v49  ;;  %v12583_v49 = vld [vmem:[#allocation2 + $0x278] ss:$12 sps:$4 sm:$0xff]  }
 0x380   :  { %2419 = vmatprep.subr.bf16.mxu0 %v12533_v50  ;;  %v12586_v50 = vld [vmem:[#allocation2 + $0x334] ss:$12 sps:$4 sm:$0xff]  }
 0x381   :  { %11774 = vmatpush3.bf16.msra.mxu1 %v14192_v45 }
 0x382   :  { %11775 = vmatprep.subr.bf16.mxu1 %v13466_v19 }
 0x383   :  { %2420 = vmatpush1.bf16.msra.mxu0 %v12531_v51  ;;  %v12584_v51 = vld [vmem:[#allocation2 + $0x330] ss:$12 sps:$4 sm:$0xff]  }
 0x384   :  { %10221 = vmatmul.mubr.msk.bf16.gmra.mrb[44].mxu1 %vm605_vm2, %v12523_v55  ;;  %10235 = vmatmul.mubr.msk.bf16.gmra.mrb[64].mxu0 %vm605_vm2, %v14288_v57 }
 0x385   :  { %11776 = vmatpush3.bf16.msra.mxu1 %v14214_v35  ;;  %1698 = vmatprep.mubr.bf16.mxu1 %v13465_v0 }
 0x386   :  { %11777 = vmatprep.subr.bf16.mxu1 %v13466_v19  ;;  %1932 = vmatprep.mubr.bf16.mxu0 %v13465_v0 }
 0x387   :  { %2421 = vmatprep.subr.bf16.mxu0 %v12536_v2  ;;  %v12589_v2 = vld [vmem:[#allocation2 + $0x348] ss:$12 sps:$4 sm:$0xff]  }
 0x388   :  { %2422 = vmatpush1.bf16.msra.mxu0 %v12534_v4  ;;  %v12591_v4 = vld [vmem:[#allocation2 + $0x34c] ss:$12 sps:$4 sm:$0xff]  }
 0x389   :  { %11778 = vmatpush3.bf16.msra.mxu1 %v14236_v11  ;;  %2423 = vmatprep.subr.bf16.mxu0 %v12539_v22  ;;  %v12594_v22 = vld [vmem:[#allocation2 + $0x364] ss:$12 sps:$4 sm:$0xff]  }
 0x38a   :  { %11779 = vmatprep.subr.bf16.mxu1 %v13466_v19 }
 0x38c   :  { %10222 = vmatmul.mubr.msk.bf16.gmra.mrb[48].mxu1 %vm605_vm2, %v12525_v29  ;;  %10236 = vmatmul.mubr.msk.bf16.gmra.mrb[68].mxu0 %vm605_vm2, %v14305_v53 }
 0x38d   :  { %11780 = vmatpush3.bf16.msra.mxu1 %v14258_v47  ;;  %11781 = vmatprep.mubr.msk.bf16.mxu1 %vm13467_vm1, %v13466_v19 }
 0x38e   :  { %11793 = vmatprep.subr.bf16.mxu1 %v13466_v19  ;;  %2424 = vmatpush1.bf16.msra.mxu0 %v12537_v60 }
 0x38f   :  { %2425 = vmatprep.subr.bf16.mxu0 %v12542_v3 }
 0x392   :  { %2426 = vmatpush1.bf16.msra.mxu0 %v12540_v7 }
 0x393   :  { %2427 = vmatprep.subr.bf16.mxu0 %v12545_v63 }
 0x394   :  { %11782 = vmatmul.mubr.msk.bf16.vlgmr.msra.gmra.mrb[52].mxu1 %vm605_vm2, %v12522_v1  ;;  %v12581_v1 = vld [vmem:[#allocation2 + $0x31c] ss:$12 sps:$4 sm:$0xff]  }
 0x395   :  { %11794 = vmatpush3.bf16.msra.mxu1 %v14170_v27  ;;  %11785 = vmatprep.mubr.msk.bf16.mxu1 %vm13467_vm1, %v13466_v19 }
 0x396   :  { %11795 = vmatprep.subr.bf16.mxu1 %v13466_v19  ;;  %2428 = vmatpush1.bf16.msra.mxu0 %v12543_v5 }
 0x397   :  { %2429 = vmatprep.subr.bf16.mxu0 %v12548_v9 }
 0x399   :  { %11796 = vmatpush3.bf16.msra.mxu1 %v14192_v45 }
 0x39a   :  { %11797 = vmatprep.subr.bf16.mxu1 %v13466_v19  ;;  %2430 = vmatpush1.bf16.msra.mxu0 %v12546_v8 }
 0x39b   :  { %2431 = vmatprep.subr.bf16.mxu0 %v12551_v12 }
 0x39c   :  { %11786 = vmatmul.mubr.msk.bf16.gmra.mrb[56].mxu1 %vm605_vm2, %v12523_v55  ;;  %v12587_v55 = vld [vmem:[#allocation2 + $0x350] ss:$12 sps:$4 sm:$0xff]  }
 0x39d   :  { %11798 = vmatpush3.bf16.msra.mxu1 %v14214_v35  ;;  %11789 = vmatprep.mubr.msk.bf16.mxu1 %vm13467_vm1, %v13466_v19 }
 0x39e   :  { %11799 = vmatprep.subr.bf16.mxu1 %v13466_v19  ;;  %2432 = vmatpush1.bf16.msra.mxu0 %v12549_v13 }
 0x39f   :  { %2433 = vmatprep.subr.bf16.mxu0 %v12556_v14 }
 0x3a1   :  { %11800 = vmatpush3.bf16.msra.mxu1 %v14236_v11 }
 0x3a2   :  { %11801 = vmatprep.subr.bf16.mxu1 %v13466_v19  ;;  %2434 = vmatpush1.bf16.msra.mxu0 %v12554_v15  ;;  %v12592_v15 = vld [vmem:[#allocation2 + $0x360] ss:$12 sps:$4 sm:$0xff]  }
 0x3a3   :  { %2435 = vmatprep.subr.bf16.mxu0 %v12561_v16  ;;  %v12595_v16 = vld [vmem:[#allocation2 + $0x368] ss:$12 sps:$4 sm:$0xff]  }
 0x3a4   :  { %11790 = vmatmul.mubr.msk.bf16.gmra.mrb[60].mxu1 %vm605_vm2, %v12525_v29 }
 0x3a5   :  { %11802 = vmatpush3.bf16.msra.mxu1 %v14258_v47  ;;  %11803 = vmatprep.mubr.msk.bf16.mxu1 %vm13467_vm1, %v13466_v19 }
 0x3a6   :  { %11193 = vmatprep.subr.bf16.mxu1 %v12552_v17  ;;  %2436 = vmatpush1.bf16.msra.mxu0 %v12559_v20  ;;  %v12598_v17 = vld [vmem:[#allocation2 + $0x37c] ss:$12 sps:$4 sm:$0xff]  }
 0x3a7   :  { %2437 = vmatprep.subr.bf16.mxu0 %v12566_v31  ;;  %v12602_v31 = vld [vmem:[#allocation2 + $0x394] ss:$12 sps:$4 sm:$0xff]  }
 0x3aa   :  { %2438 = vmatpush1.bf16.msra.mxu0 %v12564_v32 }
 0x3ab   :  { %2439 = vmatprep.subr.bf16.mxu0 %v12571_v58 }
 0x3ac   :  { %11804 = vmatmul.mubr.msk.bf16.vlgmr.msra.gmra.mrb[64].mxu1 %vm605_vm2, %v14270_v18  ;;  %v12582_v18 = vld [vmem:[#allocation2 + $0x338] ss:$12 sps:$4 sm:$0xff]  }
 0x3ad   :  { %11807 = vmatprep.mubr.msk.bf16.mxu1 %vm13467_vm1, %v13466_v19  ;;  %11194 = vmatpush3.bf16.msra.mxu1 %v12553_v23 }
 0x3ae   :  { %11195 = vmatprep.subr.bf16.mxu1 %v12557_v24  ;;  %2440 = vmatpush1.bf16.msra.mxu0 %v12569_v39  ;;  %v12596_v24 = vld [vmem:[#allocation2 + $0x378] ss:$12 sps:$4 sm:$0xff]  }
 0x3af   :  { %2441 = vmatprep.subr.bf16.mxu0 %v12576_v41 }
 0x3b1   :  { %11196 = vmatpush3.bf16.msra.mxu1 %v12558_v25  ;;  %v12599_v25 = vld [vmem:[#allocation2 + $0x380] ss:$12 sps:$4 sm:$0xff]  }
 0x3b2   :  { %11197 = vmatprep.subr.bf16.mxu1 %v12562_v28  ;;  %2442 = vmatpush1.bf16.msra.mxu0 %v12574_v42  ;;  %v12600_v42 = vld [vmem:[#allocation2 + $0x390] ss:$12 sps:$4 sm:$0xff]  }
 0x3b3   :  { %2443 = vmatprep.subr.bf16.mxu0 %v12581_v1 }
 0x3b4   :  { %11808 = vmatmul.mubr.msk.bf16.gmra.mrb[68].mxu1 %vm605_vm2, %v14288_v57  ;;  %v12588_v57 = vld [vmem:[#allocation2 + $0x290] ss:$12 sps:$4 sm:$0xff]  }
 0x3b5   :  { %11811 = vmatprep.mubr.msk.bf16.mxu1 %vm13467_vm1, %v13466_v19  ;;  %11198 = vmatpush3.bf16.msra.mxu1 %v12563_v30 }
 0x3b6   :  { %11199 = vmatprep.subr.bf16.mxu1 %v12567_v33  ;;  %2444 = vmatpush1.bf16.msra.mxu0 %v12579_v62 }
 0x3b7   :  { %2445 = vmatprep.subr.bf16.mxu0 %v12586_v50  ;;  %v12604_v50 = vld [vmem:[#allocation2 + $0x3a8] ss:$12 sps:$4 sm:$0xff]  }
 0x3b9   :  { %11200 = vmatpush3.bf16.msra.mxu1 %v12568_v38 }
 0x3ba   :  { %11201 = vmatprep.subr.bf16.mxu1 %v12572_v59  ;;  %2446 = vmatpush1.bf16.msra.mxu0 %v12584_v51  ;;  %v12607_v51 = vld [vmem:[#allocation2 + $0x3b0] ss:$12 sps:$4 sm:$0xff]  }
 0x3bb   :  { %2447 = vmatprep.subr.bf16.mxu0 %v12591_v4  ;;  %v12610_v4 = vld [vmem:[#allocation2 + $0x4] ss:$12 sps:$4 sm:$0xff]  }
 0x3bc   :  { %11812 = vmatmul.mubr.msk.bf16.gmra.mrb[72].mxu1 %vm605_vm2, %v14305_v53 }
 0x3bd   :  { %11202 = vmatpush3.bf16.msra.mxu1 %v12573_v40 }
 0x3be   :  { %11203 = vmatprep.subr.bf16.mxu1 %v12577_v43  ;;  %2448 = vmatpush1.bf16.msra.mxu0 %v12589_v2  ;;  %v12603_v43 = vld [vmem:[#allocation2 + $0x398] ss:$12 sps:$4 sm:$0xff]  }
 0x3bf   :  { %2478 = vmatprep.subr.bf16.mxu0 %v12594_v22  ;;  %v12611_v22 = vld [vmem:[#allocation2 + $0xc8] ss:$12 sps:$4 sm:$0xff]  }
 0x3c1   :  { %11204 = vmatpush3.bf16.msra.mxu1 %v12578_v61  ;;  %v12606_v61 = vld [vmem:[#allocation2 + $0x3ac] ss:$12 sps:$4 sm:$0xff]  }
 0x3c2   :  { %11205 = vmatprep.subr.bf16.mxu1 %v12582_v18 }
 0x3c5   :  { %11206 = vmatpush3.bf16.msra.mxu1 %v12583_v49 }
 0x3c6   :  { %11207 = vmatprep.subr.bf16.mxu1 %v12587_v55 }
 0x3c9   :  { %11208 = vmatpush3.bf16.msra.mxu1 %v12588_v57 }
 0x3ca   :  { %11815 = vmatprep.subr.bf16.mxu1 %v13466_v19 }
 0x44f   :  { %v1680_v29 = vpop.f32.mrb[40].mxu1  ;;  %v1914_v53 = vpop.f32.mrb[60].mxu0 }
 0x450   :  { %v1682_v60 = vpop.f32.mrb[41].mxu1  ;;  %v1916_v3 = vpop.f32.mrb[61].mxu0 }
 0x451   :  { %v1684_v7 = vpop.f32.mrb[42].mxu1  ;;  %v1918_v63 = vpop.f32.mrb[62].mxu0 }
 0x452   :  { %v14345_v5 = vpack.c.bf16 %v1684_v7, %v1680_v29  ;;  %v1686_v9 = vpop.f32.mrb[43].mxu1  ;;  %v1997_v8 = vpack.c.bf16 %v1918_v63, %v1914_v53  ;;  %v1920_v12 = vpop.f32.mrb[63].mxu0 }
 0x453   :  { %v14347_v13 = vpack.c.bf16 %v1686_v9, %v1682_v60  ;;  %v1998_v14 = vpack.c.bf16 %v1920_v12, %v1916_v3 }
 0x455   :  { %2571 = vmatprep.mubr.bf16.mxu1 %v1998_v14  ;;  %2449 = vmatprep.mubr.bf16.mxu0 %v1998_v14 }
 0x456   :  { %2572 = vmatmul.mubr.bf16.vlgmr.msra.gmra.mrb[76].mxu1 %v1997_v8  ;;  %2450 = vmatmul.mubr.bf16.vlgmr.msra.gmra.mrb[72].mxu0 %v1997_v8 }
 0x457   :  { %v1690_v20 = vpop.f32.mrb[44].mxu1  ;;  %v1924_v23 = vpop.f32.mrb[64].mxu0  ;;  %11816 = vmatpush3.bf16.msra.mxu1 %v12595_v16  ;;  %2479 = vmatpush1.bf16.msra.mxu0 %v12592_v15 }
 0x458   :  { %v1692_v28 = vpop.f32.mrb[45].mxu1  ;;  %v1926_v30 = vpop.f32.mrb[65].mxu0  ;;  %2480 = vmatprep.subr.bf16.mxu0 %v12598_v17  ;;  %11817 = vmatprep.subr.bf16.mxu1 %v13466_v19 }
 0x459   :  { %v1694_v32 = vpop.f32.mrb[46].mxu1  ;;  %v1928_v33 = vpop.f32.mrb[66].mxu0 }
 0x45a   :  { %v14350_v38 = vpack.c.bf16 %v1694_v32, %v1690_v20  ;;  %v1696_v39 = vpop.f32.mrb[47].mxu1  ;;  %v2000_v58 = vpack.c.bf16 %v1928_v33, %v1924_v23  ;;  %v1930_v59 = vpop.f32.mrb[67].mxu0  ;;  %v12608_v32 = vld [vmem:[#allocation2] ss:$12 sps:$4 sm:$0xff]   ;;  %v12612_v33 = vld [vmem:[#allocation2 + $0x8] ss:$12 sps:$4 sm:$0xff]  }
 0x45b   :  { %v14352_v40 = vpack.c.bf16 %v1696_v39, %v1692_v28  ;;  %v2001_v41 = vpack.c.bf16 %v1930_v59, %v1926_v30  ;;  %2481 = vmatpush1.bf16.msra.mxu0 %v12596_v24  ;;  %11818 = vmatpush3.bf16.msra.mxu1 %v12599_v25  ;;  %v12615_v59 = vld [vmem:[#allocation2 + $0x1c] ss:$12 sps:$4 sm:$0xff]  }
 0x45c   :  { %2482 = vmatprep.subr.bf16.mxu0 %v12602_v31  ;;  %11819 = vmatprep.subr.bf16.mxu1 %v13466_v19 }
 0x45d   :  { %2579 = vmatprep.mubr.bf16.mxu1 %v2001_v41  ;;  %2459 = vmatprep.mubr.bf16.mxu0 %v2001_v41  ;;  %v12616_v41 = vld [vmem:[#allocation2 + $0xe0] ss:$12 sps:$4 sm:$0xff]  }
 0x45e   :  { %2580 = vmatmul.mubr.bf16.gmra.mrb[80].mxu1 %v2000_v58  ;;  %2460 = vmatmul.mubr.bf16.gmra.mrb[76].mxu0 %v2000_v58 }
 0x45f   :  { %v14355_v62 = vpop.f32.mrb[48].mxu1  ;;  %v1934_v1 = vpop.f32.mrb[68].mxu0  ;;  %2483 = vmatpush1.bf16.msra.mxu0 %v12600_v42  ;;  %11820 = vmatpush3.bf16.msra.mxu1 %v12603_v43  ;;  %v12613_v42 = vld [vmem:[#allocation2 + $0x18] ss:$12 sps:$4 sm:$0xff]   ;;  %v12617_v43 = vld [vmem:[#allocation2 + $0x20] ss:$12 sps:$4 sm:$0xff]  }
 0x460   :  { %v14357_v18 = vpop.f32.mrb[49].mxu1  ;;  %v1936_v49 = vpop.f32.mrb[69].mxu0  ;;  %2484 = vmatprep.subr.bf16.mxu0 %v12606_v61  ;;  %11821 = vmatprep.subr.bf16.mxu1 %v13466_v19  ;;  %v2003_v53 = vpack.c.bf16 %v1934_v1, %v1934_v1  ;;  %v12620_v61 = vld [vmem:[#allocation2 + $0x34] ss:$12 sps:$4 sm:$0xff]   ;;  %v12621_v1 = vld [vmem:[#allocation2 + $0xf8] ss:$12 sps:$4 sm:$0xff]  }
 0x461   :  { %v1704_v55 = vpop.f32.mrb[50].mxu1  ;;  %v2004_v57 = vpack.c.bf16 %v1936_v49, %v1936_v49  ;;  %v1938_v2 = vpop.f32.mrb[70].mxu0 }
 0x462   :  { %v1705_v29 = vpop.f32.mrb[51].mxu1  ;;  %v1939_v60 = vpop.f32.mrb[71].mxu0  ;;  %v12618_v55 = vld [vmem:[#allocation2 + $0x30] ss:$12 sps:$4 sm:$0xff]  }
 0x463   :  { %2587 = vmatprep.mubr.bf16.mxu1 %v2004_v57  ;;  %2469 = vmatprep.mubr.bf16.mxu0 %v2004_v57  ;;  %v12622_v57 = vld [vmem:[#allocation2 + $0x38] ss:$12 sps:$4 sm:$0xff]   ;;  %v12626_v29 = vld [vmem:[#allocation2 + $0x110] ss:$12 sps:$4 sm:$0xff]  }
 0x464   :  { %2485 = vmatpush1.bf16.msra.mxu0 %v12604_v50  ;;  %11822 = vmatpush3.bf16.msra.mxu1 %v12607_v51  ;;  %v12627_v60 = vld [vmem:[#allocation2 + $0x50] ss:$12 sps:$4 sm:$0xff]  }
 0x465   :  { %2980 = vmatprep.subr.bf16.mxu0 %v12610_v4  ;;  %11234 = vmatprep.subr.bf16.mxu1 %v12611_v22  ;;  %v12625_v22 = vld [vmem:[#allocation2 + $0x4c] ss:$12 sps:$4 sm:$0xff]  }
 0x466   :  { %2588 = vmatmul.mubr.bf16.gmra.mrb[84].mxu1 %v2003_v53  ;;  %2470 = vmatmul.mubr.bf16.gmra.mrb[80].mxu0 %v2003_v53  ;;  %v12623_v53 = vld [vmem:[#allocation2 + $0x48] ss:$12 sps:$4 sm:$0xff]  }
 0x467   :  { %v1741_v3 = vpop.f32.mrb[52].mxu1  ;;  %2510 = vmatprep.mubr.bf16.mxu0 %v13465_v0  ;;  %11823 = vmatprep.mubr.msk.bf16.mxu1 %vm13467_vm1, %v13466_v19 }
 0x468   :  { %v11783_v7 = vpop.f32.mrb[53].mxu1 }
 0x469   :  { %v1744_v63 = vpop.f32.mrb[54].mxu1  ;;  %v12631_v7 = vld [vmem:[#allocation2 + $0x128] ss:$12 sps:$4 sm:$0xff]  }
 0x46a   :  { %v14363_v9 = vpack.c.bf16 %v1744_v63, %v1741_v3  ;;  %v11784_v8 = vpop.f32.mrb[55].mxu1  ;;  %v12630_v3 = vld [vmem:[#allocation2 + $0x64] ss:$12 sps:$4 sm:$0xff]  }
 0x46f   :  { %v1749_v12 = vpop.f32.mrb[56].mxu1 }
 0x470   :  { %v11787_v14 = vpop.f32.mrb[57].mxu1 }
 0x471   :  { %v1752_v15 = vpop.f32.mrb[58].mxu1  ;;  %v12628_v14 = vld [vmem:[#allocation2 + $0x60] ss:$12 sps:$4 sm:$0xff]  }
 0x472   :  { %v14365_v16 = vpack.c.bf16 %v1752_v15, %v1749_v12  ;;  %v11788_v17 = vpop.f32.mrb[59].mxu1  ;;  %v12632_v15 = vld [vmem:[#allocation2 + $0x68] ss:$12 sps:$4 sm:$0xff]  }
 0x477   :  { %v14367_v20 = vpop.f32.mrb[60].mxu1 }
 0x478   :  { %v11791_v23 = vpop.f32.mrb[61].mxu1 }
 0x479   :  { %v1760_v24 = vpop.f32.mrb[62].mxu1 }
 0x47a   :  { %v11792_v25 = vpop.f32.mrb[63].mxu1  ;;  %v12635_v24 = vld [vmem:[#allocation2 + $0x7c] ss:$12 sps:$4 sm:$0xff]  }
 0x47b   :  { %v12636_v25 = vld [vmem:[#allocation2 + $0x140] ss:$12 sps:$4 sm:$0xff]  }
 0x47f   :  { %v1975_v28 = vpop.f32.mrb[64].mxu1 }
 0x480   :  { %v11805_v30 = vpop.f32.mrb[65].mxu1 }
 0x481   :  { %v1978_v31 = vpop.f32.mrb[66].mxu1  ;;  %v12637_v30 = vld [vmem:[#allocation2 + $0x80] ss:$12 sps:$4 sm:$0xff]  }
 0x482   :  { %v1999_v39 = vpack.c.bf16 %v1978_v31, %v1975_v28  ;;  %v11806_v58 = vpop.f32.mrb[67].mxu1  ;;  %v12633_v28 = vld [vmem:[#allocation2 + $0x78] ss:$12 sps:$4 sm:$0xff]   ;;  %v12640_v31 = vld [vmem:[#allocation2 + $0x94] ss:$12 sps:$4 sm:$0xff]  }
 0x483   :  { %v12645_v58 = vld [vmem:[#allocation2 + $0xac] ss:$12 sps:$4 sm:$0xff]  }
 0x484   :  { %10300 = vmatmul.mubr.msk.bf16.vlgmr.msra.gmra.mrb[72].mxu0 %vm2407_vm3, %v1999_v39  ;;  %11824 = vmatmul.mubr.msk.bf16.vlgmr.msra.gmra.mrb[88].mxu1 %vm2407_vm3, %v1999_v39  ;;  %v12642_v39 = vld [vmem:[#allocation2 + $0x98] ss:$12 sps:$4 sm:$0xff]  }
 0x485   :  { %2981 = vmatpush1.bf16.msra.mxu0 %v12608_v32  ;;  %11235 = vmatpush3.bf16.msra.mxu1 %v12612_v33  ;;  %v12641_v32 = vld [vmem:[#allocation2 + $0x158] ss:$12 sps:$4 sm:$0xff]   ;;  %v12638_v33 = vld [vmem:[#allocation2 + $0x90] ss:$12 sps:$4 sm:$0xff]  }
 0x486   :  { %2982 = vmatprep.subr.bf16.mxu0 %v12615_v59  ;;  %11236 = vmatprep.subr.bf16.mxu1 %v12616_v41  ;;  %v12646_v59 = vld [vmem:[#allocation2 + $0x170] ss:$12 sps:$4 sm:$0xff]   ;;  %v12643_v41 = vld [vmem:[#allocation2 + $0xa8] ss:$12 sps:$4 sm:$0xff]  }
 0x487   :  { %v1983_v49 = vpop.f32.mrb[68].mxu1  ;;  %2520 = vmatprep.mubr.bf16.mxu0 %v13465_v0  ;;  %11827 = vmatprep.mubr.msk.bf16.mxu1 %vm13467_vm1, %v13466_v19 }
 0x488   :  { %v11809_v50 = vpop.f32.mrb[69].mxu1 }
 0x489   :  { %2983 = vmatpush1.bf16.msra.mxu0 %v12613_v42  ;;  %11237 = vmatpush3.bf16.msra.mxu1 %v12617_v43  ;;  %v1986_v51 = vpop.f32.mrb[70].mxu1  ;;  %v12647_v42 = vld [vmem:[#allocation2 + $0xb0] ss:$12 sps:$4 sm:$0xff]   ;;  %v12655_v50 = vld [vmem:[#allocation2 + $0x1a0] ss:$12 sps:$4 sm:$0xff]  }
 0x48a   :  { %v2002_v2 = vpack.c.bf16 %v1986_v51, %v1983_v49  ;;  %2984 = vmatprep.subr.bf16.mxu0 %v12620_v61  ;;  %11238 = vmatprep.subr.bf16.mxu1 %v12621_v1  ;;  %v11810_v4 = vpop.f32.mrb[71].mxu1  ;;  %v12650_v43 = vld [vmem:[#allocation2 + $0xc4] ss:$12 sps:$4 sm:$0xff]   ;;  %v12651_v61 = vld [vmem:[#allocation2 + $0x188] ss:$12 sps:$4 sm:$0xff]  }
 0x48b   :  { %v12654_v1 = vld [vmem:[#allocation2 + $0xdc] ss:$12 sps:$4 sm:$0xff]   ;;  %v12652_v49 = vld [vmem:[#allocation2 + $0xd8] ss:$12 sps:$4 sm:$0xff]   ;;  %v12658_v51 = vld [vmem:[#allocation2 + $0xf4] ss:$12 sps:$4 sm:$0xff]   ;;  %v1770_v4 = vpack.c.bf16 %v14357_v18, %v14357_v18 }
 0x48c   :  { %10301 = vmatmul.mubr.msk.bf16.gmra.mrb[76].mxu0 %vm2407_vm3, %v2002_v2  ;;  %11828 = vmatmul.mubr.msk.bf16.gmra.mrb[92].mxu1 %vm2407_vm3, %v2002_v2  ;;  %v12662_v2 = vld [vmem:[#allocation2 + $0x10c] ss:$12 sps:$4 sm:$0xff]   ;;  %v12669_v18 = vld [vmem:[#allocation2 + $0x13c] ss:$12 sps:$4 sm:$0xff]  }
 0x48d   :  { %2985 = vmatpush1.bf16.msra.mxu0 %v12618_v55  ;;  %11239 = vmatpush3.bf16.msra.mxu1 %v12622_v57  ;;  %v12656_v55 = vld [vmem:[#allocation2 + $0xf0] ss:$12 sps:$4 sm:$0xff]   ;;  %v12659_v57 = vld [vmem:[#allocation2 + $0x1b8] ss:$12 sps:$4 sm:$0xff]  }
 0x48e   :  { %2986 = vmatprep.subr.bf16.mxu0 %v12625_v22  ;;  %11240 = vmatprep.subr.bf16.mxu1 %v12626_v29  ;;  %v12660_v22 = vld [vmem:[#allocation2 + $0x108] ss:$12 sps:$4 sm:$0xff]   ;;  %v12663_v29 = vld [vmem:[#allocation2 + $0x1d0] ss:$12 sps:$4 sm:$0xff]  }
 0x48f   :  { %v1991_v63 = vpop.f32.mrb[72].mxu1  ;;  %2530 = vmatprep.mubr.bf16.mxu0 %v13465_v0  ;;  %11831 = vmatprep.mubr.msk.bf16.mxu1 %vm13467_vm1, %v13466_v19 }
 0x490   :  { %v2005_v8 = vpack.c.bf16 %v1991_v63, %v1991_v63  ;;  %v11813_v12 = vpop.f32.mrb[73].mxu1  ;;  %v12672_v63 = vld [vmem:[#allocation2 + $0x154] ss:$12 sps:$4 sm:$0xff]  }
 0x491   :  { %2987 = vmatpush1.bf16.msra.mxu0 %v12623_v53  ;;  %11241 = vmatpush3.bf16.msra.mxu1 %v12627_v60  ;;  %v1994_v17 = vpop.f32.mrb[74].mxu1  ;;  %v12666_v53 = vld [vmem:[#allocation2 + $0x124] ss:$12 sps:$4 sm:$0xff]   ;;  %v12664_v60 = vld [vmem:[#allocation2 + $0x120] ss:$12 sps:$4 sm:$0xff]  }
 0x492   :  { %2988 = vmatprep.subr.bf16.mxu0 %v12630_v3  ;;  %11242 = vmatprep.subr.bf16.mxu1 %v12631_v7  ;;  %v11814_v23 = vpop.f32.mrb[75].mxu1  ;;  %v1769_v3 = vpack.c.bf16 %v14355_v62, %v14355_v62  ;;  %v12667_v7 = vld [vmem:[#allocation2 + $0x138] ss:$12 sps:$4 sm:$0xff]   ;;  %v12673_v62 = vld [vmem:[#allocation2 + $0x168] ss:$12 sps:$4 sm:$0xff]  }
 0x493   :  { %v12675_v12 = vld [vmem:[#allocation2 + $0x16c] ss:$12 sps:$4 sm:$0xff]   ;;  %v12709_v23 = vld [vmem:[#allocation2 + $0x450] ss:$12 sps:$4 sm:$0xff]  }
 0x494   :  { %10302 = vmatmul.mubr.msk.bf16.gmra.mrb[80].mxu0 %vm2407_vm3, %v2005_v8  ;;  %11832 = vmatmul.mubr.msk.bf16.gmra.mrb[96].mxu1 %vm2407_vm3, %v2005_v8  ;;  %v12670_v8 = vld [vmem:[#allocation2 + $0x150] ss:$12 sps:$4 sm:$0xff]   ;;  %v12706_v17 = vld [vmem:[#allocation2 + $0x438] ss:$12 sps:$4 sm:$0xff]  }
 0x495   :  { %2989 = vmatpush1.bf16.msra.mxu0 %v12628_v14  ;;  %11243 = vmatpush3.bf16.msra.mxu1 %v12632_v15  ;;  %v12676_v14 = vld [vmem:[#allocation2 + $0x180] ss:$12 sps:$4 sm:$0xff]   ;;  %v12708_v15 = vld [vmem:[#allocation2 + $0x43c] ss:$12 sps:$4 sm:$0xff]  }
 0x496   :  { %3012 = vmatprep.mubr.bf16.mxu0 %v14347_v13  ;;  %3134 = vmatprep.mubr.bf16.mxu1 %v14347_v13  ;;  %v12648_v13 = vld [vmem:[#allocation2 + $0xc0] ss:$12 sps:$4 sm:$0xff]  }
 0x497   :  { %2990 = vmatprep.subr.bf16.mxu0 %v12635_v24  ;;  %11244 = vmatprep.subr.bf16.mxu1 %v12636_v25  ;;  %v12711_v24 = vld [vmem:[#allocation2 + $0x454] ss:$12 sps:$4 sm:$0xff]   ;;  %v12714_v25 = vld [vmem:[#allocation2 + $0x46c] ss:$12 sps:$4 sm:$0xff]  }
 0x499   :  { %2991 = vmatpush1.bf16.msra.mxu0 %v12633_v28  ;;  %11245 = vmatpush3.bf16.msra.mxu1 %v12637_v30  ;;  %v12712_v28 = vld [vmem:[#allocation2 + $0x468] ss:$12 sps:$4 sm:$0xff]   ;;  %v12717_v30 = vld [vmem:[#allocation2 + $0x484] ss:$12 sps:$4 sm:$0xff]  }
 0x49a   :  { %2992 = vmatprep.subr.bf16.mxu0 %v12640_v31  ;;  %11246 = vmatprep.subr.bf16.mxu1 %v12641_v32  ;;  %v12718_v31 = vld [vmem:[#allocation2 + $0x488] ss:$12 sps:$4 sm:$0xff]   ;;  %v12715_v32 = vld [vmem:[#allocation2 + $0x480] ss:$12 sps:$4 sm:$0xff]  }
 0x49d   :  { %2993 = vmatpush1.bf16.msra.mxu0 %v12638_v33  ;;  %11247 = vmatpush3.bf16.msra.mxu1 %v12642_v39  ;;  %v12719_v33 = vld [vmem:[#allocation2 + $0x3c8] ss:$12 sps:$4 sm:$0xff]  }
 0x49e   :  { %2994 = vmatprep.subr.bf16.mxu0 %v12645_v58  ;;  %11248 = vmatprep.subr.bf16.mxu1 %v12646_v59  ;;  %v12722_v39 = vld [vmem:[#allocation2 + $0x49c] ss:$12 sps:$4 sm:$0xff]   ;;  %v12723_v58 = vld [vmem:[#allocation2 + $0x4a0] ss:$12 sps:$4 sm:$0xff]  }
 0x49f   :  { %v12724_v59 = vld [vmem:[#allocation2 + $0x3e0] ss:$12 sps:$4 sm:$0xff]  }
 0x4a1   :  { %2995 = vmatpush1.bf16.msra.mxu0 %v12643_v41  ;;  %11249 = vmatpush3.bf16.msra.mxu1 %v12647_v42  ;;  %v12728_v41 = vld [vmem:[#allocation2 + $0x4b8] ss:$12 sps:$4 sm:$0xff]  }
 0x4a2   :  { %2996 = vmatprep.subr.bf16.mxu0 %v12650_v43  ;;  %11835 = vmatprep.subr.bf16.mxu1 %v13466_v19  ;;  %v12720_v42 = vld [vmem:[#allocation2 + $0x498] ss:$12 sps:$4 sm:$0xff]   ;;  %v12727_v43 = vld [vmem:[#allocation2 + $0x4b4] ss:$12 sps:$4 sm:$0xff]  }
 0x4a4   :  { %3135 = vmatmul.mubr.bf16.vlgmr.msra.gmra.mrb[100].mxu1 %v14345_v5 }
 0x4a5   :  { %2997 = vmatpush1.bf16.msra.mxu0 %v12648_v13  ;;  %3142 = vmatprep.mubr.bf16.mxu1 %v14352_v40  ;;  %v12729_v13 = vld [vmem:[#allocation2 + $0x3f8] ss:$12 sps:$4 sm:$0xff]  }
 0x4a6   :  { %11836 = vmatpush3.bf16.msra.mxu1 %v12651_v61  ;;  %2998 = vmatprep.subr.bf16.mxu0 %v12654_v1  ;;  %v12733_v61 = vld [vmem:[#allocation2 + $0x4d0] ss:$12 sps:$4 sm:$0xff]  }
 0x4a7   :  { %11837 = vmatprep.subr.bf16.mxu1 %v13466_v19  ;;  %v12725_v1 = vld [vmem:[#allocation2 + $0x4b0] ss:$12 sps:$4 sm:$0xff]  }
 0x4a9   :  { %2999 = vmatpush1.bf16.msra.mxu0 %v12652_v49  ;;  %v12732_v49 = vld [vmem:[#allocation2 + $0x4cc] ss:$12 sps:$4 sm:$0xff]  }
 0x4aa   :  { %11838 = vmatpush3.bf16.msra.mxu1 %v12655_v50  ;;  %3000 = vmatprep.subr.bf16.mxu0 %v12658_v51  ;;  %v12734_v50 = vld [vmem:[#allocation2 + $0x410] ss:$12 sps:$4 sm:$0xff]   ;;  %v12738_v51 = vld [vmem:[#allocation2 + $0x4e8] ss:$12 sps:$4 sm:$0xff]  }
 0x4ab   :  { %11839 = vmatprep.subr.bf16.mxu1 %v13466_v19 }
 0x4ac   :  { %3143 = vmatmul.mubr.bf16.gmra.mrb[104].mxu1 %v14350_v38 }
 0x4ad   :  { %3001 = vmatpush1.bf16.msra.mxu0 %v12656_v55  ;;  %3150 = vmatprep.mubr.bf16.mxu1 %v1770_v4  ;;  %v12730_v55 = vld [vmem:[#allocation2 + $0x4c8] ss:$12 sps:$4 sm:$0xff]  }
 0x4ae   :  { %11840 = vmatpush3.bf16.msra.mxu1 %v12659_v57  ;;  %3002 = vmatprep.subr.bf16.mxu0 %v12662_v2  ;;  %v12737_v57 = vld [vmem:[#allocation2 + $0x4e4] ss:$12 sps:$4 sm:$0xff]   ;;  %v12739_v2 = vld [vmem:[#allocation2 + $0x428] ss:$12 sps:$4 sm:$0xff]  }
 0x4af   :  { %11841 = vmatprep.subr.bf16.mxu1 %v13466_v19 }
 0x4b1   :  { %3003 = vmatpush1.bf16.msra.mxu0 %v12660_v22  ;;  %v12735_v22 = vld [vmem:[#allocation2 + $0x4e0] ss:$12 sps:$4 sm:$0xff]  }
 0x4b2   :  { %11842 = vmatpush3.bf16.msra.mxu1 %v12663_v29  ;;  %3004 = vmatprep.subr.bf16.mxu0 %v12666_v53  ;;  %v12742_v29 = vld [vmem:[#allocation2 + $0x4fc] ss:$12 sps:$4 sm:$0xff]   ;;  %v12744_v53 = vld [vmem:[#allocation2 + $0x440] ss:$12 sps:$4 sm:$0xff]  }
 0x4b3   :  { %3242 = vmatprep.subr.bf16.mxu1 %v14175_v36  ;;  %v12678_v36 = vld [vmem:[#allocation2 + $0x184] ss:$12 sps:$4 sm:$0xff]  }
 0x4b4   :  { %3151 = vmatmul.mubr.bf16.gmra.mrb[108].mxu1 %v1769_v3 }
 0x4b5   :  { %3005 = vmatpush1.bf16.msra.mxu0 %v12664_v60  ;;  %11843 = vmatprep.mubr.msk.bf16.mxu1 %vm13467_vm1, %v13466_v19  ;;  %v12748_v60 = vld [vmem:[#allocation2 + $0x518] ss:$12 sps:$4 sm:$0xff]  }
 0x4b6   :  { %3006 = vmatprep.subr.bf16.mxu0 %v12669_v18  ;;  %v12747_v18 = vld [vmem:[#allocation2 + $0x514] ss:$12 sps:$4 sm:$0xff]  }
 0x4b9   :  { %3007 = vmatpush1.bf16.msra.mxu0 %v12667_v7  ;;  %v12745_v7 = vld [vmem:[#allocation2 + $0x510] ss:$12 sps:$4 sm:$0xff]  }
 0x4ba   :  { %3008 = vmatprep.subr.bf16.mxu0 %v12672_v63  ;;  %v12749_v63 = vld [vmem:[#allocation2 + $0x458] ss:$12 sps:$4 sm:$0xff]  }
 0x4bc   :  { %11844 = vmatmul.mubr.msk.bf16.vlgmr.msra.gmra.mrb[88].mxu1 %vm2407_vm3, %v14363_v9 }
 0x4bd   :  { %3243 = vmatpush1.bf16.msra.mxu1 %v14168_v26  ;;  %3009 = vmatpush1.bf16.msra.mxu0 %v12670_v8  ;;  %v12681_v26 = vld [vmem:[#allocation2 + $0x19c] ss:$12 sps:$4 sm:$0xff]  }
 0x4be   :  { %3244 = vmatprep.subr.bf16.mxu1 %v14197_v6  ;;  %3010 = vmatprep.subr.bf16.mxu0 %v12675_v12  ;;  %v1771_v6 = vpack.c.bf16 %v14367_v20, %v14367_v20  ;;  %v12705_v20 = vld [vmem:[#allocation2 + $0x424] ss:$12 sps:$4 sm:$0xff]   ;;  %v12752_v12 = vld [vmem:[#allocation2 + $0x52c] ss:$12 sps:$4 sm:$0xff]  }
 0x4bf   :  { %11847 = vmatprep.mubr.msk.bf16.mxu1 %vm13467_vm1, %v13466_v19 }
 0x4c1   :  { %3245 = vmatpush1.bf16.msra.mxu1 %v14190_v37  ;;  %3011 = vmatpush1.bf16.msra.mxu0 %v12673_v62  ;;  %v12679_v37 = vld [vmem:[#allocation2 + $0x198] ss:$12 sps:$4 sm:$0xff]   ;;  %v12753_v62 = vld [vmem:[#allocation2 + $0x530] ss:$12 sps:$4 sm:$0xff]  }
 0x4c2   :  { %3246 = vmatprep.subr.bf16.mxu1 %v14219_v46  ;;  %3041 = vmatprep.subr.bf16.mxu0 %v12678_v36  ;;  %v12684_v46 = vld [vmem:[#allocation2 + $0x1b4] ss:$12 sps:$4 sm:$0xff]  }
 0x4c4   :  { %3013 = vmatmul.mubr.bf16.vlgmr.msra.gmra.mrb[72].mxu0 %v14345_v5  ;;  %11848 = vmatmul.mubr.msk.bf16.gmra.mrb[92].mxu1 %vm2407_vm3, %v14365_v16  ;;  %v12693_v5 = vld [vmem:[#allocation2 + $0x3c4] ss:$12 sps:$4 sm:$0xff]  }
 0x4c5   :  { %3247 = vmatpush1.bf16.msra.mxu1 %v14212_v34  ;;  %3022 = vmatprep.mubr.bf16.mxu0 %v14352_v40  ;;  %v12682_v34 = vld [vmem:[#allocation2 + $0x1b0] ss:$12 sps:$4 sm:$0xff]   ;;  %v12694_v40 = vld [vmem:[#allocation2 + $0x3d8] ss:$12 sps:$4 sm:$0xff]  }
 0x4c6   :  { %3248 = vmatprep.subr.bf16.mxu1 %v14241_v21  ;;  %11851 = vmatprep.mubr.msk.bf16.mxu1 %vm13467_vm1, %v13466_v19  ;;  %v12688_v21 = vld [vmem:[#allocation2 + $0x1cc] ss:$12 sps:$4 sm:$0xff]  }
 0x4c7   :  { %3042 = vmatpush1.bf16.msra.mxu0 %v12676_v14  ;;  %v12750_v14 = vld [vmem:[#allocation2 + $0x528] ss:$12 sps:$4 sm:$0xff]  }
 0x4c8   :  { %3043 = vmatprep.subr.bf16.mxu0 %v12681_v26  ;;  %v12754_v26 = vld [vmem:[#allocation2 + $0x470] ss:$12 sps:$4 sm:$0xff]  }
 0x4c9   :  { %3249 = vmatpush1.bf16.msra.mxu1 %v14234_v10  ;;  %v12685_v10 = vld [vmem:[%s15342_s28 + $0x28] sm:$0xff]  }
 0x4ca   :  { %3250 = vmatprep.subr.bf16.mxu1 %v14260_v48  ;;  %v12686_v48 = vld [vmem:[#allocation2 + $0x1c8] ss:$12 sps:$4 sm:$0xff]  }
 0x4cb   :  { %3044 = vmatpush1.bf16.msra.mxu0 %v12679_v37 }
 0x4cc   :  { %3023 = vmatmul.mubr.bf16.gmra.mrb[76].mxu0 %v14350_v38  ;;  %11852 = vmatmul.mubr.msk.bf16.gmra.mrb[96].mxu1 %vm2407_vm3, %v1771_v6  ;;  %v12691_v38 = vld [vmem:[#allocation2 + $0x3c0] ss:$12 sps:$4 sm:$0xff]  }
 0x4cd   :  { %3251 = vmatpush1.bf16.msra.mxu1 %v14256_v44  ;;  %3032 = vmatprep.mubr.bf16.mxu0 %v1770_v4  ;;  %v12689_v44 = vld [vmem:[%s15342_s28 + $0x30] sm:$0xff]   ;;  %v12743_v4 = vld [vmem:[#allocation2 + $0x500] ss:$12 sps:$4 sm:$0xff]  }
 0x4ce   :  { %3274 = vmatprep.mubr.bf16.mxu1 %v13465_v0  ;;  %11855 = vmatprep.subr.bf16.mxu1 %v13466_v19 }
 0x4cf   :  { %3045 = vmatprep.subr.bf16.mxu0 %v12684_v46 }
 0x4d0   :  { %3046 = vmatpush1.bf16.msra.mxu0 %v12682_v34 }
 0x4d1   :  { %3047 = vmatprep.subr.bf16.mxu0 %v12688_v21 }
 0x4d4   :  { %3033 = vmatmul.mubr.bf16.gmra.mrb[80].mxu0 %v1769_v3  ;;  %10380 = vmatmul.mubr.msk.bf16.vlgmr.msra.gmra.mrb[112].mxu1 %vm605_vm2, %v12685_v10  ;;  %v12740_v3 = vld [vmem:[#allocation2 + $0x4f8] ss:$12 sps:$4 sm:$0xff]  }
 0x4d5   :  { %11856 = vmatpush3.bf16.msra.mxu1 %v14170_v27  ;;  %3048 = vmatpush1.bf16.msra.mxu0 %v12686_v48  ;;  %v12696_v27 = vld [vmem:[#allocation2 + $0x3dc] ss:$12 sps:$4 sm:$0xff]  }
 0x4d6   :  { %11857 = vmatprep.subr.bf16.mxu1 %v13466_v19  ;;  %3073 = vmatprep.mubr.bf16.mxu0 %v13465_v0 }
 0x4d7   :  { %3284 = vmatprep.mubr.bf16.mxu1 %v13465_v0  ;;  %3778 = vmatprep.subr.bf16.mxu0 %v12693_v5 }
 0x4d9   :  { %11858 = vmatpush3.bf16.msra.mxu1 %v14192_v45  ;;  %v12690_v45 = vld [vmem:[%s15342_s28 + $0x38] ss:$0 sps:$4 sm:$0xff]  }
 0x4da   :  { %11859 = vmatprep.subr.bf16.mxu1 %v13466_v19 }
 0x4dc   :  { %10366 = vmatmul.mubr.msk.bf16.vlgmr.msra.gmra.mrb[72].mxu0 %vm2407_vm3, %v14363_v9  ;;  %10381 = vmatmul.mubr.msk.bf16.gmra.mrb[116].mxu1 %vm605_vm2, %v12689_v44  ;;  %v12699_v9 = vld [vmem:[#allocation2 + $0x3f4] ss:$12 sps:$4 sm:$0xff]  }
 0x4dd   :  { %11860 = vmatpush3.bf16.msra.mxu1 %v14214_v35  ;;  %3083 = vmatprep.mubr.bf16.mxu0 %v13465_v0  ;;  %v12697_v35 = vld [vmem:[#allocation2 + $0x3f0] ss:$12 sps:$4 sm:$0xff]  }
 0x4de   :  { %11861 = vmatprep.subr.bf16.mxu1 %v13466_v19  ;;  %3294 = vmatprep.mubr.bf16.mxu1 %v13465_v0 }
 0x4df   :  { %3779 = vmatpush1.bf16.msra.mxu0 %v12691_v38 }
 0x4e0   :  { %3780 = vmatprep.subr.bf16.mxu0 %v12696_v27 }
 0x4e1   :  { %11862 = vmatpush3.bf16.msra.mxu1 %v14236_v11  ;;  %v12702_v11 = vld [vmem:[#allocation2 + $0x40c] ss:$12 sps:$4 sm:$0xff]  }
 0x4e2   :  { %11863 = vmatprep.subr.bf16.mxu1 %v13466_v19 }
 0x4e3   :  { %3781 = vmatpush1.bf16.msra.mxu0 %v12694_v40 }
 0x4e4   :  { %10367 = vmatmul.mubr.msk.bf16.gmra.mrb[76].mxu0 %vm2407_vm3, %v14365_v16  ;;  %10382 = vmatmul.mubr.msk.bf16.gmra.mrb[120].mxu1 %vm605_vm2, %v12690_v45  ;;  %v12703_v16 = vld [vmem:[#allocation2 + $0x420] ss:$12 sps:$4 sm:$0xff]  }
 0x4e5   :  { %11864 = vmatpush3.bf16.msra.mxu1 %v14258_v47  ;;  %3093 = vmatprep.mubr.bf16.mxu0 %v13465_v0  ;;  %v12700_v47 = vld [vmem:[#allocation2 + $0x408] ss:$12 sps:$4 sm:$0xff]  }
 0x4e6   :  { %11865 = vmatprep.mubr.msk.bf16.mxu1 %vm13467_vm1, %v13466_v19  ;;  %3782 = vmatprep.subr.bf16.mxu0 %v12699_v9 }
 0x4e7   :  { %3783 = vmatpush1.bf16.msra.mxu0 %v12697_v35  ;;  %11283 = vmatprep.subr.bf16.mxu1 %v12718_v31 }
 0x4e8   :  { %3784 = vmatprep.subr.bf16.mxu0 %v12702_v11 }
 0x4eb   :  { %3785 = vmatpush1.bf16.msra.mxu0 %v12700_v47 }
 0x4ec   :  { %10368 = vmatmul.mubr.msk.bf16.gmra.mrb[80].mxu0 %vm2407_vm3, %v1771_v6  ;;  %11866 = vmatmul.mubr.msk.bf16.vlgmr.msra.gmra.mrb[124].mxu1 %vm605_vm2, %v12685_v10 }
 0x4ed   :  { %11869 = vmatprep.mubr.msk.bf16.mxu1 %vm13467_vm1, %v13466_v19  ;;  %3786 = vmatprep.subr.bf16.mxu0 %v12705_v20 }
 0x4ee   :  { %11284 = vmatpush3.bf16.msra.mxu1 %v12719_v33 }
 0x4ef   :  { %3787 = vmatpush1.bf16.msra.mxu0 %v12703_v16  ;;  %11285 = vmatprep.subr.bf16.mxu1 %v12723_v58 }
 0x4f0   :  { %3788 = vmatprep.subr.bf16.mxu0 %v12708_v15 }
 0x4f2   :  { %11286 = vmatpush3.bf16.msra.mxu1 %v12724_v59 }
 0x4f3   :  { %3789 = vmatpush1.bf16.msra.mxu0 %v12706_v17  ;;  %11287 = vmatprep.subr.bf16.mxu1 %v12728_v41 }
 0x4f4   :  { %11870 = vmatmul.mubr.msk.bf16.gmra.mrb[128].mxu1 %vm605_vm2, %v12689_v44  ;;  %3790 = vmatprep.subr.bf16.mxu0 %v12711_v24  ;;  %v12757_v44 = vld [vmem:[#allocation2 + $0x544] ss:$12 sps:$4 sm:$0xff]  }
 0x4f5   :  { %11873 = vmatprep.mubr.msk.bf16.mxu1 %vm13467_vm1, %v13466_v19 }
 0x4f6   :  { %11288 = vmatpush3.bf16.msra.mxu1 %v12729_v13 }
 0x4f7   :  { %3791 = vmatpush1.bf16.msra.mxu0 %v12709_v23  ;;  %11289 = vmatprep.subr.bf16.mxu1 %v12733_v61 }
 0x4f8   :  { %3792 = vmatprep.subr.bf16.mxu0 %v12714_v25 }
 0x4fa   :  { %11290 = vmatpush3.bf16.msra.mxu1 %v12734_v50 }
 0x4fb   :  { %3793 = vmatpush1.bf16.msra.mxu0 %v12712_v28  ;;  %11291 = vmatprep.subr.bf16.mxu1 %v12738_v51 }
 0x4fc   :  { %11874 = vmatmul.mubr.msk.bf16.gmra.mrb[132].mxu1 %vm605_vm2, %v12690_v45  ;;  %3794 = vmatprep.subr.bf16.mxu0 %v12717_v30 }
 0x4fe   :  { %11292 = vmatpush3.bf16.msra.mxu1 %v12739_v2 }
 0x4ff   :  { %3795 = vmatpush1.bf16.msra.mxu0 %v12715_v32  ;;  %11293 = vmatprep.subr.bf16.mxu1 %v12743_v4  ;;  %v12755_v4 = vld [vmem:[#allocation2 + $0x540] ss:$12 sps:$4 sm:$0xff]  }
 0x500   :  { %3796 = vmatprep.subr.bf16.mxu0 %v12722_v39 }
 0x502   :  { %11294 = vmatpush3.bf16.msra.mxu1 %v12744_v53 }
 0x503   :  { %3797 = vmatpush1.bf16.msra.mxu0 %v12720_v42  ;;  %11295 = vmatprep.subr.bf16.mxu1 %v12748_v60  ;;  %v12759_v60 = vld [vmem:[#allocation2 + $0x558] ss:$12 sps:$4 sm:$0xff]  }
 0x504   :  { %3798 = vmatprep.subr.bf16.mxu0 %v12727_v43 }
 0x506   :  { %11296 = vmatpush3.bf16.msra.mxu1 %v12749_v63 }
 0x507   :  { %3799 = vmatpush1.bf16.msra.mxu0 %v12725_v1  ;;  %11297 = vmatprep.subr.bf16.mxu1 %v12753_v62 }
 0x508   :  { %3800 = vmatprep.subr.bf16.mxu0 %v12732_v49 }
 0x50a   :  { %11298 = vmatpush3.bf16.msra.mxu1 %v12754_v26  ;;  %v12769_v26 = vld [vmem:[#allocation2 + $0x58c] ss:$12 sps:$4 sm:$0xff]  }
 0x50b   :  { %3801 = vmatpush1.bf16.msra.mxu0 %v12730_v55  ;;  %11877 = vmatprep.subr.bf16.mxu1 %v13466_v19 }
 0x50c   :  { %3802 = vmatprep.subr.bf16.mxu0 %v12737_v57 }
 0x50f   :  { %3803 = vmatpush1.bf16.msra.mxu0 %v12735_v22  ;;  %v12758_v22 = vld [vmem:[#allocation2 + $0x548] ss:$12 sps:$4 sm:$0xff]  }
 0x510   :  { %3804 = vmatprep.subr.bf16.mxu0 %v12742_v29  ;;  %v12761_v29 = vld [vmem:[#allocation2 + $0x55c] ss:$12 sps:$4 sm:$0xff]  }
 0x513   :  { %3805 = vmatpush1.bf16.msra.mxu0 %v12740_v3  ;;  %v12762_v3 = vld [vmem:[#allocation2 + $0x560] ss:$12 sps:$4 sm:$0xff]  }
 0x514   :  { %3806 = vmatprep.subr.bf16.mxu0 %v12747_v18 }
 0x517   :  { %3807 = vmatpush1.bf16.msra.mxu0 %v12745_v7  ;;  %v12765_v7 = vld [vmem:[#allocation2 + $0x574] ss:$12 sps:$4 sm:$0xff]  }
 0x518   :  { %3808 = vmatprep.subr.bf16.mxu0 %v12752_v12 }
 0x51b   :  { %3809 = vmatpush1.bf16.msra.mxu0 %v12750_v14  ;;  %v12766_v14 = vld [vmem:[#allocation2 + $0x578] ss:$12 sps:$4 sm:$0xff]  }
 0x51c   :  { %3839 = vmatprep.subr.bf16.mxu0 %v12757_v44 }
 0x529   :  { %v11209_v8 = vpop.f32.mrb[76].mxu1 }
 0x52a   :  { %v11210_v36 = vpop.f32.mrb[77].mxu1 }
 0x52b   :  { %v11211_v37 = vadd.f32 %v11210_v36, %v11209_v8  ;;  %v11212_v6 = vpop.f32.mrb[78].mxu1  ;;  %v12763_v36 = vld [vmem:[#allocation2 + $0x570] ss:$12 sps:$4 sm:$0xff]  }
 0x52c   :  { %v11213_v46 = vpop.f32.mrb[79].mxu1 }
 0x52d   :  { %v11214_v34 = vadd.f32 %v11213_v46, %v11212_v6  ;;  %v12767_v46 = vld [vmem:[#allocation2 + $0x588] ss:$12 sps:$4 sm:$0xff]  }
 0x531   :  { %v11215_v21 = vpop.f32.mrb[80].mxu1 }
 0x532   :  { %v11216_v10 = vpop.f32.mrb[81].mxu1 }
 0x533   :  { %v11217_v48 = vadd.f32 %v11216_v10, %v11215_v21  ;;  %v11218_v5 = vpop.f32.mrb[82].mxu1 }
 0x534   :  { %v11219_v38 = vpop.f32.mrb[83].mxu1 }
 0x535   :  { %v11220_v27 = vadd.f32 %v11219_v38, %v11218_v5 }
 0x539   :  { %v11221_v40 = vpop.f32.mrb[84].mxu1 }
 0x53a   :  { %v11222_v45 = vpop.f32.mrb[85].mxu1 }
 0x53b   :  { %v11223_v9 = vadd.f32 %v11222_v45, %v11221_v40  ;;  %v11224_v35 = vpop.f32.mrb[86].mxu1 }
 0x53c   :  { %v11225_v11 = vpop.f32.mrb[87].mxu1 }
 0x577   :  { %v11250_v47 = vpop.f32.mrb[100].mxu1 }
 0x578   :  { %v11251_v16 = vpop.f32.mrb[101].mxu1 }
 0x579   :  { %v11252_v20 = vadd.f32 %v11251_v16, %v11250_v47  ;;  %v11253_v15 = vpop.f32.mrb[102].mxu1 }
 0x57a   :  { %v11254_v17 = vpop.f32.mrb[103].mxu1 }
 0x57b   :  { %v14463_v23 = vadd.f32 %v11252_v20, %v11211_v37  ;;  %v11255_v24 = vadd.f32 %v11254_v17, %v11253_v15 }
 0x57d   :  { %v14465_v25 = vadd.f32 %v11255_v24, %v11214_v34  ;;  %v12770_v34 = vld [vmem:[#allocation2 + $0x590] ss:$12 sps:$4 sm:$0xff]  }
 0x57f   :  { %v11256_v28 = vpop.f32.mrb[104].mxu1 }
 0x580   :  { %v11257_v30 = vpop.f32.mrb[105].mxu1 }
 0x581   :  { %v11258_v31 = vadd.f32 %v11257_v30, %v11256_v28  ;;  %v11259_v32 = vpop.f32.mrb[106].mxu1  ;;  %v14495_v30 = vld [vmem:[%s15306_s8 + $0xc] sm:$0xff]  }
 0x582   :  { %v11260_v33 = vpop.f32.mrb[107].mxu1 }
 0x583   :  { %v14467_v39 = vadd.f32 %v11258_v31, %v11217_v48  ;;  %v11261_v58 = vadd.f32 %v11260_v33, %v11259_v32 }
 0x585   :  { %v14469_v59 = vadd.f32 %v11261_v58, %v11220_v27 }
 0x587   :  { %v11262_v41 = vpop.f32.mrb[108].mxu1 }
 0x588   :  { %v11263_v42 = vpop.f32.mrb[109].mxu1 }
 0x589   :  { %v11264_v43 = vadd.f32 %v11263_v42, %v11262_v41  ;;  %v11265_v13 = vpop.f32.mrb[110].mxu1 }
 0x58a   :  { %v11266_v61 = vpop.f32.mrb[111].mxu1 }
 0x58b   :  { %v14471_v1 = vadd.f32 %v11264_v43, %v11223_v9 }
 0x5a7   :  { %v3276_v49 = vpop.f32.mrb[112].mxu1 }
 0x5a8   :  { %v3278_v50 = vpop.f32.mrb[113].mxu1 }
 0x5a9   :  { %v3280_v51 = vpop.f32.mrb[114].mxu1 }
 0x5aa   :  { %v3359_v55 = vpack.c.bf16 %v3280_v51, %v3276_v49  ;;  %v3282_v57 = vpop.f32.mrb[115].mxu1 }
 0x5ab   :  { %v3360_v2 = vpack.c.bf16 %v3282_v57, %v3278_v50 }
 0x5ad   :  { %3810 = vmatprep.mubr.bf16.mxu0 %v3360_v2  ;;  %3932 = vmatprep.mubr.bf16.mxu1 %v3360_v2 }
 0x5ae   :  { %3811 = vmatmul.mubr.bf16.vlgmr.msra.gmra.mrb[72].mxu0 %v3359_v55  ;;  %3933 = vmatmul.mubr.bf16.vlgmr.msra.gmra.mrb[136].mxu1 %v3359_v55 }
 0x5af   :  { %v3286_v53 = vpop.f32.mrb[116].mxu1  ;;  %3840 = vmatpush1.bf16.msra.mxu0 %v12755_v4  ;;  %11878 = vmatpush3.bf16.msra.mxu1 %v12758_v22 }
 0x5b0   :  { %v3288_v18 = vpop.f32.mrb[117].mxu1  ;;  %3841 = vmatprep.subr.bf16.mxu0 %v12761_v29  ;;  %11879 = vmatprep.subr.bf16.mxu1 %v13466_v19 }
 0x5b1   :  { %v3290_v63 = vpop.f32.mrb[118].mxu1 }
 0x5b2   :  { %v3362_v8 = vpack.c.bf16 %v3290_v63, %v3286_v53  ;;  %v3292_v12 = vpop.f32.mrb[119].mxu1 }
 0x5b3   :  { %v3363_v62 = vpack.c.bf16 %v3292_v12, %v3288_v18  ;;  %3842 = vmatpush1.bf16.msra.mxu0 %v12759_v60  ;;  %11880 = vmatpush3.bf16.msra.mxu1 %v12762_v3 }
 0x5b4   :  { %3843 = vmatprep.subr.bf16.mxu0 %v12765_v7  ;;  %11881 = vmatprep.subr.bf16.mxu1 %v13466_v19 }
 0x5b5   :  { %3820 = vmatprep.mubr.bf16.mxu0 %v3363_v62  ;;  %3940 = vmatprep.mubr.bf16.mxu1 %v3363_v62 }
 0x5b6   :  { %3821 = vmatmul.mubr.bf16.gmra.mrb[76].mxu0 %v3362_v8  ;;  %3941 = vmatmul.mubr.bf16.gmra.mrb[140].mxu1 %v3362_v8 }
 0x5b7   :  { %v3296_v37 = vpop.f32.mrb[120].mxu1  ;;  %3844 = vmatpush1.bf16.msra.mxu0 %v12763_v36  ;;  %11882 = vmatpush3.bf16.msra.mxu1 %v12766_v14 }
 0x5b8   :  { %v3298_v6 = vpop.f32.mrb[121].mxu1  ;;  %3845 = vmatprep.subr.bf16.mxu0 %v12769_v26  ;;  %11883 = vmatprep.subr.bf16.mxu1 %v13466_v19  ;;  %v3365_v5 = vpack.c.bf16 %v3296_v37, %v3296_v37 }
 0x5b9   :  { %v3366_v21 = vpack.c.bf16 %v3298_v6, %v3298_v6  ;;  %v3300_v10 = vpop.f32.mrb[122].mxu1 }
 0x5ba   :  { %v3301_v48 = vpop.f32.mrb[123].mxu1 }
 0x5bb   :  { %3830 = vmatprep.mubr.bf16.mxu0 %v3366_v21  ;;  %3948 = vmatprep.mubr.bf16.mxu1 %v3366_v21 }
 0x5bc   :  { %3846 = vmatpush1.bf16.msra.mxu0 %v12767_v46  ;;  %11884 = vmatpush3.bf16.msra.mxu1 %v12770_v34 }
 0x5be   :  { %3831 = vmatmul.mubr.bf16.gmra.mrb[80].mxu0 %v3365_v5  ;;  %3949 = vmatmul.mubr.bf16.gmra.mrb[144].mxu1 %v3365_v5 }
 0x5bf   :  { %v3337_v44 = vpop.f32.mrb[124].mxu1  ;;  %3871 = vmatprep.mubr.bf16.mxu0 %v13465_v0  ;;  %11885 = vmatprep.mubr.msk.bf16.mxu1 %vm13467_vm1, %v13466_v19 }
 0x5c0   :  { %v11867_v38 = vpop.f32.mrb[125].mxu1 }
 0x5c1   :  { %v3340_v27 = vpop.f32.mrb[126].mxu1 }
 0x5c2   :  { %v3361_v40 = vpack.c.bf16 %v3340_v27, %v3337_v44  ;;  %v11868_v45 = vpop.f32.mrb[127].mxu1 }
 0x5c6   :  { %10446 = vmatmul.mubr.msk.bf16.vlgmr.msra.gmra.mrb[72].mxu0 %vm2407_vm3, %v3361_v40  ;;  %11886 = vmatmul.mubr.msk.bf16.vlgmr.msra.gmra.mrb[88].mxu1 %vm2407_vm3, %v3361_v40 }
 0x5c7   :  { %v3345_v9 = vpop.f32.mrb[128].mxu1  ;;  %3881 = vmatprep.mubr.bf16.mxu0 %v13465_v0  ;;  %11889 = vmatprep.mubr.msk.bf16.mxu1 %vm13467_vm1, %v13466_v19 }
 0x5c8   :  { %v11871_v35 = vpop.f32.mrb[129].mxu1 }
 0x5c9   :  { %v3348_v11 = vpop.f32.mrb[130].mxu1 }
 0x5ca   :  { %v3364_v47 = vpack.c.bf16 %v3348_v11, %v3345_v9  ;;  %v11872_v16 = vpop.f32.mrb[131].mxu1 }
 0x5ce   :  { %10447 = vmatmul.mubr.msk.bf16.gmra.mrb[76].mxu0 %vm2407_vm3, %v3364_v47  ;;  %11890 = vmatmul.mubr.msk.bf16.gmra.mrb[92].mxu1 %vm2407_vm3, %v3364_v47 }
 0x5cf   :  { %v3353_v20 = vpop.f32.mrb[132].mxu1  ;;  %3891 = vmatprep.mubr.bf16.mxu0 %v13465_v0  ;;  %11893 = vmatprep.mubr.msk.bf16.mxu1 %vm13467_vm1, %v13466_v19 }
 0x5d0   :  { %v11875_v15 = vpop.f32.mrb[133].mxu1  ;;  %v3367_v24 = vpack.c.bf16 %v3353_v20, %v3353_v20 }
 0x5d1   :  { %v3356_v17 = vpop.f32.mrb[134].mxu1 }
 0x5d2   :  { %v11876_v28 = vpop.f32.mrb[135].mxu1 }
 0x5d6   :  { %10448 = vmatmul.mubr.msk.bf16.gmra.mrb[80].mxu0 %vm2407_vm3, %v3367_v24  ;;  %11894 = vmatmul.mubr.msk.bf16.gmra.mrb[96].mxu1 %vm2407_vm3, %v3367_v24 }
 0x5d7   :  { %4176 = vmatprep.mubr.bf16.mxu1 %v13465_v0  ;;  %11913 = vmatprep.mubr.msk.bf16.mxu0 %vm4127_vm4, %v14495_v30 }
 0x681   :  { %v11299_v31 = vpop.f32.mrb[136].mxu1 }
 0x682   :  { %v11300_v32 = vpop.f32.mrb[137].mxu1 }
 0x683   :  { %v11301_v33 = vadd.f32 %v11300_v32, %v11299_v31  ;;  %v11302_v58 = vpop.f32.mrb[138].mxu1 }
 0x684   :  { %v11303_v41 = vpop.f32.mrb[139].mxu1 }
 0x685   :  { %v11304_v42 = vadd.f32 %v11303_v41, %v11302_v58  ;;  %v12135_v43 = vadd.f32 %v14463_v23, %v11301_v33  ;;  %v4027_v23 = vld [vmem:[%s15343_s5] ss:$2 sm:$0x7] }
 0x686   :  { %v14522_v63 = vrot.slane %v4027_v23, %v14128_v54 }
 0x687   :  { %v12138_v13 = vadd.f32 %v14465_v25, %v11304_v42  ;;  %v10452_v25 = vld [vmem:[%s15343_s5 + $0x1] ss:$2 sm:$0x7] }
 0x688   :  { %v14519_v7 = vrot.slane %v10452_v25, %v14126_v52  ;;  %v14525_v62 = vrot.slane %v10452_v25, %v14133_v56  ;;  %v14529_v14 = vrot.slane %v10452_v25, %v14128_v54 }
 0x689   :  { %v11305_v61 = vpop.f32.mrb[140].mxu1 }
 0x68a   :  { %v11306_v49 = vpop.f32.mrb[141].mxu1 }
 0x68b   :  { %v11307_v50 = vadd.f32 %v11306_v49, %v11305_v61  ;;  %v11308_v51 = vpop.f32.mrb[142].mxu1 }
 0x68c   :  { %v11309_v55 = vpop.f32.mrb[143].mxu1 }
 0x68d   :  { %v11310_v57 = vadd.f32 %v11309_v55, %v11308_v51  ;;  %v12141_v2 = vadd.f32 %v14467_v39, %v11307_v50  ;;  %v14513_v39 = vrot.slane %v4027_v23, %v14126_v52 }
 0x68f   :  { %v12144_v4 = vadd.f32 %v14469_v59, %v11310_v57  ;;  %v14516_v59 = vrot.slane %v4027_v23, %v14133_v56 }
 0x691   :  { %v11311_v22 = vpop.f32.mrb[144].mxu1 }
 0x692   :  { %v11312_v29 = vpop.f32.mrb[145].mxu1 }
 0x693   :  { %v11313_v53 = vadd.f32 %v11312_v29, %v11311_v22  ;;  %v11314_v60 = vpop.f32.mrb[146].mxu1 }
 0x694   :  { %v11315_v3 = vpop.f32.mrb[147].mxu1 }
 0x695   :  { %v14510_v18 = vadd.f32 %v14471_v1, %v11313_v53 }
 0x699   :  { %v3873_v8 = vpop.f32.mrb[72].mxu0  ;;  %v3990_v12 = vpop.f32.mrb[88].mxu1 }
 0x69a   :  { %v4044_v1 = vmul.f32 %v14513_v39, %v3873_v8  ;;  %v12136_v36 = vadd.f32 %v12135_v43, %v3990_v12  ;;  %v3875_v26 = vpop.f32.mrb[73].mxu0  ;;  %v11887_v37 = vpop.f32.mrb[89].mxu1 }
 0x69b   :  { %v4045_v6 = vmul.f32 %v14516_v59, %v3875_v26  ;;  %v3877_v46 = vpop.f32.mrb[74].mxu0  ;;  %v3993_v34 = vpop.f32.mrb[90].mxu1 }
 0x69c   :  { %v4077_v21 = vadd.f32 %v14519_v7, %v4044_v1  ;;  %v4046_v10 = vmul.f32 %v12136_v36, %v14522_v63  ;;  %v4047_v48 = vmul.f32 %v14513_v39, %v3877_v46  ;;  %v12139_v5 = vadd.f32 %v12138_v13, %v3993_v34  ;;  %v3879_v44 = vpop.f32.mrb[75].mxu0  ;;  %v11888_v38 = vpop.f32.mrb[91].mxu1 }
 0x69d   :  { %v4078_v27 = vadd.f32 %v14525_v62, %v4045_v6  ;;  %v4048_v40 = vmul.f32 %v14516_v59, %v3879_v44 }
 0x69e   :  { %v4079_v45 = vadd.f32 %v14529_v14, %v4046_v10  ;;  %v4080_v9 = vadd.f32 %v14519_v7, %v4047_v48  ;;  %v4049_v35 = vmul.f32 %v12139_v5, %v14522_v63  ;;  %v4092_v47 = vmax.f32 %v4077_v21, 0.0 }
 0x69f   :  { %v4081_v11 = vadd.f32 %v14525_v62, %v4048_v40  ;;  %v4093_v17 = vmax.f32 %v4078_v27, 0.0 }
 0x6a0   :  { %v4095_v16 = vmax.f32 %v4080_v9, 0.0  ;;  %v4082_v20 = vadd.f32 %v14529_v14, %v4049_v35  ;;  %v4094_v15 = vmax.f32 %v4079_v45, 0.0 }
 0x6a1   :  { %v4096_v24 = vmax.f32 %v4081_v11, 0.0  ;;  %v3883_v28 = vpop.f32.mrb[76].mxu0  ;;  %v3998_v31 = vpop.f32.mrb[92].mxu1 }
 0x6a2   :  { %v14542_v32 = vpack.c.bf16 %v4095_v16, %v4092_v47  ;;  %v4097_v33 = vmax.f32 %v4082_v20, 0.0  ;;  %v4050_v58 = vmul.f32 %v14513_v39, %v3883_v28  ;;  %v12142_v41 = vadd.f32 %v12141_v2, %v3998_v31  ;;  %v3885_v42 = vpop.f32.mrb[77].mxu0  ;;  %v11891_v43 = vpop.f32.mrb[93].mxu1  ;;  %v12802_v28 = vld [vmem:[#allocation5 + $0x2a8] ss:$12 sps:$4 sm:$0xff]  }
 0x6a3   :  { %v4051_v13 = vmul.f32 %v14516_v59, %v3885_v42  ;;  %v3887_v61 = vpop.f32.mrb[78].mxu0  ;;  %v4001_v49 = vpop.f32.mrb[94].mxu1  ;;  %v14546_v50 = vpack.c.bf16 %v4096_v24, %v4093_v17  ;;  %v12777_v42 = vld [vmem:[#allocation5 + $0x1e4] ss:$12 sps:$4 sm:$0xff]   ;;  %v12775_v43 = vld [vmem:[#allocation5 + $0x1e0] ss:$12 sps:$4 sm:$0xff]  }
 0x6a4   :  { %v14548_v51 = vpack.c.bf16 %v4097_v33, %v4094_v15  ;;  %v4083_v55 = vadd.f32 %v14519_v7, %v4050_v58  ;;  %v4052_v57 = vmul.f32 %v12142_v41, %v14522_v63  ;;  %v4053_v22 = vmul.f32 %v14513_v39, %v3887_v61  ;;  %v3889_v29 = vpop.f32.mrb[79].mxu0  ;;  %v11892_v53 = vpop.f32.mrb[95].mxu1  ;;  %v12803_v33 = vld [vmem:[#allocation5 + $0x1e8] ss:$12 sps:$4 sm:$0xff]   ;;  %v12778_v61 = vld [vmem:[#allocation5 + $0x1f8] ss:$12 sps:$4 sm:$0xff]  }
 0x6a5   :  { %v4084_v2 = vadd.f32 %v14525_v62, %v4051_v13  ;;  %v12145_v60 = vadd.f32 %v12144_v4, %v4001_v49  ;;  %v4054_v23 = vmul.f32 %v14516_v59, %v3889_v29  ;;  %4144 = vmatprep.subr.bf16.mxu1 %v14546_v50  ;;  %v12774_v58 = vld [vmem:[%s15306_s8 + $0x14] ss:$0 sps:$4 sm:$0x33]   ;;  %v12772_v41 = vld [vmem:[%s15306_s8 + $0x8] ss:$0 sps:$4 sm:$0x33]  }
 0x6a6   :  { %v4086_v3 = vadd.f32 %v14519_v7, %v4053_v22  ;;  %4145 = vmatpush1.bf16.msra.mxu1 %v14542_v32  ;;  %11907 = vmatprep.subr.bf16.mxu0 %v14548_v51  ;;  %v4085_v25 = vadd.f32 %v14529_v14, %v4052_v57  ;;  %v4098_v1 = vmax.f32 %v4083_v55, 0.0  ;;  %v12780_v13 = vld [vmem:[#allocation5 + $0x1fc] ss:$12 sps:$4 sm:$0xff]   ;;  %v12783_v49 = vld [vmem:[#allocation5 + $0x214] ss:$12 sps:$4 sm:$0xff]  }
 0x6a7   :  { %v4055_v8 = vmul.f32 %v12145_v60, %v14522_v63  ;;  %v4087_v12 = vadd.f32 %v14525_v62, %v4054_v23  ;;  %11908 = vmatpush3.bf16.msra.mxu0 %v14548_v51  ;;  %v4099_v36 = vmax.f32 %v4084_v2, 0.0  ;;  %v12781_v55 = vld [vmem:[#allocation5 + $0x210] ss:$12 sps:$4 sm:$0xff]   ;;  %v12786_v57 = vld [vmem:[#allocation5 + $0x22c] ss:$12 sps:$4 sm:$0xff]  }
 0x6a8   :  { %v4101_v4 = vmax.f32 %v4086_v3, 0.0  ;;  %v4100_v44 = vmax.f32 %v4085_v25, 0.0  ;;  %v12784_v22 = vld [vmem:[#allocation5 + $0x228] ss:$12 sps:$4 sm:$0xff]   ;;  %v12789_v29 = vld [vmem:[#allocation5 + $0x244] ss:$12 sps:$4 sm:$0xff]  }
 0x6a9   :  { %v4088_v26 = vadd.f32 %v14529_v14, %v4055_v8  ;;  %v4102_v37 = vmax.f32 %v4087_v12, 0.0  ;;  %v3893_v6 = vpop.f32.mrb[80].mxu0  ;;  %v4006_v46 = vpop.f32.mrb[96].mxu1  ;;  %v12787_v53 = vld [vmem:[#allocation5 + $0x240] ss:$12 sps:$4 sm:$0xff]  }
 0x6aa   :  { %v14564_v34 = vpack.c.bf16 %v4101_v4, %v4098_v1  ;;  %v4056_v21 = vmul.f32 %v14513_v39, %v3893_v6  ;;  %v12148_v10 = vadd.f32 %v14510_v18, %v4006_v46  ;;  %v3895_v48 = vpop.f32.mrb[81].mxu0  ;;  %v11895_v5 = vpop.f32.mrb[97].mxu1  ;;  %v12790_v2 = vld [vmem:[#allocation5 + $0x258] ss:$12 sps:$4 sm:$0xff]   ;;  %v12795_v60 = vld [vmem:[#allocation5 + $0x274] ss:$12 sps:$4 sm:$0xff]  }
 0x6ab   :  { %v4103_v38 = vmax.f32 %v4088_v26, 0.0  ;;  %v4057_v27 = vmul.f32 %v14516_v59, %v3895_v48  ;;  %v3897_v40 = vpop.f32.mrb[82].mxu0  ;;  %v4009_v45 = vpop.f32.mrb[98].mxu1  ;;  %v14569_v9 = vpack.c.bf16 %v4102_v37, %v4099_v36  ;;  %v12793_v23 = vld [vmem:[#allocation5 + $0x270] ss:$12 sps:$4 sm:$0xff]  }
 0x6ac   :  { %v4089_v35 = vadd.f32 %v14519_v7, %v4056_v21  ;;  %v4058_v11 = vmul.f32 %v12148_v10, %v14522_v63  ;;  %v3898_v47 = vpop.f32.mrb[83].mxu0  ;;  %v11896_v16 = vpop.f32.mrb[99].mxu1  ;;  %v12798_v3 = vld [vmem:[#allocation5 + $0x28c] ss:$12 sps:$4 sm:$0xff]   ;;  %v12796_v25 = vld [vmem:[#allocation5 + $0x288] ss:$12 sps:$4 sm:$0xff]  }
 0x6ad   :  { %v14573_v20 = vpack.c.bf16 %v4103_v38, %v4100_v44  ;;  %v4090_v18 = vadd.f32 %v14525_v62, %v4057_v27  ;;  %4146 = vmatprep.subr.bf16.mxu1 %v14569_v9  ;;  %v12801_v8 = vld [vmem:[#allocation5 + $0x2a4] ss:$12 sps:$4 sm:$0xff]   ;;  %v12799_v12 = vld [vmem:[#allocation5 + $0x2a0] ss:$12 sps:$4 sm:$0xff]   ;;  %v12806_v4 = vld [vmem:[#allocation5 + $0x2bc] ss:$12 sps:$4 sm:$0xff]  }
 0x6ae   :  { %v4104_v39 = vmax.f32 %v4089_v35, 0.0  ;;  %v4091_v15 = vadd.f32 %v14529_v14, %v4058_v11  ;;  %4147 = vmatpush1.bf16.msra.mxu1 %v14564_v34  ;;  %v12771_v14 = vld [vmem:[%s15306_s8] sm:$0xff]   ;;  %v12809_v46 = vld [vmem:[#allocation5 + $0x2d0] ss:$12 sps:$4 sm:$0xff]   ;;  %v12814_v10 = vld [vmem:[#allocation5 + $0x2e8] ss:$12 sps:$4 sm:$0xff]  }
 0x6af   :  { %v4105_v59 = vmax.f32 %v4090_v18, 0.0  ;;  %11909 = vmatprep.subr.bf16.mxu0 %v14573_v20  ;;  %v12804_v1 = vld [vmem:[#allocation5 + $0x2b8] ss:$12 sps:$4 sm:$0xff]   ;;  %v12807_v36 = vld [vmem:[#allocation5 + $0x2c0] ss:$12 sps:$4 sm:$0xff]  }
 0x6b0   :  { %v4113_v7 = vpack.c.bf16 %v4104_v39, %v4104_v39  ;;  %v4106_v17 = vmax.f32 %v4091_v15, 0.0  ;;  %11910 = vmatpush3.bf16.msra.mxu0 %v14573_v20  ;;  %v12808_v26 = vld [vmem:[#allocation5 + $0x200] ss:$12 sps:$4 sm:$0xff]   ;;  %v12812_v6 = vld [vmem:[#allocation5 + $0x2d8] ss:$12 sps:$4 sm:$0xff]  }
 0x6b1   :  { %v14581_v63 = vpack.c.bf16 %v4105_v59, %v4105_v59  ;;  %v12811_v37 = vld [vmem:[#allocation5 + $0x2d4] ss:$12 sps:$4 sm:$0xff]   ;;  %v12813_v21 = vld [vmem:[#allocation5 + $0x218] ss:$12 sps:$4 sm:$0xff]   ;;  %v12817_v5 = vld [vmem:[#allocation5 + $0x2f0] ss:$12 sps:$4 sm:$0xff]  }
 0x6b2   :  { %v14583_v24 = vpack.c.bf16 %v4106_v17, %v4106_v17  ;;  %v14586_v62 = vsel %vm4134_vm5, %v4113_v7, 0  ;;  %v12816_v48 = vld [vmem:[#allocation5 + $0x2ec] ss:$12 sps:$4 sm:$0xff]   ;;  %v12818_v44 = vld [vmem:[#allocation5 + $0x230] ss:$12 sps:$4 sm:$0xff]  }
 0x6b3   :  { %10455 = vmatprep.subr.msk.bf16.mxu1 %vm4134_vm5, %v14581_v63  ;;  %v12821_v38 = vld [vmem:[#allocation5 + $0x304] ss:$12 sps:$4 sm:$0xff]   ;;  %v12822_v27 = vld [vmem:[#allocation5 + $0x308] ss:$12 sps:$4 sm:$0xff]   ;;  %v12819_v40 = vld [vmem:[#allocation5 + $0x300] ss:$12 sps:$4 sm:$0xff]  }
 0x6b4   :  { %4149 = vmatpush1.bf16.msra.mxu1 %v14586_v62  ;;  %12405 = vmatprep.subr.msk.bf16.mxu0 %vm4134_vm5, %v14583_v24  ;;  %v14598_v31 = vsel %vm4134_vm5, %v14583_v24, 0  ;;  %v12823_v45 = vld [vmem:[#allocation5 + $0x248] ss:$12 sps:$4 sm:$0xff]   ;;  %v12824_v35 = vld [vmem:[#allocation5 + $0x318] ss:$12 sps:$4 sm:$0xff]  }
 0x6b5   :  { %11897 = vmatprep.subr.bf16.mxu1 %v14548_v51  ;;  %11912 = vmatpush3.bf16.msra.mxu0 %v14598_v31  ;;  %v12826_v11 = vld [vmem:[#allocation5 + $0x31c] ss:$12 sps:$4 sm:$0xff]   ;;  %v12827_v47 = vld [vmem:[#allocation5 + $0x320] ss:$12 sps:$4 sm:$0xff]   ;;  %v12832_v39 = vld [vmem:[#allocation5 + $0x338] ss:$12 sps:$4 sm:$0xff]  }
 0x6b6   :  { %11334 = vmatprep.subr.bf16.mxu0 %v12802_v28  ;;  %v12828_v16 = vld [vmem:[#allocation5 + $0x260] ss:$12 sps:$4 sm:$0xff]   ;;  %v12829_v15 = vld [vmem:[#allocation5 + $0x330] ss:$12 sps:$4 sm:$0xff]   ;;  %v12833_v59 = vld [vmem:[#allocation5 + $0x278] ss:$12 sps:$4 sm:$0xff]  }
 0x6b7   :  { %10456 = vmatmul.mubr.msk.bf16.vlgmr.msra.gmra.mrb[148].mxu1 %vm4127_vm4, %v12771_v14  ;;  %v12831_v18 = vld [vmem:[#allocation5 + $0x334] ss:$12 sps:$4 sm:$0xff]   ;;  %v12836_v7 = vld [vmem:[#allocation5 + $0x34c] ss:$12 sps:$4 sm:$0xff]   ;;  %v12837_v17 = vld [vmem:[#allocation5 + $0x350] ss:$12 sps:$4 sm:$0xff]  }
 0x6b8   :  { %11898 = vmatpush3.bf16.msra.mxu1 %v14548_v51  ;;  %4186 = vmatprep.mubr.bf16.mxu1 %v13465_v0  ;;  %v12834_v28 = vld [vmem:[#allocation5 + $0x348] ss:$12 sps:$4 sm:$0xff]  }
 0x6b9   :  { %11899 = vmatprep.subr.bf16.mxu1 %v14573_v20  ;;  %11914 = vmatmul.mubr.msk.bf16.vlgmr.msra.gmra.mrb[84].mxu0 %vm4127_vm4, %v12774_v58 }
 0x6ba   :  { %11335 = vmatpush3.bf16.msra.mxu0 %v12803_v33  ;;  %v12841_v33 = vld [vmem:[#allocation5 + $0x364] ss:$12 sps:$4 sm:$0xff]  }
 0x6bb   :  { %11336 = vmatprep.subr.bf16.mxu0 %v12807_v36 }
 0x6bc   :  { %11900 = vmatpush3.bf16.msra.mxu1 %v14573_v20 }
 0x6bd   :  { %12404 = vmatprep.subr.msk.bf16.mxu1 %vm4134_vm5, %v14583_v24 }
 0x6be   :  { %11337 = vmatpush3.bf16.msra.mxu0 %v12808_v26 }
 0x6bf   :  { %10457 = vmatmul.mubr.msk.bf16.gmra.mrb[152].mxu1 %vm4127_vm4, %v12772_v41  ;;  %11338 = vmatprep.subr.bf16.mxu0 %v12812_v6 }
 0x6c0   :  { %11902 = vmatpush3.bf16.msra.mxu1 %v14598_v31  ;;  %11903 = vmatprep.mubr.msk.bf16.mxu1 %vm4127_vm4, %v12771_v14  ;;  %v12838_v14 = vld [vmem:[#allocation5 + $0x290] ss:$12 sps:$4 sm:$0xff]  }
 0x6c1   :  { %4347 = vmatprep.subr.bf16.mxu1 %v14546_v50 }
 0x6c2   :  { %11339 = vmatpush3.bf16.msra.mxu0 %v12813_v21  ;;  %v12839_v21 = vld [vmem:[#allocation5 + $0x360] ss:$12 sps:$4 sm:$0xff]  }
 0x6c3   :  { %11340 = vmatprep.subr.bf16.mxu0 %v12817_v5 }
 0x6c6   :  { %11341 = vmatpush3.bf16.msra.mxu0 %v12818_v44  ;;  %v12843_v44 = vld [vmem:[#allocation5 + $0x378] ss:$12 sps:$4 sm:$0xff]  }
 0x6c7   :  { %11904 = vmatmul.mubr.msk.bf16.vlgmr.msra.gmra.mrb[156].mxu1 %vm4127_vm4, %v12772_v41  ;;  %11342 = vmatprep.subr.bf16.mxu0 %v12822_v27  ;;  %v12849_v27 = vld [vmem:[#allocation5 + $0x394] ss:$12 sps:$4 sm:$0xff]  }
 0x6c8   :  { %4348 = vmatpush1.bf16.msra.mxu1 %v14542_v32  ;;  %4379 = vmatprep.mubr.bf16.mxu1 %v13465_v0 }
 0x6c9   :  { %4349 = vmatprep.subr.bf16.mxu1 %v14569_v9 }
 0x6ca   :  { %11343 = vmatpush3.bf16.msra.mxu0 %v12823_v45  ;;  %v12850_v45 = vld [vmem:[#allocation5 + $0x398] ss:$12 sps:$4 sm:$0xff]  }
 0x6cb   :  { %11344 = vmatprep.subr.bf16.mxu0 %v12827_v47  ;;  %v12847_v47 = vld [vmem:[#allocation5 + $0x390] ss:$12 sps:$4 sm:$0xff]  }
 0x6cc   :  { %4350 = vmatpush1.bf16.msra.mxu1 %v14564_v34 }
 0x6cd   :  { %10465 = vmatprep.subr.msk.bf16.mxu1 %vm4134_vm5, %v14581_v63 }
 0x6ce   :  { %11345 = vmatpush3.bf16.msra.mxu0 %v12828_v16 }
 0x6cf   :  { %11346 = vmatprep.subr.bf16.mxu0 %v12832_v39  ;;  %v12854_v39 = vld [vmem:[#allocation5 + $0x3b0] ss:$12 sps:$4 sm:$0xff]  }
 0x6d0   :  { %4352 = vmatpush1.bf16.msra.mxu1 %v14586_v62 }
 0x6d1   :  { %4859 = vmatprep.subr.bf16.mxu1 %v12777_v42 }
 0x6d2   :  { %11347 = vmatpush3.bf16.msra.mxu0 %v12833_v59  ;;  %v12857_v59 = vld [vmem:[#allocation5 + $0x4] ss:$12 sps:$4 sm:$0xff]  }
 0x6d3   :  { %10466 = vmatmul.mubr.msk.bf16.vlgmr.msra.gmra.mrb[160].mxu1 %vm4127_vm4, %v14495_v30  ;;  %v12792_v30 = vld [vmem:[#allocation5 + $0x25c] ss:$12 sps:$4 sm:$0xff]   ;;  %11348 = vmatprep.subr.bf16.mxu0 %v12837_v17  ;;  %v12855_v17 = vld [vmem:[#allocation5] ss:$12 sps:$4 sm:$0xff]  }
 0x6d4   :  { %4389 = vmatprep.mubr.bf16.mxu1 %v13465_v0  ;;  %4860 = vmatpush1.bf16.msra.mxu1 %v12775_v43 }
 0x6d5   :  { %4861 = vmatprep.subr.bf16.mxu1 %v12780_v13 }
 0x6d6   :  { %11349 = vmatpush3.bf16.msra.mxu0 %v12838_v14 }
 0x6d8   :  { %4862 = vmatpush1.bf16.msra.mxu1 %v12778_v61 }
 0x6d9   :  { %4863 = vmatprep.subr.bf16.mxu1 %v12783_v49 }
 0x6db   :  { %10467 = vmatmul.mubr.msk.bf16.gmra.mrb[164].mxu1 %vm4127_vm4, %v12774_v58  ;;  %v12842_v58 = vld [vmem:[#allocation5 + $0x368] ss:$12 sps:$4 sm:$0xff]  }
 0x6dc   :  { %4864 = vmatpush1.bf16.msra.mxu1 %v12781_v55  ;;  %11917 = vmatprep.subr.bf16.mxu0 %v12842_v58 }
 0x6dd   :  { %4865 = vmatprep.subr.bf16.mxu1 %v12786_v57 }
 0x6e0   :  { %4866 = vmatpush1.bf16.msra.mxu1 %v12784_v22 }
 0x6e1   :  { %4867 = vmatprep.subr.bf16.mxu1 %v12789_v29 }
 0x6e4   :  { %4868 = vmatpush1.bf16.msra.mxu1 %v12787_v53 }
 0x6e5   :  { %4869 = vmatprep.subr.bf16.mxu1 %v12792_v30 }
 0x6e8   :  { %4870 = vmatpush1.bf16.msra.mxu1 %v12790_v2 }
 0x6e9   :  { %4871 = vmatprep.subr.bf16.mxu1 %v12795_v60 }
 0x6ec   :  { %4872 = vmatpush1.bf16.msra.mxu1 %v12793_v23 }
 0x6ed   :  { %4873 = vmatprep.subr.bf16.mxu1 %v12798_v3 }
 0x6f0   :  { %4874 = vmatpush1.bf16.msra.mxu1 %v12796_v25 }
 0x6f1   :  { %4875 = vmatprep.subr.bf16.mxu1 %v12801_v8 }
 0x6f4   :  { %4876 = vmatpush1.bf16.msra.mxu1 %v12799_v12 }
 0x6f5   :  { %4877 = vmatprep.subr.bf16.mxu1 %v12806_v4 }
 0x6f8   :  { %4878 = vmatpush1.bf16.msra.mxu1 %v12804_v1 }
 0x6f9   :  { %4879 = vmatprep.subr.bf16.mxu1 %v12811_v37 }
 0x6fc   :  { %4880 = vmatpush1.bf16.msra.mxu1 %v12809_v46 }
 0x6fd   :  { %4881 = vmatprep.subr.bf16.mxu1 %v12816_v48  ;;  %v12846_v48 = vld [vmem:[#allocation5 + $0x380] ss:$12 sps:$4 sm:$0xff]  }
 0x700   :  { %4882 = vmatpush1.bf16.msra.mxu1 %v12814_v10  ;;  %v12845_v10 = vld [vmem:[#allocation5 + $0x37c] ss:$12 sps:$4 sm:$0xff]  }
 0x701   :  { %4883 = vmatprep.subr.bf16.mxu1 %v12821_v38 }
 0x704   :  { %4884 = vmatpush1.bf16.msra.mxu1 %v12819_v40 }
 0x705   :  { %4885 = vmatprep.subr.bf16.mxu1 %v12826_v11 }
 0x708   :  { %4886 = vmatpush1.bf16.msra.mxu1 %v12824_v35 }
 0x709   :  { %4887 = vmatprep.subr.bf16.mxu1 %v12831_v18  ;;  %v12853_v18 = vld [vmem:[#allocation5 + $0x3ac] ss:$12 sps:$4 sm:$0xff]  }
 0x70c   :  { %4888 = vmatpush1.bf16.msra.mxu1 %v12829_v15  ;;  %v12851_v15 = vld [vmem:[#allocation5 + $0x3a8] ss:$12 sps:$4 sm:$0xff]  }
 0x70d   :  { %4889 = vmatprep.subr.bf16.mxu1 %v12836_v7  ;;  %v12858_v7 = vld [vmem:[#allocation5 + $0xc8] ss:$12 sps:$4 sm:$0xff]  }
 0x710   :  { %4890 = vmatpush1.bf16.msra.mxu1 %v12834_v28  ;;  %v12859_v28 = vld [vmem:[#allocation5 + $0x8] ss:$12 sps:$4 sm:$0xff]  }
 0x711   :  { %4910 = vmatprep.subr.bf16.mxu1 %v12841_v33  ;;  %v12862_v33 = vld [vmem:[#allocation5 + $0x1c] ss:$12 sps:$4 sm:$0xff]  }
 0x78a   :  { %v4178_v41 = vpop.f32.mrb[148].mxu1 }
 0x78b   :  { %v4180_v42 = vpop.f32.mrb[149].mxu1 }
 0x78c   :  { %v4182_v43 = vpop.f32.mrb[150].mxu1  ;;  %v14632_v13 = vpop.f32.mrb[84].mxu0 }
 0x78d   :  { %v14634_v61 = vpack.c.bf16 %v4182_v43, %v4178_v41  ;;  %v4184_v49 = vpop.f32.mrb[151].mxu1  ;;  %v4432_v55 = vpop.f32.mrb[85].mxu0  ;;  %v4451_v14 = vpack.c.bf16 %v14632_v13, %v14632_v13  ;;  %v12860_v41 = vld [vmem:[#allocation5 + $0x18] ss:$12 sps:$4 sm:$0xff]   ;;  %v12867_v43 = vld [vmem:[#allocation5 + $0x34] ss:$12 sps:$4 sm:$0xff]  }
 0x78e   :  { %v14636_v57 = vpack.c.bf16 %v4184_v49, %v4180_v42  ;;  %v11916_v22 = vpop.f32.mrb[86].mxu0  ;;  %v12864_v42 = vld [vmem:[#allocation5 + $0x20] ss:$12 sps:$4 sm:$0xff]   ;;  %v12868_v49 = vld [vmem:[#allocation5 + $0xf8] ss:$12 sps:$4 sm:$0xff]  }
 0x78f   :  { %v4435_v29 = vpop.f32.mrb[87].mxu0  ;;  %v12865_v13 = vld [vmem:[#allocation5 + $0x30] ss:$12 sps:$4 sm:$0xff]   ;;  %v12872_v22 = vld [vmem:[#allocation5 + $0x4c] ss:$12 sps:$4 sm:$0xff]  }
 0x790   :  { %v14638_v53 = vpack.c.bf16 %v4435_v29, %v4432_v55  ;;  %v12869_v55 = vld [vmem:[#allocation5 + $0x38] ss:$12 sps:$4 sm:$0xff]   ;;  %v12873_v29 = vld [vmem:[#allocation5 + $0x110] ss:$12 sps:$4 sm:$0xff]  }
 0x792   :  { %v14640_v30 = vpop.f32.mrb[152].mxu1 }
 0x793   :  { %v14642_v2 = vpop.f32.mrb[153].mxu1 }
 0x794   :  { %v4192_v60 = vpop.f32.mrb[154].mxu1 }
 0x795   :  { %v4193_v23 = vpop.f32.mrb[155].mxu1  ;;  %v12874_v60 = vld [vmem:[#allocation5 + $0x50] ss:$12 sps:$4 sm:$0xff]  }
 0x796   :  { %v12877_v23 = vld [vmem:[#allocation5 + $0x64] ss:$12 sps:$4 sm:$0xff]  }
 0x79a   :  { %v14644_v3 = vpop.f32.mrb[156].mxu1 }
 0x79b   :  { %v4229_v25 = vpop.f32.mrb[157].mxu1 }
 0x79c   :  { %v11906_v8 = vpop.f32.mrb[158].mxu1 }
 0x79d   :  { %v4232_v12 = vpop.f32.mrb[159].mxu1  ;;  %v12875_v8 = vld [vmem:[#allocation5 + $0x60] ss:$12 sps:$4 sm:$0xff]  }
 0x79e   :  { %v14646_v1 = vpack.c.bf16 %v4232_v12, %v4229_v25  ;;  %v12878_v25 = vld [vmem:[#allocation5 + $0x128] ss:$12 sps:$4 sm:$0xff]  }
 0x79f   :  { %v12879_v12 = vld [vmem:[#allocation5 + $0x68] ss:$12 sps:$4 sm:$0xff]  }
 0x7a6   :  { %v4381_v4 = vpop.f32.mrb[160].mxu1 }
 0x7a7   :  { %v4383_v36 = vpop.f32.mrb[161].mxu1 }
 0x7a8   :  { %v4385_v26 = vpop.f32.mrb[162].mxu1 }
 0x7a9   :  { %v4446_v37 = vpack.c.bf16 %v4385_v26, %v4381_v4  ;;  %v4387_v6 = vpop.f32.mrb[163].mxu1  ;;  %v12882_v4 = vld [vmem:[#allocation5 + $0x7c] ss:$12 sps:$4 sm:$0xff]   ;;  %v12880_v26 = vld [vmem:[#allocation5 + $0x78] ss:$12 sps:$4 sm:$0xff]  }
 0x7aa   :  { %v4447_v46 = vpack.c.bf16 %v4387_v6, %v4383_v36  ;;  %v12883_v36 = vld [vmem:[#allocation5 + $0x140] ss:$12 sps:$4 sm:$0xff]  }
 0x7ab   :  { %v12887_v6 = vld [vmem:[#allocation5 + $0x94] ss:$12 sps:$4 sm:$0xff]  }
 0x7ac   :  { %4891 = vmatprep.mubr.bf16.mxu1 %v4447_v46  ;;  %4993 = vmatprep.mubr.bf16.mxu0 %v4447_v46  ;;  %v12885_v46 = vld [vmem:[#allocation5 + $0x90] ss:$12 sps:$4 sm:$0xff]  }
 0x7ad   :  { %4892 = vmatmul.mubr.bf16.vlgmr.msra.gmra.mrb[168].mxu1 %v4446_v37  ;;  %4994 = vmatmul.mubr.bf16.vlgmr.msra.gmra.mrb[88].mxu0 %v4446_v37  ;;  %v12884_v37 = vld [vmem:[#allocation5 + $0x80] ss:$12 sps:$4 sm:$0xff]  }
 0x7ae   :  { %4911 = vmatpush1.bf16.msra.mxu1 %v12839_v21  ;;  %11918 = vmatpush3.bf16.msra.mxu0 %v12842_v58  ;;  %v4391_v5 = vpop.f32.mrb[164].mxu1  ;;  %v12863_v58 = vld [vmem:[#allocation5 + $0xe0] ss:$12 sps:$4 sm:$0xff]   ;;  %v12889_v21 = vld [vmem:[#allocation5 + $0x98] ss:$12 sps:$4 sm:$0xff]  }
 0x7af   :  { %4912 = vmatprep.subr.bf16.mxu1 %v12845_v10  ;;  %11919 = vmatprep.subr.bf16.mxu0 %v12846_v48  ;;  %v4393_v38 = vpop.f32.mrb[165].mxu1  ;;  %v4449_v16 = vpack.c.bf16 %v4391_v5, %v4391_v5  ;;  %v12892_v10 = vld [vmem:[#allocation5 + $0xac] ss:$12 sps:$4 sm:$0xff]   ;;  %v12890_v5 = vld [vmem:[#allocation5 + $0xa8] ss:$12 sps:$4 sm:$0xff]  }
 0x7b0   :  { %v4450_v40 = vpack.c.bf16 %v4393_v38, %v4393_v38  ;;  %v4395_v35 = vpop.f32.mrb[166].mxu1  ;;  %v12897_v38 = vld [vmem:[#allocation5 + $0xc4] ss:$12 sps:$4 sm:$0xff]  }
 0x7b1   :  { %v4396_v11 = vpop.f32.mrb[167].mxu1  ;;  %v14662_v35 = vpack.c.bf16 %v14642_v2, %v14642_v2  ;;  %v12909_v2 = vld [vmem:[#allocation5 + $0x10c] ss:$12 sps:$4 sm:$0xff]  }
 0x7b2   :  { %4913 = vmatpush1.bf16.msra.mxu1 %v12843_v44  ;;  %11920 = vmatpush3.bf16.msra.mxu0 %v12846_v48  ;;  %v12893_v48 = vld [vmem:[#allocation5 + $0x170] ss:$12 sps:$4 sm:$0xff]   ;;  %v12902_v11 = vld [vmem:[#allocation5 + $0x1a0] ss:$12 sps:$4 sm:$0xff]  }
 0x7b3   :  { %4901 = vmatprep.mubr.bf16.mxu1 %v4450_v40  ;;  %4914 = vmatprep.subr.bf16.mxu1 %v12849_v27  ;;  %v12894_v44 = vld [vmem:[#allocation5 + $0xb0] ss:$12 sps:$4 sm:$0xff]   ;;  %v12898_v27 = vld [vmem:[#allocation5 + $0x188] ss:$12 sps:$4 sm:$0xff]  }
 0x7b4   :  { %5001 = vmatprep.mubr.bf16.mxu0 %v4450_v40  ;;  %11921 = vmatprep.subr.bf16.mxu0 %v12850_v45  ;;  %v12895_v40 = vld [vmem:[#allocation5 + $0xc0] ss:$12 sps:$4 sm:$0xff]  }
 0x7b5   :  { %4902 = vmatmul.mubr.bf16.gmra.mrb[172].mxu1 %v4449_v16  ;;  %5002 = vmatmul.mubr.bf16.gmra.mrb[92].mxu0 %v4449_v16  ;;  %v12905_v16 = vld [vmem:[#allocation5 + $0xf4] ss:$12 sps:$4 sm:$0xff]  }
 0x7b6   :  { %4915 = vmatpush1.bf16.msra.mxu1 %v12847_v47  ;;  %11922 = vmatpush3.bf16.msra.mxu0 %v12850_v45  ;;  %v12901_v45 = vld [vmem:[#allocation5 + $0xdc] ss:$12 sps:$4 sm:$0xff]   ;;  %v12899_v47 = vld [vmem:[#allocation5 + $0xd8] ss:$12 sps:$4 sm:$0xff]  }
 0x7b7   :  { %4916 = vmatprep.subr.bf16.mxu1 %v12853_v18  ;;  %11923 = vmatprep.subr.bf16.mxu0 %v12854_v39  ;;  %v12906_v18 = vld [vmem:[#allocation5 + $0x1b8] ss:$12 sps:$4 sm:$0xff]  }
 0x7b8   :  { %4942 = vmatprep.mubr.bf16.mxu1 %v13465_v0  ;;  %11925 = vmatprep.mubr.msk.bf16.mxu0 %vm2407_vm3, %v14638_v53 }
 0x7ba   :  { %4917 = vmatpush1.bf16.msra.mxu1 %v12851_v15  ;;  %11924 = vmatpush3.bf16.msra.mxu0 %v12854_v39  ;;  %v12903_v39 = vld [vmem:[#allocation5 + $0xf0] ss:$12 sps:$4 sm:$0xff]   ;;  %v14668_v15 = vpack.c.bf16 %v14640_v30, %v14640_v30 }
 0x7bb   :  { %5383 = vmatprep.subr.bf16.mxu1 %v12857_v59  ;;  %11368 = vmatprep.subr.bf16.mxu0 %v12858_v7  ;;  %v12910_v59 = vld [vmem:[#allocation5 + $0x1d0] ss:$12 sps:$4 sm:$0xff]   ;;  %v12907_v7 = vld [vmem:[#allocation5 + $0x108] ss:$12 sps:$4 sm:$0xff]  }
 0x7bc   :  { %v12916_v30 = vld [vmem:[#allocation5 + $0x13c] ss:$12 sps:$4 sm:$0xff]  }
 0x7bd   :  { %10530 = vmatmul.mubr.msk.bf16.vlgmr.msra.gmra.mrb[168].mxu1 %vm2407_vm3, %v14638_v53  ;;  %11926 = vmatmul.mubr.msk.bf16.vlgmr.msra.gmra.mrb[96].mxu0 %vm2407_vm3, %v4451_v14  ;;  %v12870_v53 = vld [vmem:[#allocation5 + $0x48] ss:$12 sps:$4 sm:$0xff]  }
 0x7be   :  { %5384 = vmatpush1.bf16.msra.mxu1 %v12855_v17  ;;  %11369 = vmatpush3.bf16.msra.mxu0 %v12859_v28  ;;  %v12913_v17 = vld [vmem:[#allocation5 + $0x124] ss:$12 sps:$4 sm:$0xff]   ;;  %v12911_v28 = vld [vmem:[#allocation5 + $0x120] ss:$12 sps:$4 sm:$0xff]  }
 0x7bf   :  { %5517 = vmatprep.mubr.bf16.mxu0 %v14636_v57  ;;  %5385 = vmatprep.subr.bf16.mxu1 %v12862_v33  ;;  %v12914_v33 = vld [vmem:[#allocation5 + $0x138] ss:$12 sps:$4 sm:$0xff]  }
 0x7c0   :  { %11370 = vmatprep.subr.bf16.mxu0 %v12863_v58  ;;  %4952 = vmatprep.mubr.bf16.mxu1 %v13465_v0  ;;  %v12919_v58 = vld [vmem:[#allocation5 + $0x154] ss:$12 sps:$4 sm:$0xff]  }
 0x7c2   :  { %5386 = vmatpush1.bf16.msra.mxu1 %v12860_v41  ;;  %11371 = vmatpush3.bf16.msra.mxu0 %v12864_v42  ;;  %v12917_v41 = vld [vmem:[#allocation5 + $0x150] ss:$12 sps:$4 sm:$0xff]   ;;  %v12930_v42 = vld [vmem:[%s15306_s8 + $0x20] ss:$0 sps:$4 sm:$0x33]  }
 0x7c3   :  { %5387 = vmatprep.subr.bf16.mxu1 %v12867_v43  ;;  %11372 = vmatprep.subr.bf16.mxu0 %v12868_v49  ;;  %v12931_v43 = vld [vmem:[#allocation5 + $0x1b0] ss:$12 sps:$4 sm:$0xff]   ;;  %v12934_v49 = vld [vmem:[#allocation5 + $0x1c8] ss:$12 sps:$4 sm:$0xff]  }
 0x7c5   :  { %10531 = vmatmul.mubr.msk.bf16.gmra.mrb[172].mxu1 %vm2407_vm3, %v4451_v14  ;;  %v14675_v14 = vpack.c.bf16 %v14644_v3, %v14644_v3  ;;  %v12922_v3 = vld [vmem:[#allocation5 + $0x16c] ss:$12 sps:$4 sm:$0xff]  }
 0x7c6   :  { %5388 = vmatpush1.bf16.msra.mxu1 %v12865_v13  ;;  %11373 = vmatpush3.bf16.msra.mxu0 %v12869_v55  ;;  %v12942_v13 = vld [vmem:[#allocation5 + $0x3dc] ss:$12 sps:$4 sm:$0xff]   ;;  %v12945_v55 = vld [vmem:[#allocation5 + $0x3f4] ss:$12 sps:$4 sm:$0xff]  }
 0x7c7   :  { %5415 = vmatprep.mubr.bf16.mxu1 %v14636_v57  ;;  %5389 = vmatprep.subr.bf16.mxu1 %v12872_v22  ;;  %v12888_v57 = vld [vmem:[#allocation5 + $0x158] ss:$12 sps:$4 sm:$0xff]   ;;  %v12943_v22 = vld [vmem:[#allocation5 + $0x3f0] ss:$12 sps:$4 sm:$0xff]  }
 0x7c8   :  { %11374 = vmatprep.subr.bf16.mxu0 %v12873_v29  ;;  %v12948_v29 = vld [vmem:[#allocation5 + $0x40c] ss:$12 sps:$4 sm:$0xff]  }
 0x7ca   :  { %5390 = vmatpush1.bf16.msra.mxu1 %v12870_v53  ;;  %11375 = vmatpush3.bf16.msra.mxu0 %v12874_v60  ;;  %v12946_v53 = vld [vmem:[#allocation5 + $0x408] ss:$12 sps:$4 sm:$0xff]   ;;  %v12951_v60 = vld [vmem:[#allocation5 + $0x424] ss:$12 sps:$4 sm:$0xff]  }
 0x7cb   :  { %5391 = vmatprep.subr.bf16.mxu1 %v12877_v23  ;;  %11376 = vmatprep.subr.bf16.mxu0 %v12878_v25  ;;  %v12954_v23 = vld [vmem:[#allocation5 + $0x43c] ss:$12 sps:$4 sm:$0xff]   ;;  %v12952_v25 = vld [vmem:[#allocation5 + $0x438] ss:$12 sps:$4 sm:$0xff]  }
 0x7ce   :  { %5392 = vmatpush1.bf16.msra.mxu1 %v12875_v8  ;;  %11377 = vmatpush3.bf16.msra.mxu0 %v12879_v12  ;;  %v12957_v8 = vld [vmem:[#allocation5 + $0x454] ss:$12 sps:$4 sm:$0xff]   ;;  %v12955_v12 = vld [vmem:[#allocation5 + $0x450] ss:$12 sps:$4 sm:$0xff]  }
 0x7cf   :  { %5393 = vmatprep.subr.bf16.mxu1 %v12882_v4  ;;  %11378 = vmatprep.subr.bf16.mxu0 %v12883_v36  ;;  %v12960_v4 = vld [vmem:[#allocation5 + $0x46c] ss:$12 sps:$4 sm:$0xff]   ;;  %v12958_v36 = vld [vmem:[#allocation5 + $0x468] ss:$12 sps:$4 sm:$0xff]  }
 0x7d2   :  { %5394 = vmatpush1.bf16.msra.mxu1 %v12880_v26  ;;  %11379 = vmatpush3.bf16.msra.mxu0 %v12884_v37  ;;  %v12963_v26 = vld [vmem:[#allocation5 + $0x484] ss:$12 sps:$4 sm:$0xff]   ;;  %v12964_v37 = vld [vmem:[#allocation5 + $0x488] ss:$12 sps:$4 sm:$0xff]  }
 0x7d3   :  { %5395 = vmatprep.subr.bf16.mxu1 %v12887_v6  ;;  %11380 = vmatprep.subr.bf16.mxu0 %v12888_v57  ;;  %v12961_v6 = vld [vmem:[#allocation5 + $0x480] ss:$12 sps:$4 sm:$0xff]   ;;  %v12965_v57 = vld [vmem:[#allocation5 + $0x3c8] ss:$12 sps:$4 sm:$0xff]  }
 0x7d6   :  { %5396 = vmatpush1.bf16.msra.mxu1 %v12885_v46  ;;  %11381 = vmatpush3.bf16.msra.mxu0 %v12889_v21  ;;  %v12966_v46 = vld [vmem:[#allocation5 + $0x498] ss:$12 sps:$4 sm:$0xff]   ;;  %v12968_v21 = vld [vmem:[#allocation5 + $0x49c] ss:$12 sps:$4 sm:$0xff]  }
 0x7d7   :  { %5397 = vmatprep.subr.bf16.mxu1 %v12892_v10  ;;  %11382 = vmatprep.subr.bf16.mxu0 %v12893_v48  ;;  %v12969_v10 = vld [vmem:[#allocation5 + $0x4a0] ss:$12 sps:$4 sm:$0xff]  }
 0x7d8   :  { %v12970_v48 = vld [vmem:[#allocation5 + $0x3e0] ss:$12 sps:$4 sm:$0xff]  }
 0x7da   :  { %5398 = vmatpush1.bf16.msra.mxu1 %v12890_v5  ;;  %11383 = vmatpush3.bf16.msra.mxu0 %v12894_v44  ;;  %v12973_v5 = vld [vmem:[#allocation5 + $0x4b4] ss:$12 sps:$4 sm:$0xff]   ;;  %v12974_v44 = vld [vmem:[#allocation5 + $0x4b8] ss:$12 sps:$4 sm:$0xff]  }
 0x7db   :  { %5399 = vmatprep.subr.bf16.mxu1 %v12897_v38  ;;  %11929 = vmatprep.subr.bf16.mxu0 %v12898_v27  ;;  %v12971_v38 = vld [vmem:[#allocation5 + $0x4b0] ss:$12 sps:$4 sm:$0xff]  }
 0x7dd   :  { %5518 = vmatmul.mubr.bf16.vlgmr.msra.gmra.mrb[100].mxu0 %v14634_v61 }
 0x7de   :  { %5400 = vmatpush1.bf16.msra.mxu1 %v12895_v40  ;;  %5525 = vmatprep.mubr.bf16.mxu0 %v14662_v35  ;;  %v12978_v40 = vld [vmem:[#allocation5 + $0x4cc] ss:$12 sps:$4 sm:$0xff]  }
 0x7df   :  { %11930 = vmatpush3.bf16.msra.mxu0 %v12898_v27  ;;  %5401 = vmatprep.subr.bf16.mxu1 %v12901_v45  ;;  %v12975_v27 = vld [vmem:[#allocation5 + $0x3f8] ss:$12 sps:$4 sm:$0xff]   ;;  %v12979_v45 = vld [vmem:[#allocation5 + $0x4d0] ss:$12 sps:$4 sm:$0xff]  }
 0x7e0   :  { %11931 = vmatprep.subr.bf16.mxu0 %v12902_v11 }
 0x7e2   :  { %5402 = vmatpush1.bf16.msra.mxu1 %v12899_v47  ;;  %v12983_v47 = vld [vmem:[#allocation5 + $0x4e4] ss:$12 sps:$4 sm:$0xff]  }
 0x7e3   :  { %11932 = vmatpush3.bf16.msra.mxu0 %v12902_v11  ;;  %5403 = vmatprep.subr.bf16.mxu1 %v12905_v16  ;;  %v12980_v11 = vld [vmem:[#allocation5 + $0x410] ss:$12 sps:$4 sm:$0xff]   ;;  %v12984_v16 = vld [vmem:[#allocation5 + $0x4e8] ss:$12 sps:$4 sm:$0xff]  }
 0x7e4   :  { %11933 = vmatprep.subr.bf16.mxu0 %v12906_v18 }
 0x7e5   :  { %5526 = vmatmul.mubr.bf16.gmra.mrb[104].mxu0 %v14668_v15 }
 0x7e6   :  { %5404 = vmatpush1.bf16.msra.mxu1 %v12903_v39  ;;  %11937 = vmatprep.mubr.msk.bf16.mxu0 %vm2407_vm3, %v14646_v1  ;;  %v12985_v39 = vld [vmem:[#allocation5 + $0x428] ss:$12 sps:$4 sm:$0xff]  }
 0x7e7   :  { %11934 = vmatpush3.bf16.msra.mxu0 %v12906_v18  ;;  %5405 = vmatprep.subr.bf16.mxu1 %v12909_v2  ;;  %v12981_v18 = vld [vmem:[#allocation5 + $0x4e0] ss:$12 sps:$4 sm:$0xff]  }
 0x7e8   :  { %11935 = vmatprep.subr.bf16.mxu0 %v12910_v59  ;;  %v12989_v2 = vld [vmem:[#allocation5 + $0x500] ss:$12 sps:$4 sm:$0xff]  }
 0x7ea   :  { %5406 = vmatpush1.bf16.msra.mxu1 %v12907_v7  ;;  %v12990_v7 = vld [vmem:[#allocation5 + $0x440] ss:$12 sps:$4 sm:$0xff]  }
 0x7eb   :  { %11936 = vmatpush3.bf16.msra.mxu0 %v12910_v59  ;;  %5407 = vmatprep.subr.bf16.mxu1 %v12913_v17  ;;  %v12986_v59 = vld [vmem:[#allocation5 + $0x4f8] ss:$12 sps:$4 sm:$0xff]   ;;  %v12993_v17 = vld [vmem:[#allocation5 + $0x514] ss:$12 sps:$4 sm:$0xff]  }
 0x7ec   :  { %5599 = vmatprep.subr.bf16.mxu0 %v14546_v50  ;;  %v12920_v50 = vld [vmem:[#allocation5 + $0x168] ss:$12 sps:$4 sm:$0xff]  }
 0x7ee   :  { %11938 = vmatmul.mubr.msk.bf16.vlgmr.msra.gmra.mrb[96].mxu0 %vm2407_vm3, %v14675_v14  ;;  %5408 = vmatpush1.bf16.msra.mxu1 %v12911_v28  ;;  %v12994_v28 = vld [vmem:[#allocation5 + $0x518] ss:$12 sps:$4 sm:$0xff]  }
 0x7ef   :  { %5600 = vmatpush1.bf16.msra.mxu0 %v14542_v32  ;;  %5409 = vmatprep.subr.bf16.mxu1 %v12916_v30  ;;  %v12923_v32 = vld [vmem:[%s15306_s8 + $0x18] sm:$0xff]  }
 0x7f0   :  { %5601 = vmatprep.subr.bf16.mxu0 %v14569_v9  ;;  %5631 = vmatprep.mubr.bf16.mxu0 %v13465_v0  ;;  %v12926_v9 = vld [vmem:[#allocation5 + $0x184] ss:$12 sps:$4 sm:$0xff]  }
 0x7f1   :  { %v12991_v30 = vld [vmem:[#allocation5 + $0x510] ss:$12 sps:$4 sm:$0xff]  }
 0x7f2   :  { %5410 = vmatpush1.bf16.msra.mxu1 %v12914_v33  ;;  %v12998_v33 = vld [vmem:[#allocation5 + $0x52c] ss:$12 sps:$4 sm:$0xff]  }
 0x7f3   :  { %5602 = vmatpush1.bf16.msra.mxu0 %v14564_v34  ;;  %5411 = vmatprep.subr.bf16.mxu1 %v12919_v58  ;;  %v12924_v34 = vld [vmem:[#allocation5 + $0x180] ss:$12 sps:$4 sm:$0xff]   ;;  %v12999_v58 = vld [vmem:[#allocation5 + $0x530] ss:$12 sps:$4 sm:$0xff]  }
 0x7f4   :  { %10603 = vmatprep.subr.msk.bf16.mxu0 %vm4134_vm5, %v14581_v63  ;;  %v12929_v63 = vld [vmem:[#allocation5 + $0x19c] ss:$12 sps:$4 sm:$0xff]  }
 0x7f6   :  { %5412 = vmatpush1.bf16.msra.mxu1 %v12917_v41  ;;  %v12996_v41 = vld [vmem:[#allocation5 + $0x528] ss:$12 sps:$4 sm:$0xff]  }
 0x7f7   :  { %5604 = vmatpush1.bf16.msra.mxu0 %v14586_v62  ;;  %5413 = vmatprep.subr.bf16.mxu1 %v12922_v3  ;;  %v12927_v62 = vld [vmem:[#allocation5 + $0x198] ss:$12 sps:$4 sm:$0xff]   ;;  %v13000_v3 = vld [vmem:[#allocation5 + $0x470] ss:$12 sps:$4 sm:$0xff]  }
 0x7f8   :  { %11941 = vmatprep.subr.bf16.mxu0 %v14548_v51 }
 0x7fa   :  { %10604 = vmatmul.mubr.msk.bf16.vlgmr.msra.gmra.mrb[108].mxu0 %vm4127_vm4, %v12923_v32  ;;  %5414 = vmatpush1.bf16.msra.mxu1 %v12920_v50  ;;  %v13003_v50 = vld [vmem:[#allocation5 + $0x544] ss:$12 sps:$4 sm:$0xff]  }
 0x7fb   :  { %11942 = vmatpush3.bf16.msra.mxu0 %v14548_v51  ;;  %5434 = vmatprep.subr.bf16.mxu1 %v12926_v9  ;;  %v12933_v51 = vld [vmem:[#allocation5 + $0x1b4] ss:$12 sps:$4 sm:$0xff]  }
 0x7fc   :  { %11943 = vmatprep.subr.bf16.mxu0 %v14573_v20  ;;  %5641 = vmatprep.mubr.bf16.mxu0 %v13465_v0 }
 0x7fd   :  { %5416 = vmatmul.mubr.bf16.vlgmr.msra.gmra.mrb[168].mxu1 %v14634_v61  ;;  %v12936_v61 = vld [vmem:[#allocation5 + $0x1cc] ss:$12 sps:$4 sm:$0xff]  }
 0x7fe   :  { %5425 = vmatprep.mubr.bf16.mxu1 %v14662_v35  ;;  %5435 = vmatpush1.bf16.msra.mxu1 %v12924_v34  ;;  %v12976_v35 = vld [vmem:[#allocation5 + $0x4c8] ss:$12 sps:$4 sm:$0xff]  }
 0x7ff   :  { %11944 = vmatpush3.bf16.msra.mxu0 %v14573_v20  ;;  %5436 = vmatprep.subr.bf16.mxu1 %v12929_v63  ;;  %v12937_v20 = vld [vmem:[#allocation5 + $0x3c0] ss:$12 sps:$4 sm:$0xff]  }
 0x800   :  { %12406 = vmatprep.subr.msk.bf16.mxu0 %vm4134_vm5, %v14583_v24  ;;  %v12939_v24 = vld [vmem:[#allocation5 + $0x3c4] ss:$12 sps:$4 sm:$0xff]  }
 0x802   :  { %10605 = vmatmul.mubr.msk.bf16.gmra.mrb[112].mxu0 %vm4127_vm4, %v12930_v42  ;;  %5437 = vmatpush1.bf16.msra.mxu1 %v12927_v62 }
 0x803   :  { %11946 = vmatpush3.bf16.msra.mxu0 %v14598_v31  ;;  %5438 = vmatprep.subr.bf16.mxu1 %v12933_v51  ;;  %v12940_v31 = vld [vmem:[#allocation5 + $0x3d8] ss:$12 sps:$4 sm:$0xff]  }
 0x804   :  { %11947 = vmatprep.mubr.msk.bf16.mxu0 %vm4127_vm4, %v12923_v32  ;;  %11407 = vmatprep.subr.bf16.mxu0 %v12964_v37  ;;  %v13004_v32 = vld [vmem:[#allocation5 + $0x548] ss:$12 sps:$4 sm:$0xff]  }
 0x805   :  { %5426 = vmatmul.mubr.bf16.gmra.mrb[172].mxu1 %v14668_v15  ;;  %v12988_v15 = vld [vmem:[#allocation5 + $0x4fc] ss:$12 sps:$4 sm:$0xff]  }
 0x806   :  { %5439 = vmatpush1.bf16.msra.mxu1 %v12931_v43  ;;  %5466 = vmatprep.mubr.bf16.mxu1 %v13465_v0 }
 0x807   :  { %5440 = vmatprep.subr.bf16.mxu1 %v12936_v61 }
 0x80a   :  { %11948 = vmatmul.mubr.msk.bf16.vlgmr.msra.gmra.mrb[116].mxu0 %vm4127_vm4, %v12930_v42  ;;  %5441 = vmatpush1.bf16.msra.mxu1 %v12934_v49 }
 0x80b   :  { %6111 = vmatprep.subr.bf16.mxu1 %v12939_v24  ;;  %11408 = vmatpush3.bf16.msra.mxu0 %v12965_v57 }
 0x80c   :  { %11409 = vmatprep.subr.bf16.mxu0 %v12969_v10  ;;  %v13001_v10 = vld [vmem:[#allocation5 + $0x540] ss:$12 sps:$4 sm:$0xff]  }
 0x80d   :  { %10594 = vmatmul.mubr.msk.bf16.vlgmr.msra.gmra.mrb[168].mxu1 %vm2407_vm3, %v14646_v1  ;;  %v12949_v1 = vld [vmem:[#allocation5 + $0x420] ss:$12 sps:$4 sm:$0xff]  }
 0x80e   :  { %5476 = vmatprep.mubr.bf16.mxu1 %v13465_v0  ;;  %6112 = vmatpush1.bf16.msra.mxu1 %v12937_v20 }
 0x80f   :  { %6113 = vmatprep.subr.bf16.mxu1 %v12942_v13  ;;  %11410 = vmatpush3.bf16.msra.mxu0 %v12970_v48  ;;  %v13007_v48 = vld [vmem:[#allocation5 + $0x55c] ss:$12 sps:$4 sm:$0xff]  }
 0x810   :  { %11411 = vmatprep.subr.bf16.mxu0 %v12974_v44 }
 0x812   :  { %6114 = vmatpush1.bf16.msra.mxu1 %v12940_v31 }
 0x813   :  { %6115 = vmatprep.subr.bf16.mxu1 %v12945_v55  ;;  %11412 = vmatpush3.bf16.msra.mxu0 %v12975_v27 }
 0x814   :  { %11413 = vmatprep.subr.bf16.mxu0 %v12979_v45 }
 0x815   :  { %10595 = vmatmul.mubr.msk.bf16.gmra.mrb[172].mxu1 %vm2407_vm3, %v14675_v14  ;;  %v12995_v14 = vld [vmem:[#allocation5 + $0x458] ss:$12 sps:$4 sm:$0xff]  }
 0x816   :  { %6116 = vmatpush1.bf16.msra.mxu1 %v12943_v22 }
 0x817   :  { %6117 = vmatprep.subr.bf16.mxu1 %v12948_v29  ;;  %11414 = vmatpush3.bf16.msra.mxu0 %v12980_v11  ;;  %v13012_v11 = vld [vmem:[#allocation5 + $0x578] ss:$12 sps:$4 sm:$0xff]  }
 0x818   :  { %11415 = vmatprep.subr.bf16.mxu0 %v12984_v16  ;;  %v13009_v16 = vld [vmem:[#allocation5 + $0x570] ss:$12 sps:$4 sm:$0xff]  }
 0x81a   :  { %6118 = vmatpush1.bf16.msra.mxu1 %v12946_v53 }
 0x81b   :  { %6119 = vmatprep.subr.bf16.mxu1 %v12951_v60  ;;  %11416 = vmatpush3.bf16.msra.mxu0 %v12985_v39  ;;  %v13015_v39 = vld [vmem:[#allocation5 + $0x58c] ss:$12 sps:$4 sm:$0xff]  }
 0x81c   :  { %11417 = vmatprep.subr.bf16.mxu0 %v12989_v2 }
 0x81e   :  { %6120 = vmatpush1.bf16.msra.mxu1 %v12949_v1 }
 0x81f   :  { %6121 = vmatprep.subr.bf16.mxu1 %v12954_v23  ;;  %11418 = vmatpush3.bf16.msra.mxu0 %v12990_v7 }
 0x820   :  { %11419 = vmatprep.subr.bf16.mxu0 %v12994_v28 }
 0x822   :  { %6122 = vmatpush1.bf16.msra.mxu1 %v12952_v25 }
 0x823   :  { %6123 = vmatprep.subr.bf16.mxu1 %v12957_v8  ;;  %11420 = vmatpush3.bf16.msra.mxu0 %v12995_v14 }
 0x824   :  { %11421 = vmatprep.subr.bf16.mxu0 %v12999_v58  ;;  %v13047_v58 = vld [vmem:[#allocation7 + $0x1e8] ss:$12 sps:$4 sm:$0xff]  }
 0x826   :  { %6124 = vmatpush1.bf16.msra.mxu1 %v12955_v12 }
 0x827   :  { %6125 = vmatprep.subr.bf16.mxu1 %v12960_v4  ;;  %11422 = vmatpush3.bf16.msra.mxu0 %v13000_v3  ;;  %v13052_v3 = vld [vmem:[#allocation7 + $0x200] ss:$12 sps:$4 sm:$0xff]  }
 0x828   :  { %11951 = vmatprep.subr.bf16.mxu0 %v13004_v32 }
 0x82a   :  { %6126 = vmatpush1.bf16.msra.mxu1 %v12958_v36 }
 0x82b   :  { %6127 = vmatprep.subr.bf16.mxu1 %v12963_v26 }
 0x82e   :  { %6128 = vmatpush1.bf16.msra.mxu1 %v12961_v6 }
 0x82f   :  { %6129 = vmatprep.subr.bf16.mxu1 %v12968_v21 }
 0x832   :  { %6130 = vmatpush1.bf16.msra.mxu1 %v12966_v46 }
 0x833   :  { %6131 = vmatprep.subr.bf16.mxu1 %v12973_v5  ;;  %v13008_v5 = vld [vmem:[#allocation5 + $0x560] ss:$12 sps:$4 sm:$0xff]  }
 0x836   :  { %6132 = vmatpush1.bf16.msra.mxu1 %v12971_v38  ;;  %v13005_v38 = vld [vmem:[#allocation5 + $0x558] ss:$12 sps:$4 sm:$0xff]  }
 0x837   :  { %6133 = vmatprep.subr.bf16.mxu1 %v12978_v40 }
 0x83a   :  { %6134 = vmatpush1.bf16.msra.mxu1 %v12976_v35  ;;  %v13011_v35 = vld [vmem:[#allocation5 + $0x574] ss:$12 sps:$4 sm:$0xff]  }
 0x83b   :  { %6135 = vmatprep.subr.bf16.mxu1 %v12983_v47 }
 0x83e   :  { %6136 = vmatpush1.bf16.msra.mxu1 %v12981_v18 }
 0x83f   :  { %6137 = vmatprep.subr.bf16.mxu1 %v12988_v15  ;;  %v13016_v15 = vld [vmem:[#allocation5 + $0x590] ss:$12 sps:$4 sm:$0xff]  }
 0x842   :  { %6138 = vmatpush1.bf16.msra.mxu1 %v12986_v59  ;;  %v13013_v59 = vld [vmem:[#allocation5 + $0x588] ss:$12 sps:$4 sm:$0xff]  }
 0x843   :  { %6139 = vmatprep.subr.bf16.mxu1 %v12993_v17 }
 0x846   :  { %6140 = vmatpush1.bf16.msra.mxu1 %v12991_v30 }
 0x847   :  { %6141 = vmatprep.subr.bf16.mxu1 %v12998_v33  ;;  %v13046_v33 = vld [vmem:[#allocation7 + $0x2a8] ss:$12 sps:$4 sm:$0xff]  }
 0x84a   :  { %6142 = vmatpush1.bf16.msra.mxu1 %v12996_v41  ;;  %v13051_v41 = vld [vmem:[#allocation7 + $0x2c0] ss:$12 sps:$4 sm:$0xff]  }
 0x84b   :  { %6162 = vmatprep.subr.bf16.mxu1 %v13003_v50  ;;  %v13056_v50 = vld [vmem:[#allocation7 + $0x2d8] ss:$12 sps:$4 sm:$0xff]  }
 0x880   :  { %v11350_v9 = vpop.f32.mrb[88].mxu0 }
 0x881   :  { %v11351_v34 = vpop.f32.mrb[89].mxu0 }
 0x882   :  { %v11352_v63 = vadd.f32 %v11351_v34, %v11350_v9  ;;  %v11353_v62 = vpop.f32.mrb[90].mxu0  ;;  %v13061_v9 = vld [vmem:[#allocation7 + $0x2f0] ss:$12 sps:$4 sm:$0xff]  }
 0x883   :  { %v11354_v42 = vpop.f32.mrb[91].mxu0 }
 0x884   :  { %v11355_v51 = vadd.f32 %v11354_v42, %v11353_v62 }
 0x888   :  { %v11356_v43 = vpop.f32.mrb[92].mxu0 }
 0x889   :  { %v11357_v61 = vpop.f32.mrb[93].mxu0 }
 0x88a   :  { %v11358_v49 = vadd.f32 %v11357_v61, %v11356_v43  ;;  %v11359_v20 = vpop.f32.mrb[94].mxu0 }
 0x88b   :  { %v11360_v24 = vpop.f32.mrb[95].mxu0 }
 0x8b0   :  { %v11384_v13 = vpop.f32.mrb[100].mxu0 }
 0x8b1   :  { %v11385_v31 = vpop.f32.mrb[101].mxu0 }
 0x8b2   :  { %v11386_v55 = vadd.f32 %v11385_v31, %v11384_v13  ;;  %v11387_v22 = vpop.f32.mrb[102].mxu0 }
 0x8b3   :  { %v11388_v29 = vpop.f32.mrb[103].mxu0 }
 0x8b4   :  { %v14714_v53 = vadd.f32 %v11386_v55, %v11352_v63  ;;  %v11389_v60 = vadd.f32 %v11388_v29, %v11387_v22  ;;  %v6318_v55 = vld [vmem:[%s15308_s10] ss:$2 sm:$0x7]  ;;  %v10672_v29 = vld [vmem:[%s15308_s10 + $0x1] ss:$2 sm:$0x7] }
 0x8b6   :  { %v14716_v1 = vadd.f32 %v11389_v60, %v11355_v51 }
 0x8b8   :  { %v11390_v23 = vpop.f32.mrb[104].mxu0 }
 0x8b9   :  { %v11391_v25 = vpop.f32.mrb[105].mxu0 }
 0x8ba   :  { %v11392_v8 = vadd.f32 %v11391_v25, %v11390_v23  ;;  %v11393_v12 = vpop.f32.mrb[106].mxu0  ;;  %v6323_v23 = vrot.slane %v6318_v55, %v14126_v52 }
 0x8bb   :  { %v11394_v4 = vpop.f32.mrb[107].mxu0  ;;  %v6331_v12 = vrot.slane %v6318_v55, %v14128_v54 }
 0x8bc   :  { %v14718_v36 = vadd.f32 %v11392_v8, %v11358_v49  ;;  %v6354_v4 = vrot.slane %v10672_v29, %v14133_v56 }
 0x8cd   :  { %v5633_v26 = vpop.f32.mrb[108].mxu0 }
 0x8ce   :  { %v5635_v37 = vpop.f32.mrb[109].mxu0 }
 0x8cf   :  { %v5637_v6 = vpop.f32.mrb[110].mxu0 }
 0x8d0   :  { %v5698_v57 = vpack.c.bf16 %v5637_v6, %v5633_v26  ;;  %v5639_v46 = vpop.f32.mrb[111].mxu0 }
 0x8d1   :  { %v5699_v21 = vpack.c.bf16 %v5639_v46, %v5635_v37  ;;  %v6358_v46 = vrot.slane %v10672_v29, %v14128_v54 }
 0x8d3   :  { %6143 = vmatprep.mubr.bf16.mxu1 %v5699_v21  ;;  %6245 = vmatprep.mubr.bf16.mxu0 %v5699_v21 }
 0x8d4   :  { %6144 = vmatmul.mubr.bf16.vlgmr.msra.gmra.mrb[168].mxu1 %v5698_v57  ;;  %6246 = vmatmul.mubr.bf16.vlgmr.msra.gmra.mrb[120].mxu0 %v5698_v57 }
 0x8d5   :  { %6163 = vmatpush1.bf16.msra.mxu1 %v13001_v10  ;;  %11952 = vmatpush3.bf16.msra.mxu0 %v13004_v32  ;;  %v5643_v44 = vpop.f32.mrb[112].mxu0  ;;  %v13057_v32 = vld [vmem:[#allocation7 + $0x218] ss:$12 sps:$4 sm:$0xff]  }
 0x8d6   :  { %v5645_v27 = vpop.f32.mrb[113].mxu0  ;;  %6164 = vmatprep.subr.bf16.mxu1 %v13007_v48  ;;  %11953 = vmatprep.subr.bf16.mxu0 %v13008_v5  ;;  %v5701_v18 = vpack.c.bf16 %v5643_v44, %v5643_v44 }
 0x8d7   :  { %v5702_v40 = vpack.c.bf16 %v5645_v27, %v5645_v27  ;;  %v5647_v45 = vpop.f32.mrb[114].mxu0 }
 0x8d8   :  { %v5648_v47 = vpop.f32.mrb[115].mxu0 }
 0x8d9   :  { %6165 = vmatpush1.bf16.msra.mxu1 %v13005_v38  ;;  %11954 = vmatpush3.bf16.msra.mxu0 %v13008_v5 }
 0x8da   :  { %6153 = vmatprep.mubr.bf16.mxu1 %v5702_v40  ;;  %6253 = vmatprep.mubr.bf16.mxu0 %v5702_v40 }
 0x8db   :  { %6166 = vmatprep.subr.bf16.mxu1 %v13011_v35  ;;  %11955 = vmatprep.subr.bf16.mxu0 %v13012_v11 }
 0x8dc   :  { %6154 = vmatmul.mubr.bf16.gmra.mrb[172].mxu1 %v5701_v18  ;;  %6254 = vmatmul.mubr.bf16.gmra.mrb[124].mxu0 %v5701_v18 }
 0x8dd   :  { %v11949_v2 = vpop.f32.mrb[116].mxu0  ;;  %6167 = vmatpush1.bf16.msra.mxu1 %v13009_v16  ;;  %11956 = vmatpush3.bf16.msra.mxu0 %v13012_v11 }
 0x8de   :  { %v5684_v7 = vpop.f32.mrb[117].mxu0  ;;  %6168 = vmatprep.subr.bf16.mxu1 %v13015_v39  ;;  %11957 = vmatprep.subr.bf16.mxu0 %v13016_v15  ;;  %v5703_v14 = vpack.c.bf16 %v11949_v2, %v11949_v2 }
 0x8df   :  { %v11950_v17 = vpop.f32.mrb[118].mxu0  ;;  %6194 = vmatprep.mubr.bf16.mxu1 %v13465_v0 }
 0x8e0   :  { %v5687_v28 = vpop.f32.mrb[119].mxu0 }
 0x8e1   :  { %v5700_v30 = vpack.c.bf16 %v5687_v28, %v5684_v7  ;;  %6169 = vmatpush1.bf16.msra.mxu1 %v13013_v59  ;;  %11958 = vmatpush3.bf16.msra.mxu0 %v13016_v15 }
 0x8e2   :  { %11447 = vmatprep.subr.bf16.mxu1 %v13046_v33 }
 0x8e3   :  { %11959 = vmatprep.mubr.msk.bf16.mxu0 %vm2407_vm3, %v5700_v30 }
 0x8e4   :  { %10668 = vmatmul.mubr.msk.bf16.vlgmr.msra.gmra.mrb[168].mxu1 %vm2407_vm3, %v5700_v30  ;;  %11960 = vmatmul.mubr.msk.bf16.vlgmr.msra.gmra.mrb[96].mxu0 %vm2407_vm3, %v5703_v14 }
 0x8e5   :  { %6204 = vmatprep.mubr.bf16.mxu1 %v13465_v0  ;;  %6439 = vmatprep.mubr.bf16.mxu0 %v13465_v0 }
 0x8e6   :  { %11448 = vmatpush3.bf16.msra.mxu1 %v13047_v58 }
 0x8e7   :  { %11449 = vmatprep.subr.bf16.mxu1 %v13051_v41 }
 0x8ea   :  { %11450 = vmatpush3.bf16.msra.mxu1 %v13052_v3 }
 0x8eb   :  { %11451 = vmatprep.subr.bf16.mxu1 %v13056_v50 }
 0x8ec   :  { %10669 = vmatmul.mubr.msk.bf16.gmra.mrb[172].mxu1 %vm2407_vm3, %v5703_v14 }
 0x8ee   :  { %11452 = vmatpush3.bf16.msra.mxu1 %v13057_v32 }
 0x8ef   :  { %11453 = vmatprep.subr.bf16.mxu1 %v13061_v9 }
 0x9a7   :  { %v11423_v34 = vpop.f32.mrb[120].mxu0 }
 0x9a8   :  { %v11424_v63 = vpop.f32.mrb[121].mxu0 }
 0x9a9   :  { %v11425_v62 = vadd.f32 %v11424_v63, %v11423_v34  ;;  %v11426_v42 = vpop.f32.mrb[122].mxu0 }
 0x9aa   :  { %v11427_v51 = vpop.f32.mrb[123].mxu0 }
 0x9ab   :  { %v11428_v43 = vadd.f32 %v11427_v51, %v11426_v42  ;;  %v12153_v61 = vadd.f32 %v14714_v53, %v11425_v62  ;;  %v6327_v53 = vrot.slane %v6318_v55, %v14133_v56 }
 0x9ad   :  { %v12156_v49 = vadd.f32 %v14716_v1, %v11428_v43  ;;  %v6350_v1 = vrot.slane %v10672_v29, %v14126_v52  ;;  %v13018_v29 = vld [vmem:[%s15309_s11 + $0x8] sm:$0x1f]  }
 0x9af   :  { %v11429_v20 = vpop.f32.mrb[124].mxu0 }
 0x9b0   :  { %v11430_v24 = vpop.f32.mrb[125].mxu0 }
 0x9b1   :  { %v11431_v13 = vadd.f32 %v11430_v24, %v11429_v20  ;;  %v11432_v31 = vpop.f32.mrb[126].mxu0 }
 0x9b2   :  { %v11433_v22 = vpop.f32.mrb[127].mxu0  ;;  %v13017_v31 = vld [vmem:[%s15309_s11] sm:$0x1f]  }
 0x9b3   :  { %v12150_v60 = vadd.f32 %v14718_v36, %v11431_v13 }
 0x9b7   :  { %v6196_v25 = vpop.f32.mrb[168].mxu1  ;;  %v11961_v8 = vpop.f32.mrb[96].mxu0 }
 0x9b8   :  { %v6335_v26 = vmul.f32 %v6323_v23, %v6196_v25  ;;  %v12151_v37 = vadd.f32 %v12150_v60, %v11961_v8  ;;  %v6198_v6 = vpop.f32.mrb[169].mxu1  ;;  %v6295_v57 = vpop.f32.mrb[97].mxu0  ;;  %v13021_v60 = vld [vmem:[#allocation7 + $0x1e4] ss:$12 sps:$4 sm:$0xff]   ;;  %v13027_v25 = vld [vmem:[#allocation7 + $0x214] ss:$12 sps:$4 sm:$0xff]  }
 0x9b9   :  { %v6336_v21 = vmul.f32 %v6327_v53, %v6198_v6  ;;  %v12154_v36 = vadd.f32 %v12153_v61, %v6295_v57  ;;  %v6200_v10 = vpop.f32.mrb[170].mxu1  ;;  %v11962_v48 = vpop.f32.mrb[98].mxu0  ;;  %v13025_v8 = vld [vmem:[#allocation7 + $0x210] ss:$12 sps:$4 sm:$0xff]   ;;  %v13034_v57 = vld [vmem:[#allocation7 + $0x258] ss:$12 sps:$4 sm:$0xff]  }
 0x9ba   :  { %v6362_v5 = vadd.f32 %v6350_v1, %v6335_v26  ;;  %v6338_v44 = vmul.f32 %v6323_v23, %v6200_v10  ;;  %v6202_v38 = vpop.f32.mrb[171].mxu1  ;;  %v6298_v27 = vpop.f32.mrb[99].mxu0  ;;  %v6343_v30 = vmul.f32 %v12151_v37, %v6331_v12  ;;  %v13033_v26 = vld [vmem:[#allocation7 + $0x244] ss:$12 sps:$4 sm:$0xff]   ;;  %v13031_v37 = vld [vmem:[#allocation7 + $0x240] ss:$12 sps:$4 sm:$0xff]  }
 0x9bb   :  { %v6363_v40 = vadd.f32 %v6354_v4, %v6336_v21  ;;  %v6337_v45 = vmul.f32 %v12154_v36, %v6331_v12  ;;  %v6339_v35 = vmul.f32 %v6327_v53, %v6202_v38  ;;  %v12157_v11 = vadd.f32 %v12156_v49, %v6298_v27  ;;  %v13036_v6 = vld [vmem:[#allocation7 + $0x25c] ss:$12 sps:$4 sm:$0xff]   ;;  %v13042_v36 = vld [vmem:[#allocation7 + $0x28c] ss:$12 sps:$4 sm:$0xff]   ;;  %v13045_v48 = vld [vmem:[#allocation7 + $0x2a4] ss:$12 sps:$4 sm:$0xff]  }
 0x9bc   :  { %v6365_v47 = vadd.f32 %v6350_v1, %v6338_v44  ;;  %v6371_v15 = vmax.f32 %v6362_v5, 0.0  ;;  %v6370_v43 = vadd.f32 %v6358_v46, %v6343_v30  ;;  %v13037_v21 = vld [vmem:[#allocation7 + $0x270] ss:$12 sps:$4 sm:$0xff]   ;;  %v13040_v10 = vld [vmem:[#allocation7 + $0x288] ss:$12 sps:$4 sm:$0xff]  }
 0x9bd   :  { %v6364_v16 = vadd.f32 %v6358_v46, %v6337_v45  ;;  %v6366_v18 = vadd.f32 %v6354_v4, %v6339_v35  ;;  %v6340_v39 = vmul.f32 %v12157_v11, %v6331_v12  ;;  %v6372_v59 = vmax.f32 %v6363_v40, 0.0  ;;  %v13030_v12 = vld [vmem:[#allocation7 + $0x22c] ss:$12 sps:$4 sm:$0xff]   ;;  %v13050_v44 = vld [vmem:[#allocation7 + $0x2bc] ss:$12 sps:$4 sm:$0xff]  }
 0x9be   :  { %v6374_v2 = vmax.f32 %v6365_v47, 0.0  ;;  %v6379_v13 = vmax.f32 %v6370_v43, 0.0  ;;  %v13043_v5 = vld [vmem:[#allocation7 + $0x2a0] ss:$12 sps:$4 sm:$0xff]   ;;  %v13048_v38 = vld [vmem:[#allocation7 + $0x2b8] ss:$12 sps:$4 sm:$0xff]  }
 0x9bf   :  { %v6375_v7 = vmax.f32 %v6366_v18, 0.0  ;;  %v6367_v17 = vadd.f32 %v6358_v46, %v6340_v39  ;;  %v6206_v28 = vpop.f32.mrb[172].mxu1  ;;  %v6373_v41 = vmax.f32 %v6364_v16, 0.0  ;;  %v13039_v46 = vld [vmem:[#allocation7 + $0x274] ss:$12 sps:$4 sm:$0xff]  }
 0x9c0   :  { %v14742_v14 = vpack.c.bf16 %v6374_v2, %v6371_v15  ;;  %v6341_v33 = vmul.f32 %v6323_v23, %v6206_v28  ;;  %v6208_v58 = vpop.f32.mrb[173].mxu1  ;;  %v6385_v55 = vpack.c.bf16 %v6379_v13, %v6379_v13  ;;  %v13019_v23 = vld [vmem:[#allocation7 + $0x1e0] ss:$12 sps:$4 sm:$0xff]   ;;  %v13053_v40 = vld [vmem:[#allocation7 + $0x2d0] ss:$12 sps:$4 sm:$0xff]  }
 0x9c1   :  { %v6376_v3 = vmax.f32 %v6367_v17, 0.0  ;;  %v6342_v50 = vmul.f32 %v6327_v53, %v6208_v58  ;;  %v6210_v32 = vpop.f32.mrb[174].mxu1  ;;  %v14744_v9 = vpack.c.bf16 %v6375_v7, %v6372_v59  ;;  %v13024_v53 = vld [vmem:[#allocation7 + $0x1fc] ss:$12 sps:$4 sm:$0xff]   ;;  %v13055_v27 = vld [vmem:[#allocation7 + $0x2d4] ss:$12 sps:$4 sm:$0xff]  }
 0x9c2   :  { %v6368_v34 = vadd.f32 %v6350_v1, %v6341_v33  ;;  %v6211_v63 = vpop.f32.mrb[175].mxu1  ;;  %v14768_v22 = vsel %vm6397_vm6, %v6385_v55, 0  ;;  %v13022_v1 = vld [vmem:[#allocation7 + $0x1f8] ss:$12 sps:$4 sm:$0xff]   ;;  %v13058_v35 = vld [vmem:[#allocation7 + $0x2e8] ss:$12 sps:$4 sm:$0xff]  }
 0x9c3   :  { %v14746_v62 = vpack.c.bf16 %v6376_v3, %v6373_v41  ;;  %v6369_v42 = vadd.f32 %v6354_v4, %v6342_v50  ;;  %6407 = vmatprep.subr.bf16.mxu0 %v14744_v9  ;;  %v13028_v4 = vld [vmem:[#allocation7 + $0x228] ss:$12 sps:$4 sm:$0xff]   ;;  %v13060_v45 = vld [vmem:[#allocation7 + $0x2ec] ss:$12 sps:$4 sm:$0xff]   ;;  %v13062_v11 = vld [vmem:[#allocation7 + $0x230] ss:$12 sps:$4 sm:$0xff]  }
 0x9c4   :  { %v6377_v51 = vmax.f32 %v6368_v34, 0.0  ;;  %6408 = vmatpush1.bf16.msra.mxu0 %v14742_v14  ;;  %11454 = vmatpush3.bf16.msra.mxu1 %v13062_v11  ;;  %v13063_v47 = vld [vmem:[#allocation7 + $0x300] ss:$12 sps:$4 sm:$0xff]   ;;  %v13065_v16 = vld [vmem:[#allocation7 + $0x304] ss:$12 sps:$4 sm:$0xff]  }
 0x9c5   :  { %v6378_v61 = vmax.f32 %v6369_v42, 0.0  ;;  %v13066_v18 = vld [vmem:[#allocation7 + $0x308] ss:$12 sps:$4 sm:$0xff]   ;;  %v13071_v2 = vld [vmem:[#allocation7 + $0x320] ss:$12 sps:$4 sm:$0xff]  }
 0x9c6   :  { %v6383_v49 = vpack.c.bf16 %v6377_v51, %v6377_v51  ;;  %v13067_v39 = vld [vmem:[#allocation7 + $0x248] ss:$12 sps:$4 sm:$0xff]   ;;  %11455 = vmatprep.subr.bf16.mxu1 %v13066_v18  ;;  %v13068_v59 = vld [vmem:[#allocation7 + $0x318] ss:$12 sps:$4 sm:$0xff]   ;;  %v13072_v7 = vld [vmem:[#allocation7 + $0x260] ss:$12 sps:$4 sm:$0xff]  }
 0x9c7   :  { %v14750_v20 = vpack.c.bf16 %v6378_v61, %v6378_v61  ;;  %v13070_v15 = vld [vmem:[#allocation7 + $0x31c] ss:$12 sps:$4 sm:$0xff]   ;;  %v13075_v28 = vld [vmem:[#allocation7 + $0x334] ss:$12 sps:$4 sm:$0xff]   ;;  %v13076_v30 = vld [vmem:[#allocation7 + $0x338] ss:$12 sps:$4 sm:$0xff]  }
 0x9c8   :  { %v14753_v24 = vsel %vm6397_vm6, %v6383_v49, 0  ;;  %11456 = vmatpush3.bf16.msra.mxu1 %v13067_v39  ;;  %v13073_v17 = vld [vmem:[#allocation7 + $0x330] ss:$12 sps:$4 sm:$0xff]   ;;  %v13077_v33 = vld [vmem:[#allocation7 + $0x278] ss:$12 sps:$4 sm:$0xff]  }
 0x9c9   :  { %10674 = vmatprep.subr.msk.bf16.mxu0 %vm6397_vm6, %v14750_v20  ;;  %11457 = vmatprep.subr.bf16.mxu1 %v13071_v2  ;;  %v13080_v58 = vld [vmem:[#allocation7 + $0x34c] ss:$12 sps:$4 sm:$0xff]   ;;  %v13081_v41 = vld [vmem:[#allocation7 + $0x350] ss:$12 sps:$4 sm:$0xff]   ;;  %v13078_v3 = vld [vmem:[#allocation7 + $0x348] ss:$12 sps:$4 sm:$0xff]  }
 0x9ca   :  { %6410 = vmatpush1.bf16.msra.mxu0 %v14753_v24  ;;  %v13082_v50 = vld [vmem:[#allocation7 + $0x290] ss:$12 sps:$4 sm:$0xff]   ;;  %v13099_v11 = vld [vmem:[#allocation7] ss:$12 sps:$4 sm:$0xff]   ;;  %v13104_v39 = vld [vmem:[#allocation7 + $0x18] ss:$12 sps:$4 sm:$0xff]  }
 0x9cb   :  { %11963 = vmatprep.subr.bf16.mxu0 %v13466_v19  ;;  %v13085_v32 = vld [vmem:[#allocation7 + $0x364] ss:$12 sps:$4 sm:$0xff]   ;;  %v13107_v18 = vld [vmem:[#allocation7 + $0xe0] ss:$12 sps:$4 sm:$0xff]  }
 0x9cc   :  { %11458 = vmatpush3.bf16.msra.mxu1 %v13072_v7  ;;  %v13111_v2 = vld [vmem:[#allocation7 + $0x34] ss:$12 sps:$4 sm:$0xff]   ;;  %v13109_v7 = vld [vmem:[#allocation7 + $0x30] ss:$12 sps:$4 sm:$0xff]  }
 0x9cd   :  { %10675 = vmatmul.mubr.msk.bf16.vlgmr.msra.gmra.mrb[128].mxu0 %vm6393_vm7, %v13017_v31  ;;  %11459 = vmatprep.subr.bf16.mxu1 %v13076_v30  ;;  %v13117_v30 = vld [vmem:[#allocation7 + $0x110] ss:$12 sps:$4 sm:$0xff]  }
 0x9ce   :  { %11964 = vmatpush3.bf16.msra.mxu0 %v14746_v62  ;;  %11967 = vmatprep.mubr.msk.bf16.mxu0 %vm13467_vm1, %v13466_v19 }
 0x9cf   :  { %11965 = vmatprep.subr.bf16.mxu0 %v13466_v19 }
 0x9d0   :  { %11460 = vmatpush3.bf16.msra.mxu1 %v13077_v33  ;;  %v13114_v33 = vld [vmem:[#allocation7 + $0x48] ss:$12 sps:$4 sm:$0xff]  }
 0x9d1   :  { %11461 = vmatprep.subr.bf16.mxu1 %v13081_v41  ;;  %v13121_v41 = vld [vmem:[#allocation7 + $0x64] ss:$12 sps:$4 sm:$0xff]  }
 0x9d2   :  { %11966 = vmatpush3.bf16.msra.mxu0 %v14768_v22 }
 0x9d3   :  { %6585 = vmatprep.subr.bf16.mxu0 %v14744_v9 }
 0x9d4   :  { %11462 = vmatpush3.bf16.msra.mxu1 %v13082_v50  ;;  %v13119_v50 = vld [vmem:[#allocation7 + $0x60] ss:$12 sps:$4 sm:$0xff]  }
 0x9d5   :  { %11968 = vmatmul.mubr.msk.bf16.vlgmr.msra.gmra.mrb[132].mxu0 %vm6393_vm7, %v13017_v31  ;;  %11979 = vmatprep.subr.bf16.mxu1 %v13466_v19 }
 0x9d6   :  { %6586 = vmatpush1.bf16.msra.mxu0 %v14742_v14  ;;  %6617 = vmatprep.mubr.bf16.mxu0 %v13465_v0 }
 0x9d7   :  { %10680 = vmatprep.subr.msk.bf16.mxu0 %vm6397_vm6, %v14750_v20 }
 0x9da   :  { %6588 = vmatpush1.bf16.msra.mxu0 %v14753_v24 }
 0x9db   :  { %11971 = vmatprep.subr.bf16.mxu0 %v13466_v19 }
 0x9dd   :  { %10681 = vmatmul.mubr.msk.bf16.vlgmr.msra.gmra.mrb[136].mxu0 %vm6393_vm7, %v13018_v29 }
 0x9de   :  { %11972 = vmatpush3.bf16.msra.mxu0 %v14746_v62  ;;  %11975 = vmatprep.mubr.msk.bf16.mxu0 %vm13467_vm1, %v13466_v19 }
 0x9df   :  { %11973 = vmatprep.subr.bf16.mxu0 %v13466_v19 }
 0x9e2   :  { %11974 = vmatpush3.bf16.msra.mxu0 %v14768_v22 }
 0x9e3   :  { %7076 = vmatprep.subr.bf16.mxu0 %v13021_v60 }
 0x9e5   :  { %11976 = vmatmul.mubr.msk.bf16.vlgmr.msra.gmra.mrb[140].mxu0 %vm6393_vm7, %v13018_v29 }
 0x9e6   :  { %7077 = vmatpush1.bf16.msra.mxu0 %v13019_v23 }
 0x9e7   :  { %7078 = vmatprep.subr.bf16.mxu0 %v13024_v53 }
 0x9ea   :  { %7079 = vmatpush1.bf16.msra.mxu0 %v13022_v1 }
 0x9eb   :  { %7080 = vmatprep.subr.bf16.mxu0 %v13027_v25 }
 0x9ee   :  { %7081 = vmatpush1.bf16.msra.mxu0 %v13025_v8 }
 0x9ef   :  { %7082 = vmatprep.subr.bf16.mxu0 %v13030_v12  ;;  %v13083_v12 = vld [vmem:[#allocation7 + $0x360] ss:$12 sps:$4 sm:$0xff]  }
 0x9f2   :  { %7083 = vmatpush1.bf16.msra.mxu0 %v13028_v4  ;;  %v13086_v4 = vld [vmem:[#allocation7 + $0x368] ss:$12 sps:$4 sm:$0xff]  }
 0x9f3   :  { %7084 = vmatprep.subr.bf16.mxu0 %v13033_v26  ;;  %v13089_v26 = vld [vmem:[#allocation7 + $0x37c] ss:$12 sps:$4 sm:$0xff]  }
 0x9f6   :  { %7085 = vmatpush1.bf16.msra.mxu0 %v13031_v37  ;;  %v13087_v37 = vld [vmem:[#allocation7 + $0x378] ss:$12 sps:$4 sm:$0xff]  }
 0x9f7   :  { %7086 = vmatprep.subr.bf16.mxu0 %v13036_v6  ;;  %v13090_v6 = vld [vmem:[#allocation7 + $0x380] ss:$12 sps:$4 sm:$0xff]  }
 0x9fa   :  { %7087 = vmatpush1.bf16.msra.mxu0 %v13034_v57 }
 0x9fb   :  { %7088 = vmatprep.subr.bf16.mxu0 %v13039_v46  ;;  %v13093_v46 = vld [vmem:[#allocation7 + $0x394] ss:$12 sps:$4 sm:$0xff]  }
 0x9fe   :  { %7089 = vmatpush1.bf16.msra.mxu0 %v13037_v21 }
 0x9ff   :  { %7090 = vmatprep.subr.bf16.mxu0 %v13042_v36 }
 0xa02   :  { %7091 = vmatpush1.bf16.msra.mxu0 %v13040_v10 }
 0xa03   :  { %7092 = vmatprep.subr.bf16.mxu0 %v13045_v48 }
 0xa06   :  { %7093 = vmatpush1.bf16.msra.mxu0 %v13043_v5  ;;  %v13091_v5 = vld [vmem:[#allocation7 + $0x390] ss:$12 sps:$4 sm:$0xff]  }
 0xa07   :  { %7094 = vmatprep.subr.bf16.mxu0 %v13050_v44  ;;  %v13094_v44 = vld [vmem:[#allocation7 + $0x398] ss:$12 sps:$4 sm:$0xff]  }
 0xa0a   :  { %7095 = vmatpush1.bf16.msra.mxu0 %v13048_v38  ;;  %v13097_v38 = vld [vmem:[#allocation7 + $0x3ac] ss:$12 sps:$4 sm:$0xff]  }
 0xa0b   :  { %7096 = vmatprep.subr.bf16.mxu0 %v13055_v27  ;;  %v13095_v27 = vld [vmem:[#allocation7 + $0x3a8] ss:$12 sps:$4 sm:$0xff]  }
 0xa0e   :  { %7097 = vmatpush1.bf16.msra.mxu0 %v13053_v40  ;;  %v13098_v40 = vld [vmem:[#allocation7 + $0x3b0] ss:$12 sps:$4 sm:$0xff]  }
 0xa0f   :  { %7098 = vmatprep.subr.bf16.mxu0 %v13060_v45  ;;  %v13101_v45 = vld [vmem:[#allocation7 + $0x4] ss:$12 sps:$4 sm:$0xff]  }
 0xa12   :  { %7099 = vmatpush1.bf16.msra.mxu0 %v13058_v35  ;;  %v13102_v35 = vld [vmem:[#allocation7 + $0xc8] ss:$12 sps:$4 sm:$0xff]  }
 0xa13   :  { %7100 = vmatprep.subr.bf16.mxu0 %v13065_v16  ;;  %v13106_v16 = vld [vmem:[#allocation7 + $0x1c] ss:$12 sps:$4 sm:$0xff]  }
 0xa16   :  { %7101 = vmatpush1.bf16.msra.mxu0 %v13063_v47  ;;  %v13103_v47 = vld [vmem:[#allocation7 + $0x8] ss:$12 sps:$4 sm:$0xff]  }
 0xa17   :  { %7102 = vmatprep.subr.bf16.mxu0 %v13070_v15  ;;  %v13108_v15 = vld [vmem:[#allocation7 + $0x20] ss:$12 sps:$4 sm:$0xff]  }
 0xa1a   :  { %7103 = vmatpush1.bf16.msra.mxu0 %v13068_v59  ;;  %v13112_v59 = vld [vmem:[#allocation7 + $0xf8] ss:$12 sps:$4 sm:$0xff]  }
 0xa1b   :  { %7104 = vmatprep.subr.bf16.mxu0 %v13075_v28  ;;  %v13116_v28 = vld [vmem:[#allocation7 + $0x4c] ss:$12 sps:$4 sm:$0xff]  }
 0xa1e   :  { %7105 = vmatpush1.bf16.msra.mxu0 %v13073_v17  ;;  %v13113_v17 = vld [vmem:[#allocation7 + $0x38] ss:$12 sps:$4 sm:$0xff]  }
 0xa1f   :  { %7106 = vmatprep.subr.bf16.mxu0 %v13080_v58  ;;  %v13118_v58 = vld [vmem:[#allocation7 + $0x50] ss:$12 sps:$4 sm:$0xff]  }
 0xa22   :  { %7107 = vmatpush1.bf16.msra.mxu0 %v13078_v3  ;;  %v13122_v3 = vld [vmem:[#allocation7 + $0x128] ss:$12 sps:$4 sm:$0xff]  }
 0xa23   :  { %7119 = vmatprep.subr.bf16.mxu0 %v13085_v32  ;;  %v13123_v32 = vld [vmem:[#allocation7 + $0x68] ss:$12 sps:$4 sm:$0xff]  }
 0xaa0   :  { %v6441_v34 = vpop.f32.mrb[128].mxu0 }
 0xaa1   :  { %v6443_v63 = vpop.f32.mrb[129].mxu0 }
 0xaa2   :  { %v6445_v42 = vpop.f32.mrb[130].mxu0 }
 0xaa3   :  { %v14790_v51 = vpack.c.bf16 %v6445_v42, %v6441_v34  ;;  %v6447_v43 = vpop.f32.mrb[131].mxu0  ;;  %v13126_v34 = vld [vmem:[#allocation7 + $0x7c] ss:$12 sps:$4 sm:$0xff]   ;;  %v13124_v42 = vld [vmem:[#allocation7 + $0x78] ss:$12 sps:$4 sm:$0xff]  }
 0xaa4   :  { %v6492_v61 = vpack.c.bf16 %v6447_v43, %v6443_v63  ;;  %v13127_v63 = vld [vmem:[#allocation7 + $0x140] ss:$12 sps:$4 sm:$0xff]  }
 0xaa5   :  { %v13128_v43 = vld [vmem:[#allocation7 + $0x80] ss:$12 sps:$4 sm:$0xff]  }
 0xaa8   :  { %v6484_v49 = vpop.f32.mrb[132].mxu0 }
 0xaa9   :  { %v11969_v13 = vpop.f32.mrb[133].mxu0 }
 0xaaa   :  { %v6487_v31 = vpop.f32.mrb[134].mxu0  ;;  %v13129_v13 = vld [vmem:[#allocation7 + $0x90] ss:$12 sps:$4 sm:$0xff]  }
 0xaab   :  { %v14792_v55 = vpack.c.bf16 %v6487_v31, %v6484_v49  ;;  %v11970_v29 = vpop.f32.mrb[135].mxu0  ;;  %v13132_v49 = vld [vmem:[#allocation7 + $0x158] ss:$12 sps:$4 sm:$0xff]  }
 0xaac   :  { %v13133_v31 = vld [vmem:[#allocation7 + $0x98] ss:$12 sps:$4 sm:$0xff]  }
 0xaad   :  { %v13136_v29 = vld [vmem:[#allocation7 + $0xac] ss:$12 sps:$4 sm:$0xff]  }
 0xab0   :  { %v6619_v60 = vpop.f32.mrb[136].mxu0 }
 0xab1   :  { %v6621_v23 = vpop.f32.mrb[137].mxu0 }
 0xab2   :  { %v6623_v53 = vpop.f32.mrb[138].mxu0 }
 0xab3   :  { %v6669_v1 = vpack.c.bf16 %v6623_v53, %v6619_v60  ;;  %v6625_v25 = vpop.f32.mrb[139].mxu0  ;;  %v13137_v60 = vld [vmem:[#allocation7 + $0x170] ss:$12 sps:$4 sm:$0xff]  }
 0xab4   :  { %v6670_v8 = vpack.c.bf16 %v6625_v25, %v6621_v23  ;;  %v13134_v23 = vld [vmem:[#allocation7 + $0xa8] ss:$12 sps:$4 sm:$0xff]   ;;  %v13138_v53 = vld [vmem:[#allocation7 + $0xb0] ss:$12 sps:$4 sm:$0xff]   ;;  %v13139_v25 = vld [vmem:[#allocation7 + $0xc0] ss:$12 sps:$4 sm:$0xff]  }
 0xab6   :  { %7108 = vmatprep.mubr.bf16.mxu0 %v6670_v8  ;;  %7194 = vmatprep.mubr.bf16.mxu1 %v6670_v8  ;;  %v13142_v8 = vld [vmem:[#allocation7 + $0x188] ss:$12 sps:$4 sm:$0xff]  }
 0xab7   :  { %7109 = vmatmul.mubr.bf16.vlgmr.msra.gmra.mrb[144].mxu0 %v6669_v1  ;;  %7195 = vmatmul.mubr.bf16.vlgmr.msra.gmra.mrb[176].mxu1 %v6669_v1  ;;  %v13141_v1 = vld [vmem:[#allocation7 + $0xc4] ss:$12 sps:$4 sm:$0xff]  }
 0xab8   :  { %7120 = vmatpush1.bf16.msra.mxu0 %v13083_v12  ;;  %11980 = vmatpush3.bf16.msra.mxu1 %v13086_v4  ;;  %v6662_v57 = vpop.f32.mrb[140].mxu0  ;;  %v13145_v12 = vld [vmem:[#allocation7 + $0xdc] ss:$12 sps:$4 sm:$0xff]   ;;  %v13143_v4 = vld [vmem:[#allocation7 + $0xd8] ss:$12 sps:$4 sm:$0xff]  }
 0xab9   :  { %7121 = vmatprep.subr.bf16.mxu0 %v13089_v26  ;;  %11981 = vmatprep.subr.bf16.mxu1 %v13466_v19  ;;  %v11977_v21 = vpop.f32.mrb[141].mxu0  ;;  %v13146_v26 = vld [vmem:[#allocation7 + $0x1a0] ss:$12 sps:$4 sm:$0xff]  }
 0xaba   :  { %v6665_v36 = vpop.f32.mrb[142].mxu0  ;;  %7151 = vmatprep.mubr.bf16.mxu0 %v13465_v0  ;;  %11987 = vmatprep.mubr.msk.bf16.mxu1 %vm13467_vm1, %v13466_v19  ;;  %v13151_v21 = vld [vmem:[#allocation7 + $0x108] ss:$12 sps:$4 sm:$0xff]  }
 0xabb   :  { %v6671_v10 = vpack.c.bf16 %v6665_v36, %v6662_v57  ;;  %v11978_v48 = vpop.f32.mrb[143].mxu0  ;;  %v13150_v57 = vld [vmem:[#allocation7 + $0x1b8] ss:$12 sps:$4 sm:$0xff]   ;;  %v13154_v36 = vld [vmem:[#allocation7 + $0x1d0] ss:$12 sps:$4 sm:$0xff]  }
 0xabc   :  { %7122 = vmatpush1.bf16.msra.mxu0 %v13087_v37  ;;  %11982 = vmatpush3.bf16.msra.mxu1 %v13090_v6  ;;  %v13149_v37 = vld [vmem:[#allocation7 + $0xf4] ss:$12 sps:$4 sm:$0xff]   ;;  %v13147_v6 = vld [vmem:[#allocation7 + $0xf0] ss:$12 sps:$4 sm:$0xff]  }
 0xabd   :  { %7123 = vmatprep.subr.bf16.mxu0 %v13093_v46  ;;  %11983 = vmatprep.subr.bf16.mxu1 %v13466_v19  ;;  %v13153_v46 = vld [vmem:[#allocation7 + $0x10c] ss:$12 sps:$4 sm:$0xff]  }
 0xabe   :  { %v13155_v48 = vld [vmem:[#allocation7 + $0x120] ss:$12 sps:$4 sm:$0xff]  }
 0xac0   :  { %7124 = vmatpush1.bf16.msra.mxu0 %v13091_v5  ;;  %11984 = vmatpush3.bf16.msra.mxu1 %v13094_v44  ;;  %v13160_v5 = vld [vmem:[#allocation7 + $0x13c] ss:$12 sps:$4 sm:$0xff]   ;;  %v13158_v44 = vld [vmem:[#allocation7 + $0x138] ss:$12 sps:$4 sm:$0xff]  }
 0xac1   :  { %7125 = vmatprep.subr.bf16.mxu0 %v13097_v38  ;;  %11985 = vmatprep.subr.bf16.mxu1 %v13466_v19  ;;  %v13163_v38 = vld [vmem:[#allocation7 + $0x154] ss:$12 sps:$4 sm:$0xff]  }
 0xac4   :  { %7126 = vmatpush1.bf16.msra.mxu0 %v13095_v27  ;;  %11986 = vmatpush3.bf16.msra.mxu1 %v13098_v40  ;;  %v13161_v27 = vld [vmem:[#allocation7 + $0x150] ss:$12 sps:$4 sm:$0xff]   ;;  %v13167_v40 = vld [vmem:[#allocation7 + $0x16c] ss:$12 sps:$4 sm:$0xff]  }
 0xac5   :  { %7567 = vmatprep.subr.bf16.mxu0 %v13101_v45  ;;  %11474 = vmatprep.subr.bf16.mxu1 %v13102_v35  ;;  %v13168_v45 = vld [vmem:[#allocation7 + $0x180] ss:$12 sps:$4 sm:$0xff]   ;;  %v13171_v35 = vld [vmem:[#allocation7 + $0x198] ss:$12 sps:$4 sm:$0xff]  }
 0xac7   :  { %10743 = vmatmul.mubr.msk.bf16.vlgmr.msra.gmra.mrb[144].mxu0 %vm2407_vm3, %v6671_v10  ;;  %11988 = vmatmul.mubr.msk.bf16.vlgmr.msra.gmra.mrb[180].mxu1 %vm2407_vm3, %v6671_v10  ;;  %v13157_v10 = vld [vmem:[#allocation7 + $0x124] ss:$12 sps:$4 sm:$0xff]  }
 0xac8   :  { %7568 = vmatpush1.bf16.msra.mxu0 %v13099_v11  ;;  %7599 = vmatprep.mubr.bf16.mxu0 %v6492_v61  ;;  %v13174_v11 = vld [vmem:[#allocation7 + $0x1b0] ss:$12 sps:$4 sm:$0xff]  }
 0xac9   :  { %11475 = vmatpush3.bf16.msra.mxu1 %v13103_v47  ;;  %7685 = vmatprep.mubr.bf16.mxu1 %v6492_v61  ;;  %v13131_v61 = vld [vmem:[#allocation7 + $0x94] ss:$12 sps:$4 sm:$0xff]   ;;  %v13179_v47 = vld [vmem:[#allocation7 + $0x1cc] ss:$12 sps:$4 sm:$0xff]  }
 0xaca   :  { %7569 = vmatprep.subr.bf16.mxu0 %v13106_v16  ;;  %11476 = vmatprep.subr.bf16.mxu1 %v13107_v18  ;;  %v13177_v16 = vld [vmem:[#allocation7 + $0x1c8] ss:$12 sps:$4 sm:$0xff]   ;;  %v13180_v18 = vld [vmem:[#allocation7 + $0x3c0] ss:$12 sps:$4 sm:$0xff]  }
 0xacc   :  { %7570 = vmatpush1.bf16.msra.mxu0 %v13104_v39  ;;  %v13207_v39 = vld [vmem:[#allocation7 + $0x488] ss:$12 sps:$4 sm:$0xff]  }
 0xacd   :  { %11477 = vmatpush3.bf16.msra.mxu1 %v13108_v15  ;;  %7571 = vmatprep.subr.bf16.mxu0 %v13111_v2  ;;  %v13185_v15 = vld [vmem:[#allocation7 + $0x3dc] ss:$12 sps:$4 sm:$0xff]   ;;  %v13183_v2 = vld [vmem:[#allocation7 + $0x3d8] ss:$12 sps:$4 sm:$0xff]  }
 0xace   :  { %11478 = vmatprep.subr.bf16.mxu1 %v13112_v59  ;;  %v13188_v59 = vld [vmem:[#allocation7 + $0x3f4] ss:$12 sps:$4 sm:$0xff]  }
 0xad0   :  { %7572 = vmatpush1.bf16.msra.mxu0 %v13109_v7  ;;  %v13186_v7 = vld [vmem:[#allocation7 + $0x3f0] ss:$12 sps:$4 sm:$0xff]  }
 0xad1   :  { %11479 = vmatpush3.bf16.msra.mxu1 %v13113_v17  ;;  %7573 = vmatprep.subr.bf16.mxu0 %v13116_v28  ;;  %v13191_v17 = vld [vmem:[#allocation7 + $0x40c] ss:$12 sps:$4 sm:$0xff]   ;;  %v13189_v28 = vld [vmem:[#allocation7 + $0x408] ss:$12 sps:$4 sm:$0xff]  }
 0xad2   :  { %11480 = vmatprep.subr.bf16.mxu1 %v13117_v30  ;;  %v13194_v30 = vld [vmem:[#allocation7 + $0x424] ss:$12 sps:$4 sm:$0xff]  }
 0xad4   :  { %7574 = vmatpush1.bf16.msra.mxu0 %v13114_v33  ;;  %v13192_v33 = vld [vmem:[#allocation7 + $0x420] ss:$12 sps:$4 sm:$0xff]  }
 0xad5   :  { %11481 = vmatpush3.bf16.msra.mxu1 %v13118_v58  ;;  %7575 = vmatprep.subr.bf16.mxu0 %v13121_v41  ;;  %v13197_v58 = vld [vmem:[#allocation7 + $0x43c] ss:$12 sps:$4 sm:$0xff]   ;;  %v13195_v41 = vld [vmem:[#allocation7 + $0x438] ss:$12 sps:$4 sm:$0xff]  }
 0xad6   :  { %11482 = vmatprep.subr.bf16.mxu1 %v13122_v3  ;;  %v13198_v3 = vld [vmem:[#allocation7 + $0x450] ss:$12 sps:$4 sm:$0xff]  }
 0xad8   :  { %7576 = vmatpush1.bf16.msra.mxu0 %v13119_v50  ;;  %v13203_v50 = vld [vmem:[#allocation7 + $0x46c] ss:$12 sps:$4 sm:$0xff]  }
 0xad9   :  { %11483 = vmatpush3.bf16.msra.mxu1 %v13123_v32  ;;  %7577 = vmatprep.subr.bf16.mxu0 %v13126_v34  ;;  %v13201_v32 = vld [vmem:[#allocation7 + $0x468] ss:$12 sps:$4 sm:$0xff]   ;;  %v13206_v34 = vld [vmem:[#allocation7 + $0x484] ss:$12 sps:$4 sm:$0xff]  }
 0xada   :  { %11484 = vmatprep.subr.bf16.mxu1 %v13127_v63  ;;  %v13204_v63 = vld [vmem:[#allocation7 + $0x480] ss:$12 sps:$4 sm:$0xff]  }
 0xadc   :  { %7578 = vmatpush1.bf16.msra.mxu0 %v13124_v42  ;;  %v13211_v42 = vld [vmem:[#allocation7 + $0x49c] ss:$12 sps:$4 sm:$0xff]  }
 0xadd   :  { %11485 = vmatpush3.bf16.msra.mxu1 %v13128_v43  ;;  %7579 = vmatprep.subr.bf16.mxu0 %v13131_v61  ;;  %v13212_v43 = vld [vmem:[#allocation7 + $0x4a0] ss:$12 sps:$4 sm:$0xff]   ;;  %v13209_v61 = vld [vmem:[#allocation7 + $0x498] ss:$12 sps:$4 sm:$0xff]  }
 0xade   :  { %11486 = vmatprep.subr.bf16.mxu1 %v13132_v49  ;;  %v13213_v49 = vld [vmem:[#allocation7 + $0x3e0] ss:$12 sps:$4 sm:$0xff]  }
 0xae0   :  { %7580 = vmatpush1.bf16.msra.mxu0 %v13129_v13  ;;  %v13216_v13 = vld [vmem:[#allocation7 + $0x4b4] ss:$12 sps:$4 sm:$0xff]  }
 0xae1   :  { %11487 = vmatpush3.bf16.msra.mxu1 %v13133_v31  ;;  %7581 = vmatprep.subr.bf16.mxu0 %v13136_v29  ;;  %v13217_v31 = vld [vmem:[#allocation7 + $0x4b8] ss:$12 sps:$4 sm:$0xff]   ;;  %v13214_v29 = vld [vmem:[#allocation7 + $0x4b0] ss:$12 sps:$4 sm:$0xff]  }
 0xae2   :  { %11488 = vmatprep.subr.bf16.mxu1 %v13137_v60  ;;  %v13218_v60 = vld [vmem:[#allocation7 + $0x3f8] ss:$12 sps:$4 sm:$0xff]  }
 0xae4   :  { %7582 = vmatpush1.bf16.msra.mxu0 %v13134_v23  ;;  %v13221_v23 = vld [vmem:[#allocation7 + $0x4cc] ss:$12 sps:$4 sm:$0xff]  }
 0xae5   :  { %11489 = vmatpush3.bf16.msra.mxu1 %v13138_v53  ;;  %7583 = vmatprep.subr.bf16.mxu0 %v13141_v1  ;;  %v13222_v53 = vld [vmem:[#allocation7 + $0x4d0] ss:$12 sps:$4 sm:$0xff]   ;;  %v13219_v1 = vld [vmem:[#allocation7 + $0x4c8] ss:$12 sps:$4 sm:$0xff]  }
 0xae6   :  { %11991 = vmatprep.subr.bf16.mxu1 %v13466_v19 }
 0xae8   :  { %7686 = vmatmul.mubr.bf16.vlgmr.msra.gmra.mrb[184].mxu1 %v14790_v51  ;;  %7584 = vmatpush1.bf16.msra.mxu0 %v13139_v25  ;;  %v13223_v25 = vld [vmem:[#allocation7 + $0x410] ss:$12 sps:$4 sm:$0xff]  }
 0xae9   :  { %11992 = vmatpush3.bf16.msra.mxu1 %v13142_v8  ;;  %7585 = vmatprep.subr.bf16.mxu0 %v13145_v12  ;;  %v13226_v8 = vld [vmem:[#allocation7 + $0x4e4] ss:$12 sps:$4 sm:$0xff]   ;;  %v13227_v12 = vld [vmem:[#allocation7 + $0x4e8] ss:$12 sps:$4 sm:$0xff]  }
 0xaea   :  { %11993 = vmatprep.subr.bf16.mxu1 %v13466_v19  ;;  %11999 = vmatprep.mubr.msk.bf16.mxu1 %vm13467_vm1, %v13466_v19 }
 0xaec   :  { %7586 = vmatpush1.bf16.msra.mxu0 %v13143_v4  ;;  %v13224_v4 = vld [vmem:[#allocation7 + $0x4e0] ss:$12 sps:$4 sm:$0xff]  }
 0xaed   :  { %11994 = vmatpush3.bf16.msra.mxu1 %v13146_v26  ;;  %7587 = vmatprep.subr.bf16.mxu0 %v13149_v37  ;;  %v13228_v26 = vld [vmem:[#allocation7 + $0x428] ss:$12 sps:$4 sm:$0xff]  }
 0xaee   :  { %11995 = vmatprep.subr.bf16.mxu1 %v13466_v19  ;;  %v13231_v37 = vld [vmem:[#allocation7 + $0x4fc] ss:$12 sps:$4 sm:$0xff]  }
 0xaf0   :  { %7588 = vmatpush1.bf16.msra.mxu0 %v13147_v6  ;;  %v13232_v6 = vld [vmem:[#allocation7 + $0x500] ss:$12 sps:$4 sm:$0xff]  }
 0xaf1   :  { %11996 = vmatpush3.bf16.msra.mxu1 %v13150_v57  ;;  %7589 = vmatprep.subr.bf16.mxu0 %v13153_v46  ;;  %v13229_v57 = vld [vmem:[#allocation7 + $0x4f8] ss:$12 sps:$4 sm:$0xff]   ;;  %v13233_v46 = vld [vmem:[#allocation7 + $0x440] ss:$12 sps:$4 sm:$0xff]  }
 0xaf2   :  { %11997 = vmatprep.subr.bf16.mxu1 %v13466_v19 }
 0xaf4   :  { %7590 = vmatpush1.bf16.msra.mxu0 %v13151_v21  ;;  %v13236_v21 = vld [vmem:[#allocation7 + $0x514] ss:$12 sps:$4 sm:$0xff]  }
 0xaf5   :  { %11998 = vmatpush3.bf16.msra.mxu1 %v13154_v36  ;;  %7591 = vmatprep.subr.bf16.mxu0 %v13157_v10  ;;  %v13237_v36 = vld [vmem:[#allocation7 + $0x518] ss:$12 sps:$4 sm:$0xff]   ;;  %v13234_v10 = vld [vmem:[#allocation7 + $0x510] ss:$12 sps:$4 sm:$0xff]  }
 0xaf6   :  { %7746 = vmatprep.subr.bf16.mxu1 %v14744_v9  ;;  %v13164_v9 = vld [vmem:[%s15309_s11 + $0x10] sm:$0x1f]  }
 0xaf8   :  { %12000 = vmatmul.mubr.msk.bf16.vlgmr.msra.gmra.mrb[180].mxu1 %vm2407_vm3, %v14792_v55  ;;  %7592 = vmatpush1.bf16.msra.mxu0 %v13155_v48  ;;  %v13238_v48 = vld [vmem:[#allocation7 + $0x458] ss:$12 sps:$4 sm:$0xff]  }
 0xaf9   :  { %7747 = vmatpush1.bf16.msra.mxu1 %v14742_v14  ;;  %7593 = vmatprep.subr.bf16.mxu0 %v13160_v5  ;;  %v13165_v14 = vld [vmem:[#allocation7 + $0x168] ss:$12 sps:$4 sm:$0xff]   ;;  %v13241_v5 = vld [vmem:[#allocation7 + $0x52c] ss:$12 sps:$4 sm:$0xff]  }
 0xafa   :  { %10810 = vmatprep.subr.msk.bf16.mxu1 %vm6397_vm6, %v14750_v20  ;;  %7778 = vmatprep.mubr.bf16.mxu1 %v13465_v0  ;;  %v13170_v20 = vld [vmem:[#allocation7 + $0x184] ss:$12 sps:$4 sm:$0xff]  }
 0xafc   :  { %7594 = vmatpush1.bf16.msra.mxu0 %v13158_v44  ;;  %v13242_v44 = vld [vmem:[#allocation7 + $0x530] ss:$12 sps:$4 sm:$0xff]  }
 0xafd   :  { %7749 = vmatpush1.bf16.msra.mxu1 %v14753_v24  ;;  %7595 = vmatprep.subr.bf16.mxu0 %v13163_v38  ;;  %v13173_v24 = vld [vmem:[#allocation7 + $0x19c] ss:$12 sps:$4 sm:$0xff]  }
 0xafe   :  { %12003 = vmatprep.subr.bf16.mxu1 %v13466_v19  ;;  %v13239_v38 = vld [vmem:[#allocation7 + $0x528] ss:$12 sps:$4 sm:$0xff]  }
 0xb00   :  { %10811 = vmatmul.mubr.msk.bf16.vlgmr.msra.gmra.mrb[188].mxu1 %vm6393_vm7, %v13164_v9  ;;  %7596 = vmatpush1.bf16.msra.mxu0 %v13161_v27  ;;  %v13243_v27 = vld [vmem:[#allocation7 + $0x470] ss:$12 sps:$4 sm:$0xff]  }
 0xb01   :  { %12004 = vmatpush3.bf16.msra.mxu1 %v14746_v62  ;;  %7597 = vmatprep.subr.bf16.mxu0 %v13167_v40  ;;  %v13176_v62 = vld [vmem:[#allocation7 + $0x1b4] ss:$12 sps:$4 sm:$0xff]  }
 0xb02   :  { %12005 = vmatprep.subr.bf16.mxu1 %v13466_v19  ;;  %12007 = vmatprep.mubr.msk.bf16.mxu1 %vm13467_vm1, %v13466_v19 }
 0xb04   :  { %7598 = vmatpush1.bf16.msra.mxu0 %v13165_v14 }
 0xb05   :  { %12006 = vmatpush3.bf16.msra.mxu1 %v14768_v22  ;;  %7610 = vmatprep.subr.bf16.mxu0 %v13170_v20  ;;  %v13182_v22 = vld [vmem:[#allocation7 + $0x3c4] ss:$12 sps:$4 sm:$0xff]  }
 0xb06   :  { %11504 = vmatprep.subr.bf16.mxu1 %v13207_v39 }
 0xb07   :  { %7600 = vmatmul.mubr.bf16.vlgmr.msra.gmra.mrb[144].mxu0 %v14790_v51  ;;  %v13208_v51 = vld [vmem:[#allocation7 + $0x3c8] ss:$12 sps:$4 sm:$0xff]  }
 0xb08   :  { %7611 = vmatpush1.bf16.msra.mxu0 %v13168_v45  ;;  %12008 = vmatmul.mubr.msk.bf16.vlgmr.msra.gmra.mrb[192].mxu1 %vm6393_vm7, %v13164_v9  ;;  %v13246_v9 = vld [vmem:[#allocation7 + $0x544] ss:$12 sps:$4 sm:$0xff]  }
 0xb09   :  { %7612 = vmatprep.subr.bf16.mxu0 %v13173_v24  ;;  %7642 = vmatprep.mubr.bf16.mxu0 %v13465_v0 }
 0xb0a   :  { %11505 = vmatpush3.bf16.msra.mxu1 %v13208_v51 }
 0xb0b   :  { %11506 = vmatprep.subr.bf16.mxu1 %v13212_v43  ;;  %v13252_v43 = vld [vmem:[#allocation7 + $0x570] ss:$12 sps:$4 sm:$0xff]  }
 0xb0c   :  { %7613 = vmatpush1.bf16.msra.mxu0 %v13171_v35 }
 0xb0d   :  { %7614 = vmatprep.subr.bf16.mxu0 %v13176_v62 }
 0xb0e   :  { %11507 = vmatpush3.bf16.msra.mxu1 %v13213_v49  ;;  %v13258_v49 = vld [vmem:[#allocation7 + $0x58c] ss:$12 sps:$4 sm:$0xff]  }
 0xb0f   :  { %11508 = vmatprep.subr.bf16.mxu1 %v13217_v31  ;;  %v13259_v31 = vld [vmem:[#allocation7 + $0x590] ss:$12 sps:$4 sm:$0xff]  }
 0xb10   :  { %7615 = vmatpush1.bf16.msra.mxu0 %v13174_v11 }
 0xb11   :  { %7616 = vmatprep.subr.bf16.mxu0 %v13179_v47 }
 0xb12   :  { %11509 = vmatpush3.bf16.msra.mxu1 %v13218_v60  ;;  %v13262_v60 = vld [vmem:[%s15312_s14 + $0xe8] sm:$0xff]  }
 0xb13   :  { %11510 = vmatprep.subr.bf16.mxu1 %v13222_v53  ;;  %v13264_v53 = vld [vmem:[%s15312_s14 + $0xf0] sm:$0xff]  }
 0xb14   :  { %7617 = vmatpush1.bf16.msra.mxu0 %v13177_v16 }
 0xb15   :  { %8237 = vmatprep.subr.bf16.mxu0 %v13182_v22 }
 0xb16   :  { %11511 = vmatpush3.bf16.msra.mxu1 %v13223_v25  ;;  %v13266_v25 = vld [vmem:[%s15312_s14 + $0xf8] sm:$0xff]  }
 0xb17   :  { %10805 = vmatmul.mubr.msk.bf16.vlgmr.msra.gmra.mrb[144].mxu0 %vm2407_vm3, %v14792_v55  ;;  %v13200_v55 = vld [vmem:[#allocation7 + $0x454] ss:$12 sps:$4 sm:$0xff]   ;;  %11512 = vmatprep.subr.bf16.mxu1 %v13227_v12  ;;  %v13267_v12 = vld [vmem:[%s15312_s14 + $0xb8] sm:$0xff]  }
 0xb18   :  { %8238 = vmatpush1.bf16.msra.mxu0 %v13180_v18 }
 0xb19   :  { %8239 = vmatprep.subr.bf16.mxu0 %v13185_v15 }
 0xb1a   :  { %11513 = vmatpush3.bf16.msra.mxu1 %v13228_v26  ;;  %v13270_v26 = vld [vmem:[%s15312_s14 + $0xc0] sm:$0xff]  }
 0xb1b   :  { %11514 = vmatprep.subr.bf16.mxu1 %v13232_v6  ;;  %v13272_v6 = vld [vmem:[%s15312_s14 + $0x108] sm:$0xff]  }
 0xb1c   :  { %8240 = vmatpush1.bf16.msra.mxu0 %v13183_v2 }
 0xb1d   :  { %8241 = vmatprep.subr.bf16.mxu0 %v13188_v59 }
 0xb1e   :  { %11515 = vmatpush3.bf16.msra.mxu1 %v13233_v46  ;;  %v13274_v46 = vld [vmem:[%s15312_s14 + $0x90] sm:$0xff]  }
 0xb1f   :  { %11516 = vmatprep.subr.bf16.mxu1 %v13237_v36  ;;  %v13276_v36 = vld [vmem:[%s15312_s14 + $0xd0] sm:$0xff]  }
 0xb20   :  { %8242 = vmatpush1.bf16.msra.mxu0 %v13186_v7 }
 0xb21   :  { %8243 = vmatprep.subr.bf16.mxu0 %v13191_v17 }
 0xb22   :  { %11517 = vmatpush3.bf16.msra.mxu1 %v13238_v48  ;;  %v13278_v48 = vld [vmem:[%s15312_s14 + $0x118] sm:$0xff]  }
 0xb23   :  { %11518 = vmatprep.subr.bf16.mxu1 %v13242_v44  ;;  %v13280_v44 = vld [vmem:[%s15312_s14 + $0x180] sm:$0xff]  }
 0xb24   :  { %8244 = vmatpush1.bf16.msra.mxu0 %v13189_v28 }
 0xb25   :  { %8245 = vmatprep.subr.bf16.mxu0 %v13194_v30  ;;  %v13244_v30 = vld [vmem:[#allocation7 + $0x540] ss:$12 sps:$4 sm:$0xff]  }
 0xb26   :  { %11519 = vmatpush3.bf16.msra.mxu1 %v13243_v27 }
 0xb27   :  { %12011 = vmatprep.subr.bf16.mxu1 %v13466_v19 }
 0xb28   :  { %8246 = vmatpush1.bf16.msra.mxu0 %v13192_v33  ;;  %v13247_v33 = vld [vmem:[#allocation7 + $0x548] ss:$12 sps:$4 sm:$0xff]  }
 0xb29   :  { %8247 = vmatprep.subr.bf16.mxu0 %v13197_v58  ;;  %v13250_v58 = vld [vmem:[#allocation7 + $0x55c] ss:$12 sps:$4 sm:$0xff]  }
 0xb2c   :  { %8248 = vmatpush1.bf16.msra.mxu0 %v13195_v41  ;;  %v13248_v41 = vld [vmem:[#allocation7 + $0x558] ss:$12 sps:$4 sm:$0xff]  }
 0xb2d   :  { %8249 = vmatprep.subr.bf16.mxu0 %v13200_v55  ;;  %v13251_v55 = vld [vmem:[#allocation7 + $0x560] ss:$12 sps:$4 sm:$0xff]  }
 0xb30   :  { %8250 = vmatpush1.bf16.msra.mxu0 %v13198_v3 }
 0xb31   :  { %8251 = vmatprep.subr.bf16.mxu0 %v13203_v50  ;;  %v13254_v50 = vld [vmem:[#allocation7 + $0x574] ss:$12 sps:$4 sm:$0xff]  }
 0xb34   :  { %8252 = vmatpush1.bf16.msra.mxu0 %v13201_v32 }
 0xb35   :  { %8253 = vmatprep.subr.bf16.mxu0 %v13206_v34 }
 0xb38   :  { %8254 = vmatpush1.bf16.msra.mxu0 %v13204_v63 }
 0xb39   :  { %8255 = vmatprep.subr.bf16.mxu0 %v13211_v42 }
 0xb3c   :  { %8256 = vmatpush1.bf16.msra.mxu0 %v13209_v61  ;;  %v13255_v61 = vld [vmem:[#allocation7 + $0x578] ss:$12 sps:$4 sm:$0xff]  }
 0xb3d   :  { %8257 = vmatprep.subr.bf16.mxu0 %v13216_v13  ;;  %v13256_v13 = vld [vmem:[#allocation7 + $0x588] ss:$12 sps:$4 sm:$0xff]  }
 0xb40   :  { %8258 = vmatpush1.bf16.msra.mxu0 %v13214_v29  ;;  %v13261_v29 = vld [vmem:[%s15312_s14 + $0xa0] sm:$0xff]  }
 0xb41   :  { %8259 = vmatprep.subr.bf16.mxu0 %v13221_v23  ;;  %v13263_v23 = vld [vmem:[%s15312_s14 + $0xa8] sm:$0xff]  }
 0xb44   :  { %8260 = vmatpush1.bf16.msra.mxu0 %v13219_v1  ;;  %v13265_v1 = vld [vmem:[%s15312_s14 + $0xb0] sm:$0xff]  }
 0xb45   :  { %8261 = vmatprep.subr.bf16.mxu0 %v13226_v8  ;;  %v13268_v8 = vld [vmem:[%s15312_s14 + $0x80] sm:$0xff]  }
 0xb48   :  { %8262 = vmatpush1.bf16.msra.mxu0 %v13224_v4  ;;  %v13269_v4 = vld [vmem:[%s15312_s14 + $0x100] sm:$0xff]  }
 0xb49   :  { %8263 = vmatprep.subr.bf16.mxu0 %v13231_v37  ;;  %v13271_v37 = vld [vmem:[%s15312_s14 + $0x88] sm:$0xff]  }
 0xb4c   :  { %8264 = vmatpush1.bf16.msra.mxu0 %v13229_v57  ;;  %v13273_v57 = vld [vmem:[%s15312_s14 + $0xc8] sm:$0xff]  }
 0xb4d   :  { %8265 = vmatprep.subr.bf16.mxu0 %v13236_v21  ;;  %v13275_v21 = vld [vmem:[%s15312_s14 + $0x110] sm:$0xff]  }
 0xb50   :  { %8266 = vmatpush1.bf16.msra.mxu0 %v13234_v10  ;;  %v13277_v10 = vld [vmem:[%s15312_s14 + $0x98] sm:$0xff]  }
 0xb51   :  { %8267 = vmatprep.subr.bf16.mxu0 %v13241_v5  ;;  %v13279_v5 = vld [vmem:[%s15312_s14 + $0xd8] sm:$0xff]  }
 0xb54   :  { %8268 = vmatpush1.bf16.msra.mxu0 %v13239_v38 }
 0xb55   :  { %8280 = vmatprep.subr.bf16.mxu0 %v13246_v9 }
 0xb8a   :  { %v11463_v40 = vpop.f32.mrb[176].mxu1 }
 0xb8b   :  { %v11464_v14 = vpop.f32.mrb[177].mxu1 }
 0xb8c   :  { %v11465_v20 = vadd.f32 %v11464_v14, %v11463_v40  ;;  %v11466_v45 = vpop.f32.mrb[178].mxu1 }
 0xb8d   :  { %v11467_v24 = vpop.f32.mrb[179].mxu1 }
 0xb8e   :  { %v11468_v35 = vadd.f32 %v11467_v24, %v11466_v45 }
 0xbbb   :  { %v11490_v62 = vpop.f32.mrb[184].mxu1 }
 0xbbc   :  { %v11491_v11 = vpop.f32.mrb[185].mxu1 }
 0xbbd   :  { %v11492_v47 = vadd.f32 %v11491_v11, %v11490_v62  ;;  %v11493_v16 = vpop.f32.mrb[186].mxu1  ;;  %v10875_v62 = vld [vmem:[%s15311_s13 + $0x1] ss:$2 sm:$0x7] }
 0xbbe   :  { %v11494_v22 = vpop.f32.mrb[187].mxu1 }
 0xbbf   :  { %v14833_v18 = vadd.f32 %v11492_v47, %v11465_v20  ;;  %v11495_v39 = vadd.f32 %v11494_v22, %v11493_v16  ;;  %v8440_v16 = vrot.slane %v10875_v62, %v14126_v52 }
 0xbc1   :  { %v14835_v51 = vadd.f32 %v11495_v39, %v11468_v35  ;;  %v8411_v35 = vld [vmem:[%s15311_s13] ss:$2 sm:$0x7] }
 0xbc2   :  { %v8416_v11 = vrot.slane %v8411_v35, %v14126_v52  ;;  %v8420_v47 = vrot.slane %v8411_v35, %v14133_v56  ;;  %v8424_v22 = vrot.slane %v8411_v35, %v14128_v54  ;;  %v13299_v35 = vld [vmem:[%s15312_s14 + $0x8] sm:$0xff]  }
 0xbd3   :  { %v7780_v15 = vpop.f32.mrb[188].mxu1 }
 0xbd4   :  { %v7782_v2 = vpop.f32.mrb[189].mxu1 }
 0xbd5   :  { %v7784_v59 = vpop.f32.mrb[190].mxu1 }
 0xbd6   :  { %v7830_v7 = vpack.c.bf16 %v7784_v59, %v7780_v15  ;;  %v7786_v17 = vpop.f32.mrb[191].mxu1  ;;  %v8448_v59 = vrot.slane %v10875_v62, %v14128_v54 }
 0xbd7   :  { %v7831_v28 = vpack.c.bf16 %v7786_v17, %v7782_v2 }
 0xbd9   :  { %8269 = vmatprep.mubr.bf16.mxu0 %v7831_v28  ;;  %8355 = vmatprep.mubr.bf16.mxu1 %v7831_v28 }
 0xbda   :  { %8270 = vmatmul.mubr.bf16.vlgmr.msra.gmra.mrb[144].mxu0 %v7830_v7  ;;  %8356 = vmatmul.mubr.bf16.vlgmr.msra.gmra.mrb[196].mxu1 %v7830_v7 }
 0xbdb   :  { %8281 = vmatpush1.bf16.msra.mxu0 %v13244_v30  ;;  %12012 = vmatpush3.bf16.msra.mxu1 %v13247_v33  ;;  %v7823_v3 = vpop.f32.mrb[192].mxu1 }
 0xbdc   :  { %8282 = vmatprep.subr.bf16.mxu0 %v13250_v58  ;;  %12013 = vmatprep.subr.bf16.mxu1 %v13466_v19  ;;  %v12009_v32 = vpop.f32.mrb[193].mxu1 }
 0xbdd   :  { %v7826_v34 = vpop.f32.mrb[194].mxu1  ;;  %8312 = vmatprep.mubr.bf16.mxu0 %v13465_v0  ;;  %12019 = vmatprep.mubr.msk.bf16.mxu1 %vm13467_vm1, %v13466_v19  ;;  %v13260_v0 = vld [vmem:[%s15312_s14 + $0xe0] sm:$0xff]  }
 0xbde   :  { %v7832_v63 = vpack.c.bf16 %v7826_v34, %v7823_v3  ;;  %v12010_v42 = vpop.f32.mrb[195].mxu1 }
 0xbdf   :  { %8283 = vmatpush1.bf16.msra.mxu0 %v13248_v41  ;;  %12014 = vmatpush3.bf16.msra.mxu1 %v13251_v55 }
 0xbe0   :  { %8284 = vmatprep.subr.bf16.mxu0 %v13254_v50  ;;  %12015 = vmatprep.subr.bf16.mxu1 %v13466_v19 }
 0xbe3   :  { %8285 = vmatpush1.bf16.msra.mxu0 %v13252_v43  ;;  %12016 = vmatpush3.bf16.msra.mxu1 %v13255_v61 }
 0xbe4   :  { %8286 = vmatprep.subr.bf16.mxu0 %v13258_v49  ;;  %12017 = vmatprep.subr.bf16.mxu1 %v13466_v19 }
 0xbe7   :  { %8287 = vmatpush1.bf16.msra.mxu0 %v13256_v13  ;;  %12018 = vmatpush3.bf16.msra.mxu1 %v13259_v31 }
 0xbe8   :  { %11531 = vmatprep.subr.bf16.mxu1 %v13260_v0  ;;  %12035 = vmatprep.subr.bf16.mxu0 %v13466_v19 }
 0xbea   :  { %10873 = vmatmul.mubr.msk.bf16.vlgmr.msra.gmra.mrb[144].mxu0 %vm2407_vm3, %v7832_v63  ;;  %12020 = vmatmul.mubr.msk.bf16.vlgmr.msra.gmra.mrb[180].mxu1 %vm2407_vm3, %v7832_v63 }
 0xbeb   :  { %11532 = vmatpush3.bf16.msra.mxu1 %v13261_v29  ;;  %12043 = vmatprep.mubr.msk.bf16.mxu0 %vm13467_vm1, %v13466_v19 }
 0xbec   :  { %11533 = vmatprep.subr.bf16.mxu1 %v13262_v60  ;;  %12036 = vmatpush3.bf16.msra.mxu0 %v13268_v8 }
 0xbed   :  { %12037 = vmatprep.subr.bf16.mxu0 %v13466_v19 }
 0xbef   :  { %11534 = vmatpush3.bf16.msra.mxu1 %v13263_v23 }
 0xbf0   :  { %11535 = vmatprep.subr.bf16.mxu1 %v13264_v53  ;;  %12038 = vmatpush3.bf16.msra.mxu0 %v13271_v37 }
 0xbf1   :  { %12039 = vmatprep.subr.bf16.mxu0 %v13466_v19 }
 0xbf3   :  { %11536 = vmatpush3.bf16.msra.mxu1 %v13265_v1  ;;  %v13281_v1 = vld [vmem:[%s15312_s14 + $0x140] sm:$0xff]  }
 0xbf4   :  { %11537 = vmatprep.subr.bf16.mxu1 %v13266_v25  ;;  %12040 = vmatpush3.bf16.msra.mxu0 %v13274_v46  ;;  %v13285_v46 = vld [vmem:[%s15312_s14 + $0x128] sm:$0xff]  }
 0xbf5   :  { %12041 = vmatprep.subr.bf16.mxu0 %v13466_v19 }
 0xbf7   :  { %11538 = vmatpush3.bf16.msra.mxu1 %v13267_v12 }
 0xbf8   :  { %11539 = vmatprep.subr.bf16.mxu1 %v13269_v4  ;;  %12042 = vmatpush3.bf16.msra.mxu0 %v13277_v10  ;;  %v13282_v4 = vld [vmem:[%s15312_s14 + $0x120] sm:$0xff]   ;;  %v13288_v10 = vld [vmem:[%s15312_s14 + $0x130] sm:$0xff]  }
 0xbf9   :  { %11585 = vmatprep.subr.bf16.mxu0 %v13280_v44  ;;  %v13291_v44 = vld [vmem:[%s15312_s14 + $0x138] sm:$0xff]  }
 0xbfb   :  { %11540 = vmatpush3.bf16.msra.mxu1 %v13270_v26  ;;  %v13283_v26 = vld [vmem:[%s15312_s14 + $0x188] sm:$0xff]  }
 0xbfc   :  { %11541 = vmatprep.subr.bf16.mxu1 %v13272_v6  ;;  %v13284_v6 = vld [vmem:[%s15312_s14 + $0x148] sm:$0xff]  }
 0xbff   :  { %11542 = vmatpush3.bf16.msra.mxu1 %v13273_v57  ;;  %v13286_v57 = vld [vmem:[%s15312_s14 + $0x190] sm:$0xff]  }
 0xc00   :  { %11543 = vmatprep.subr.bf16.mxu1 %v13275_v21  ;;  %v13287_v21 = vld [vmem:[%s15312_s14 + $0x150] sm:$0xff]  }
 0xc03   :  { %11544 = vmatpush3.bf16.msra.mxu1 %v13276_v36  ;;  %v13289_v36 = vld [vmem:[%s15312_s14 + $0x198] sm:$0xff]  }
 0xc04   :  { %11545 = vmatprep.subr.bf16.mxu1 %v13278_v48  ;;  %v13290_v48 = vld [vmem:[%s15312_s14 + $0x158] sm:$0xff]  }
 0xc07   :  { %11546 = vmatpush3.bf16.msra.mxu1 %v13279_v5  ;;  %v13292_v5 = vld [vmem:[%s15312_s14 + $0x1a0] sm:$0xff]  }
 0xc08   :  { %12023 = vmatprep.subr.bf16.mxu1 %v13466_v19 }
 0xcad   :  { %v11520_v38 = vpop.f32.mrb[196].mxu1 }
 0xcae   :  { %v11521_v27 = vpop.f32.mrb[197].mxu1 }
 0xcaf   :  { %v11522_v9 = vadd.f32 %v11521_v27, %v11520_v38  ;;  %v11523_v40 = vpop.f32.mrb[198].mxu1  ;;  %v13294_v38 = vld [vmem:[%s15312_s14 + $0x40] sm:$0xff]  }
 0xcb0   :  { %v11524_v14 = vpop.f32.mrb[199].mxu1  ;;  %v13293_v27 = vld [vmem:[%s15312_s14 + $0x160] sm:$0xff]  }
 0xcb1   :  { %v11525_v20 = vadd.f32 %v11524_v14, %v11523_v40  ;;  %v12159_v45 = vadd.f32 %v14833_v18, %v11522_v9  ;;  %v13296_v9 = vld [vmem:[%s15312_s14 + $0x1a8] sm:$0xff]   ;;  %v13295_v40 = vld [vmem:[%s15312_s14] sm:$0xff]  }
 0xcb3   :  { %v12162_v24 = vadd.f32 %v14835_v51, %v11525_v20  ;;  %v8444_v51 = vrot.slane %v10875_v62, %v14133_v56  ;;  %v13298_v20 = vld [vmem:[%s15312_s14 + $0x48] sm:$0xff]   ;;  %v13302_v62 = vld [vmem:[%s15312_s14 + $0x50] sm:$0xff]  }
 0xcbd   :  { %v8314_v39 = vpop.f32.mrb[144].mxu0  ;;  %v8398_v18 = vpop.f32.mrb[180].mxu1 }
 0xcbe   :  { %v8428_v15 = vmul.f32 %v8416_v11, %v8314_v39  ;;  %v12160_v2 = vadd.f32 %v12159_v45, %v8398_v18  ;;  %v8316_v7 = vpop.f32.mrb[145].mxu0  ;;  %v12021_v17 = vpop.f32.mrb[181].mxu1  ;;  %v13297_v45 = vld [vmem:[%s15312_s14 + $0x168] sm:$0xff]   ;;  %v13305_v39 = vld [vmem:[%s15312_s14 + $0x178] sm:$0xff]  }
 0xcbf   :  { %v8429_v28 = vmul.f32 %v8420_v47, %v8316_v7  ;;  %v8318_v30 = vpop.f32.mrb[146].mxu0  ;;  %v8401_v33 = vpop.f32.mrb[182].mxu1  ;;  %v13307_v18 = vld [vmem:[%s15312_s14 + $0x18] sm:$0xff]   ;;  %v13312_v7 = vld [vmem:[%s15312_s14 + $0x68] sm:$0xff]  }
 0xcc0   :  { %v8452_v58 = vadd.f32 %v8440_v16, %v8428_v15  ;;  %v8430_v41 = vmul.f32 %v12160_v2, %v8424_v22  ;;  %v8431_v55 = vmul.f32 %v8416_v11, %v8318_v30  ;;  %v12163_v3 = vadd.f32 %v12162_v24, %v8401_v33  ;;  %v8320_v50 = vpop.f32.mrb[147].mxu0  ;;  %v12022_v32 = vpop.f32.mrb[183].mxu1  ;;  %v13300_v24 = vld [vmem:[%s15312_s14 + $0x1b0] sm:$0xff]   ;;  %v13308_v15 = vld [vmem:[%s15312_s14 + $0x260] sm:$0xff]   ;;  %v13311_v17 = vld [vmem:[%s15312_s14 + $0x268] sm:$0xff]  }
 0xcc1   :  { %v8453_v34 = vadd.f32 %v8444_v51, %v8429_v28  ;;  %v8432_v63 = vmul.f32 %v8420_v47, %v8320_v50  ;;  %v13301_v11 = vld [vmem:[%s15312_s14 + $0x170] sm:$0xff]   ;;  %v13304_v47 = vld [vmem:[%s15312_s14 + $0x1b8] sm:$0xff]   ;;  %v13313_v28 = vld [vmem:[%s15312_s14 + $0x28] sm:$0xff]  }
 0xcc2   :  { %v8454_v42 = vadd.f32 %v8448_v59, %v8430_v41  ;;  %v8455_v43 = vadd.f32 %v8440_v16, %v8431_v55  ;;  %v8433_v56 = vmul.f32 %v12163_v3, %v8424_v22  ;;  %v8458_v49 = vmax.f32 %v8452_v58, 0.0  ;;  %v13303_v16 = vld [vmem:[%s15312_s14 + $0x10] sm:$0xff]   ;;  %v13306_v22 = vld [vmem:[%s15312_s14 + $0x58] sm:$0xff]   ;;  %v13320_v3 = vld [vmem:[%s15312_s14 + $0x2c0] sm:$0xff]  }
 0xcc3   :  { %v8456_v61 = vadd.f32 %v8444_v51, %v8432_v63  ;;  %v8459_v31 = vmax.f32 %v8453_v34, 0.0  ;;  %v13309_v51 = vld [vmem:[%s15312_s14 + $0x60] sm:$0xff]   ;;  %v13315_v30 = vld [vmem:[%s15312_s14 + $0x70] sm:$0xff]   ;;  %v13318_v41 = vld [vmem:[%s15312_s14 + $0x78] sm:$0xff]  }
 0xcc4   :  { %v8461_v13 = vmax.f32 %v8455_v43, 0.0  ;;  %v8457_v54 = vadd.f32 %v8448_v59, %v8433_v56  ;;  %v8460_v29 = vmax.f32 %v8454_v42, 0.0  ;;  %v13310_v59 = vld [vmem:[%s15312_s14 + $0x20] sm:$0xff]   ;;  %v13314_v33 = vld [vmem:[%s15312_s14 + $0x270] sm:$0xff]   ;;  %v13317_v55 = vld [vmem:[%s15312_s14 + $0x278] sm:$0xff]  }
 0xcc5   :  { %v8462_v0 = vmax.f32 %v8456_v61, 0.0  ;;  %v13316_v58 = vld [vmem:[%s15312_s14 + $0x30] sm:$0xff]   ;;  %v13319_v50 = vld [vmem:[%s15312_s14 + $0x38] sm:$0xff]   ;;  %v13321_v32 = vld [vmem:[%s15312_s14 + $0x280] sm:$0xff]  }
 0xcc6   :  { %v14929_v60 = vpack.c.bf16 %v8461_v13, %v8458_v49  ;;  %v8463_v23 = vmax.f32 %v8457_v54, 0.0  ;;  %v13323_v63 = vld [vmem:[%s15312_s14 + $0x2c8] sm:$0xff]   ;;  %v13322_v43 = vld [vmem:[%s15312_s14 + $0x1c0] sm:$0xff]   ;;  %v13326_v61 = vld [vmem:[%s15312_s14 + $0x2d0] sm:$0xff]  }
 0xcc7   :  { %v14931_v53 = vpack.c.bf16 %v8462_v0, %v8459_v31  ;;  %v13324_v56 = vld [vmem:[%s15312_s14 + $0x288] sm:$0xff]   ;;  %v13327_v13 = vld [vmem:[%s15312_s14 + $0x290] sm:$0xff]   ;;  %v13329_v54 = vld [vmem:[%s15312_s14 + $0x2d8] sm:$0xff]  }
 0xcc8   :  { %v14936_v25 = vpack.c.bf16 %v8463_v23, %v8460_v29  ;;  %v8551_v37 = vrot.slane %v14929_v60, 1  ;;  %v9003_v2 = vrot.slane %v14929_v60, 2  ;;  %v13325_v49 = vld [vmem:[%s15312_s14 + $0x1c8] sm:$0xff]   ;;  %v13328_v31 = vld [vmem:[%s15312_s14 + $0x1d0] sm:$0xff]   ;;  %v13330_v0 = vld [vmem:[%s15312_s14 + $0x298] sm:$0xff]  }
 0xcc9   :  { %v8552_v8 = vrot.slane %v14931_v53, 1  ;;  %v9004_v12 = vrot.slane %v14931_v53, 2  ;;  %v9504_v42 = vrot.slane %v14931_v53, 4  ;;  %v13332_v29 = vld [vmem:[%s15312_s14 + $0x2e0] sm:$0xff]   ;;  %v13331_v23 = vld [vmem:[%s15312_s14 + $0x1d8] sm:$0xff]  }
 0xcca   :  { %12044 = vmatmul.mubr.msk.bf16.vlgmr.msra.gmra.mrb[148].mxu0 %vm2407_vm3, %v14936_v25  ;;  %v8553_v14 = vrot.slane %v14936_v25, 1  ;;  %v9255_v34 = vrot.slane %v14936_v25, 3 }
 0xccb   :  { %11586 = vmatpush3.bf16.msra.mxu0 %v13281_v1  ;;  %8711 = vmatprep.mubr.bf16.mxu1 %v8552_v8  ;;  %v13334_v1 = vld [vmem:[%s15312_s14 + $0x220] sm:$0xff]  }
 0xccc   :  { %9163 = vmatprep.mubr.bf16.mxu0 %v9004_v12  ;;  %8712 = vmatmul.mubr.bf16.vlgmr.msra.gmra.mrb[200].mxu1 %v8551_v37  ;;  %v13333_v8 = vld [vmem:[%s15312_s14 + $0x2a0] sm:$0xff]   ;;  %v13336_v12 = vld [vmem:[%s15312_s14 + $0x2e8] sm:$0xff]  }
 0xccd   :  { %12024 = vmatpush3.bf16.msra.mxu1 %v13282_v4  ;;  %11587 = vmatprep.subr.bf16.mxu0 %v13283_v26  ;;  %v13335_v4 = vld [vmem:[%s15312_s14 + $0x1e0] sm:$0xff]   ;;  %v9005_v26 = vrot.slane %v14936_v25, 2  ;;  %v13338_v37 = vld [vmem:[%s15312_s14 + $0x228] sm:$0xff]  }
 0xcce   :  { %12025 = vmatprep.subr.bf16.mxu1 %v13466_v19  ;;  %12031 = vmatprep.mubr.msk.bf16.mxu1 %vm13467_vm1, %v13466_v19 }
 0xccf   :  { %11588 = vmatpush3.bf16.msra.mxu0 %v13284_v6  ;;  %v9254_v6 = vrot.slane %v14931_v53, 3 }
 0xcd0   :  { %11589 = vmatprep.subr.bf16.mxu0 %v13286_v57  ;;  %v13337_v57 = vld [vmem:[%s15312_s14 + $0x2a8] sm:$0xff]  }
 0xcd1   :  { %12026 = vmatpush3.bf16.msra.mxu1 %v13285_v46  ;;  %v13340_v46 = vld [vmem:[%s15312_s14 + $0x2f0] sm:$0xff]  }
 0xcd2   :  { %12027 = vmatprep.subr.bf16.mxu1 %v13466_v19 }
 0xcd3   :  { %11590 = vmatpush3.bf16.msra.mxu0 %v13287_v21  ;;  %v13339_v21 = vld [vmem:[%s15312_s14 + $0x1e8] sm:$0xff]  }
 0xcd4   :  { %11591 = vmatprep.subr.bf16.mxu0 %v13289_v36  ;;  %v13341_v36 = vld [vmem:[%s15312_s14 + $0x2b0] sm:$0xff]  }
 0xcd5   :  { %12028 = vmatpush3.bf16.msra.mxu1 %v13288_v10  ;;  %v13344_v10 = vld [vmem:[%s15312_s14 + $0x2f8] sm:$0xff]  }
 0xcd6   :  { %12029 = vmatprep.subr.bf16.mxu1 %v13466_v19 }
 0xcd7   :  { %11592 = vmatpush3.bf16.msra.mxu0 %v13290_v48  ;;  %v13343_v48 = vld [vmem:[%s15312_s14 + $0x1f0] sm:$0xff]  }
 0xcd8   :  { %11593 = vmatprep.subr.bf16.mxu0 %v13292_v5  ;;  %v13346_v5 = vld [vmem:[%s15312_s14 + $0x238] sm:$0xff]  }
 0xcd9   :  { %12030 = vmatpush3.bf16.msra.mxu1 %v13291_v44  ;;  %v13345_v44 = vld [vmem:[%s15312_s14 + $0x2b8] sm:$0xff]  }
 0xcda   :  { %11558 = vmatprep.subr.bf16.mxu1 %v13294_v38  ;;  %v13347_v38 = vld [vmem:[%s15312_s14 + $0x1f8] sm:$0xff]  }
 0xcdb   :  { %11594 = vmatpush3.bf16.msra.mxu0 %v13293_v27  ;;  %v13348_v27 = vld [vmem:[%s15312_s14 + $0x240] sm:$0xff]  }
 0xcdc   :  { %12032 = vmatmul.mubr.msk.bf16.vlgmr.msra.gmra.mrb[204].mxu1 %vm2407_vm3, %v8553_v14  ;;  %11595 = vmatprep.subr.bf16.mxu0 %v13296_v9  ;;  %v9503_v9 = vrot.slane %v14929_v60, 4  ;;  %v13350_v14 = vld [vmem:[%s15312_s14 + $0x248] sm:$0xff]  }
 0xcdd   :  { %11559 = vmatpush3.bf16.msra.mxu1 %v13295_v40  ;;  %8914 = vmatprep.mubr.bf16.mxu1 %v14931_v53  ;;  %v13342_v53 = vld [vmem:[%s15312_s14 + $0x230] sm:$0xff]   ;;  %v13349_v40 = vld [vmem:[%s15312_s14 + $0x200] sm:$0xff]  }
 0xcde   :  { %11560 = vmatprep.subr.bf16.mxu1 %v13298_v20  ;;  %v13351_v20 = vld [vmem:[%s15312_s14 + $0x208] sm:$0xff]  }
 0xcdf   :  { %11596 = vmatpush3.bf16.msra.mxu0 %v13297_v45  ;;  %v13352_v45 = vld [vmem:[%s15312_s14 + $0x250] sm:$0xff]  }
 0xce0   :  { %11597 = vmatprep.subr.bf16.mxu0 %v13300_v24  ;;  %v13353_v24 = vld [vmem:[%s15312_s14 + $0x210] sm:$0xff]  }
 0xce1   :  { %11561 = vmatpush3.bf16.msra.mxu1 %v13299_v35  ;;  %v13354_v35 = vld [vmem:[%s15312_s14 + $0x258] sm:$0xff]  }
 0xce2   :  { %11562 = vmatprep.subr.bf16.mxu1 %v13302_v62  ;;  %v13355_v62 = vld [vmem:[%s15312_s14 + $0x218] sm:$0xff]  }
 0xce3   :  { %11598 = vmatpush3.bf16.msra.mxu0 %v13301_v11  ;;  %v13356_v11 = vld [vmem:[%s15312_s14 + $0x300] sm:$0xff]  }
 0xce4   :  { %11599 = vmatprep.subr.bf16.mxu0 %v13304_v47  ;;  %v9253_v47 = vrot.slane %v14929_v60, 3 }
 0xce5   :  { %11563 = vmatpush3.bf16.msra.mxu1 %v13303_v16  ;;  %v13357_v16 = vld [vmem:[%s15312_s14 + $0x308] sm:$0xff]  }
 0xce6   :  { %11564 = vmatprep.subr.bf16.mxu1 %v13306_v22  ;;  %v13358_v22 = vld [vmem:[%s15312_s14 + $0x310] sm:$0xff]  }
 0xce7   :  { %11600 = vmatpush3.bf16.msra.mxu0 %v13305_v39  ;;  %v9505_v39 = vrot.slane %v14936_v25, 4  ;;  %v9722_v25 = vld [vmem:[%s15314_s16 + $0x8] sm:$0xff] }
 0xce8   :  { %12059 = vmatprep.subr.bf16.mxu0 %v13466_v19 }
 0xce9   :  { %11565 = vmatpush3.bf16.msra.mxu1 %v13307_v18  ;;  %v9726_v18 = vld [vmem:[%s15315_s17] sm:$0xff] }
 0xcea   :  { %9164 = vmatmul.mubr.bf16.vlgmr.msra.gmra.mrb[152].mxu0 %v9003_v2  ;;  %11566 = vmatprep.subr.bf16.mxu1 %v13309_v51  ;;  %v9727_v51 = vld [vmem:[%s15315_s17 + $0x8] sm:$0xff]  ;;  %v9721_v2 = vld [vmem:[%s15314_s16] sm:$0xff] }
 0xceb   :  { %12060 = vmatpush3.bf16.msra.mxu0 %v13308_v15  ;;  %12067 = vmatprep.mubr.msk.bf16.mxu0 %vm13467_vm1, %v13466_v19  ;;  %v12117_v15 = vpack.c.bf16 %v9727_v51, %v9726_v18 }
 0xcec   :  { %12061 = vmatprep.subr.bf16.mxu0 %v13466_v19 }
 0xced   :  { %11567 = vmatpush3.bf16.msra.mxu1 %v13310_v59  ;;  %v13468_v59 = vmov 0.0|0.0  }
 0xcee   :  { %11568 = vmatprep.subr.bf16.mxu1 %v13312_v7  ;;  %v12123_v7 = vpack.c.bf16 %v9722_v25, %v9721_v2 }
 0xcef   :  { %12062 = vmatpush3.bf16.msra.mxu0 %v13311_v17  ;;  %v9728_v17 = vld [vmem:[%s15315_s17 + $0x10] sm:$0xff] }
 0xcf0   :  { %12063 = vmatprep.subr.bf16.mxu0 %v13466_v19 }
 0xcf1   :  { %11569 = vmatpush3.bf16.msra.mxu1 %v13313_v28  ;;  %v9729_v28 = vld [vmem:[%s15315_s17 + $0x18] sm:$0xff] }
 0xcf2   :  { %11570 = vmatprep.subr.bf16.mxu1 %v13315_v30  ;;  %v12120_v30 = vpack.c.bf16 %v9729_v28, %v9728_v17 }
 0xcf3   :  { %12064 = vmatpush3.bf16.msra.mxu0 %v13314_v33  ;;  %v9723_v33 = vld [vmem:[%s15314_s16 + $0x10] sm:$0xff] }
 0xcf4   :  { %12065 = vmatprep.subr.bf16.mxu0 %v13466_v19 }
 0xcf5   :  { %11571 = vmatpush3.bf16.msra.mxu1 %v13316_v58  ;;  %v9724_v58 = vld [vmem:[%s15314_s16 + $0x18] sm:$0xff] }
 0xcf6   :  { %11572 = vmatprep.subr.bf16.mxu1 %v13318_v41  ;;  %v12126_v41 = vpack.c.bf16 %v9724_v58, %v9723_v33  ;;  %v9887_v58 = vld [vmem:[%s15317_s19] sm:$0xff] }
 0xcf7   :  { %12066 = vmatpush3.bf16.msra.mxu0 %v13317_v55  ;;  %v9725_v55 = vld [vmem:[%s15344_s9] sm:$0x3] }
 0xcf8   :  { %11639 = vmatprep.subr.bf16.mxu0 %v13320_v3 }
 0xcf9   :  { %11573 = vmatpush3.bf16.msra.mxu1 %v13319_v50 }
 0xcfa   :  { %12068 = vmatmul.mubr.msk.bf16.vlgmr.msra.gmra.mrb[156].mxu0 %vm2407_vm3, %v9255_v34  ;;  %12047 = vmatprep.subr.bf16.mxu1 %v13466_v19 }
 0xcfb   :  { %11640 = vmatpush3.bf16.msra.mxu0 %v13321_v32  ;;  %9663 = vmatprep.mubr.bf16.mxu0 %v9504_v42 }
 0xcfc   :  { %8915 = vmatmul.mubr.bf16.vlgmr.msra.gmra.mrb[208].mxu1 %v14929_v60  ;;  %11641 = vmatprep.subr.bf16.mxu0 %v13323_v63  ;;  %v13359_v60 = vld [vmem:[%s15312_s14 + $0x318] sm:$0xff]  }
 0xcfd   :  { %12048 = vmatpush3.bf16.msra.mxu1 %v13322_v43  ;;  %12055 = vmatprep.mubr.msk.bf16.mxu1 %vm13467_vm1, %v13466_v19 }
 0xcfe   :  { %12049 = vmatprep.subr.bf16.mxu1 %v13466_v19 }
 0xcff   :  { %11642 = vmatpush3.bf16.msra.mxu0 %v13324_v56 }
 0xd00   :  { %11643 = vmatprep.subr.bf16.mxu0 %v13326_v61 }
 0xd01   :  { %12050 = vmatpush3.bf16.msra.mxu1 %v13325_v49 }
 0xd02   :  { %12051 = vmatprep.subr.bf16.mxu1 %v13466_v19 }
 0xd03   :  { %11644 = vmatpush3.bf16.msra.mxu0 %v13327_v13 }
 0xd04   :  { %11645 = vmatprep.subr.bf16.mxu0 %v13329_v54 }
 0xd05   :  { %12052 = vmatpush3.bf16.msra.mxu1 %v13328_v31 }
 0xd06   :  { %12053 = vmatprep.subr.bf16.mxu1 %v13466_v19 }
 0xd07   :  { %11646 = vmatpush3.bf16.msra.mxu0 %v13330_v0 }
 0xd08   :  { %11647 = vmatprep.subr.bf16.mxu0 %v13332_v29 }
 0xd09   :  { %12054 = vmatpush3.bf16.msra.mxu1 %v13331_v23 }
 0xd0a   :  { %11612 = vmatprep.subr.bf16.mxu1 %v13334_v1 }
 0xd0b   :  { %11648 = vmatpush3.bf16.msra.mxu0 %v13333_v8 }
 0xd0c   :  { %12056 = vmatmul.mubr.msk.bf16.vlgmr.msra.gmra.mrb[212].mxu1 %vm2407_vm3, %v9005_v26  ;;  %11649 = vmatprep.subr.bf16.mxu0 %v13336_v12 }
 0xd0d   :  { %11613 = vmatpush3.bf16.msra.mxu1 %v13335_v4  ;;  %9413 = vmatprep.mubr.bf16.mxu1 %v9254_v6 }
 0xd0e   :  { %11614 = vmatprep.subr.bf16.mxu1 %v13338_v37 }
 0xd0f   :  { %11650 = vmatpush3.bf16.msra.mxu0 %v13337_v57 }
 0xd10   :  { %11651 = vmatprep.subr.bf16.mxu0 %v13340_v46 }
 0xd11   :  { %11615 = vmatpush3.bf16.msra.mxu1 %v13339_v21 }
 0xd12   :  { %11616 = vmatprep.subr.bf16.mxu1 %v13342_v53 }
 0xd13   :  { %11652 = vmatpush3.bf16.msra.mxu0 %v13341_v36 }
 0xd14   :  { %11653 = vmatprep.subr.bf16.mxu0 %v13344_v10 }
 0xd15   :  { %11617 = vmatpush3.bf16.msra.mxu1 %v13343_v48 }
 0xd16   :  { %11618 = vmatprep.subr.bf16.mxu1 %v13346_v5 }
 0xd17   :  { %11654 = vmatpush3.bf16.msra.mxu0 %v13345_v44 }
 0xd18   :  { %12122 = vmatprep.subr.bf16.mxu0 %v13468_v59 }
 0xd19   :  { %11619 = vmatpush3.bf16.msra.mxu1 %v13347_v38 }
 0xd1a   :  { %9664 = vmatmul.mubr.bf16.vlgmr.msra.gmra.mrb[160].mxu0 %v9503_v9  ;;  %11620 = vmatprep.subr.bf16.mxu1 %v13348_v27 }
 0xd1b   :  { %12102 = vmatprep.mubr.msk.f32.mxu0 %vm13467_vm1, %v13466_v19  ;;  %12124 = vmatpush3.bf16.msra.mxu0 %v12123_v7 }
 0xd1c   :  { %12125 = vmatprep.subr.bf16.mxu0 %v13468_v59 }
 0xd1d   :  { %11621 = vmatpush3.bf16.msra.mxu1 %v13349_v40 }
 0xd1e   :  { %11622 = vmatprep.subr.bf16.mxu1 %v13350_v14 }
 0xd1f   :  { %12127 = vmatpush3.bf16.msra.mxu0 %v12126_v41  ;;  %v9888_v41 = vld [vmem:[%s15317_s19 + $0x8] sm:$0xff] }
 0xd21   :  { %11623 = vmatpush3.bf16.msra.mxu1 %v13351_v20 }
 0xd22   :  { %11624 = vmatprep.subr.bf16.mxu1 %v13352_v45 }
 0xd25   :  { %11625 = vmatpush3.bf16.msra.mxu1 %v13353_v24 }
 0xd26   :  { %11626 = vmatprep.subr.bf16.mxu1 %v13354_v35 }
 0xd29   :  { %11627 = vmatpush3.bf16.msra.mxu1 %v13355_v62 }
 0xd2a   :  { %12071 = vmatprep.subr.bf16.mxu1 %v13466_v19 }
 0xd2c   :  { %9414 = vmatmul.mubr.bf16.vlgmr.msra.gmra.mrb[216].mxu1 %v9253_v47 }
 0xd2d   :  { %12072 = vmatpush3.bf16.msra.mxu1 %v13356_v11  ;;  %12079 = vmatprep.mubr.msk.bf16.mxu1 %vm13467_vm1, %v13466_v19 }
 0xd2e   :  { %12073 = vmatprep.subr.bf16.mxu1 %v13466_v19 }
 0xd31   :  { %12074 = vmatpush3.bf16.msra.mxu1 %v13357_v16 }
 0xd32   :  { %12075 = vmatprep.subr.bf16.mxu1 %v13466_v19 }
 0xd35   :  { %12076 = vmatpush3.bf16.msra.mxu1 %v13358_v22 }
 0xd36   :  { %12077 = vmatprep.subr.bf16.mxu1 %v13466_v19 }
 0xd39   :  { %12078 = vmatpush3.bf16.msra.mxu1 %v13359_v60 }
 0xd3a   :  { %12116 = vmatprep.subr.bf16.mxu1 %v13468_v59 }
 0xd3c   :  { %12080 = vmatmul.mubr.msk.bf16.vlgmr.msra.gmra.mrb[220].mxu1 %vm2407_vm3, %v9505_v39 }
 0xd3d   :  { %12091 = vmatprep.mubr.msk.f32.mxu1 %vm13467_vm1, %v13466_v19  ;;  %12118 = vmatpush3.bf16.msra.mxu1 %v12117_v15  ;;  %v11141_v15 = vld [vmem:[%s15313_s15] ss:$0 sm:$0xff] }
 0xd3e   :  { %12119 = vmatprep.subr.bf16.mxu1 %v13468_v59 }
 0xd41   :  { %12121 = vmatpush3.bf16.msra.mxu1 %v12120_v30 }
 0xd42   :  { %12128 = vmatprep.subr.bf16.mxu1 %v13468_v59 }
 0xd44   :  { %12092 = vmatmul.mubr.msk.f32.vlgmr.msra.gmra.mrb[224].mxu1 %vm241_vm0, %v9725_v55  ;;  %v9889_v55 = vld [vmem:[%s15317_s19 + $0x10] sm:$0xff] }
 0xd45   :  { %12113 = vmatprep.mubr.msk.f32.mxu1 %vm13467_vm1, %v13466_v19 }
 0xd9d   :  { %v8956_v3 = vpop.f32.mrb[148].mxu0 }
 0xd9e   :  { %v12045_v50 = vpop.f32.mrb[149].mxu0 }
 0xd9f   :  { %v11547_v32 = vpop.f32.mrb[200].mxu1  ;;  %v8959_v34 = vpop.f32.mrb[150].mxu0  ;;  %v9890_v50 = vld [vmem:[%s15317_s19 + $0x18] sm:$0xff]  ;;  %s13469_s19 = smov [#allocation8]  }
 0xda0   :  { %v11548_v63 = vpop.f32.mrb[201].mxu1  ;;  %v12046_v42 = vpop.f32.mrb[151].mxu0  ;;  %s10004_s29 = sshll.u32 %s13469_s19, 4  ;;  %s10005_s29 = int_to_ptr.vmem [resolvable:$true] %s10004_s29 }
 0xda1   :  { %v11549_v43 = vadd.f32 %v11548_v63, %v11547_v32  ;;  %v11550_v56 = vpop.f32.mrb[202].mxu1  ;;  %v12132_v32 = vpack.c.bf16 %v9890_v50, %v9889_v55  ;;  %v11144_v63 = vld [vmem:[%s15316_s18] ss:$0 sm:$0xff]  ;;  %s13432_s3 = scalar_lea.vmem %s10005_s29, 32  ;;  %p13437_p11 = scmp.lt.s32.totalorder %s10005_s29, %s10005_s29 }
 0xda2   :  { %v11551_v61 = vpop.f32.mrb[203].mxu1  ;;  %p13433_p10 = scmp.ne.s32.totalorder %s10005_s29, %s13432_s3  ;;  %p13438_p12 = scmp.lt.s32.totalorder %s13432_s3, %s13432_s3 }
 0xda4   :  { %p13439_p13 = por %p13438_p12, %p13437_p11 }
 0xda6   :  { %p13440_p0 = pnand %p13439_p13, %p13433_p10 }
 0xdaf   :  { %v8753_v49 = vpop.f32.mrb[204].mxu1 }
 0xdb0   :  { %v8754_v13 = vadd.f32 %v11549_v43, %v8753_v49  ;;  %v12033_v54 = vpop.f32.mrb[205].mxu1 }
 0xdb1   :  { %v8756_v31 = vpop.f32.mrb[206].mxu1 }
 0xdb2   :  { %v12034_v0 = vpop.f32.mrb[207].mxu1 }
 0xdbd   :  { %v11601_v29 = vpop.f32.mrb[152].mxu0 }
 0xdbe   :  { %v11602_v23 = vpop.f32.mrb[153].mxu0 }
 0xdbf   :  { %v11603_v1 = vadd.f32 %v11602_v23, %v11601_v29  ;;  %v11604_v8 = vpop.f32.mrb[154].mxu0 }
 0xdc0   :  { %v11605_v12 = vpop.f32.mrb[155].mxu0 }
 0xdcd   :  { %v9455_v19 = vpop.f32.mrb[156].mxu0 }
 0xdce   :  { %v12069_v4 = vpop.f32.mrb[157].mxu0 }
 0xdcf   :  { %v11574_v26 = vpop.f32.mrb[208].mxu1  ;;  %v9458_v37 = vpop.f32.mrb[158].mxu0 }
 0xdd0   :  { %v11575_v6 = vpop.f32.mrb[209].mxu1  ;;  %v12070_v57 = vpop.f32.mrb[159].mxu0 }
 0xdd1   :  { %v11576_v46 = vadd.f32 %v11575_v6, %v11574_v26  ;;  %v11577_v21 = vpop.f32.mrb[210].mxu1 }
 0xdd2   :  { %v11578_v53 = vpop.f32.mrb[211].mxu1 }
 0xdd3   :  { %v8917_v36 = vadd.f32 %v11576_v46, %v8754_v13 }
 0xdd5   :  { %v8957_v10 = vadd.f32 %v8956_v3, %v8917_v36  ;;  %v12129_v3 = vpack.c.bf16 %v9888_v41, %v9887_v58 }
 0xdd7   :  { %12130 = vmatpush3.bf16.msra.mxu1 %v12129_v3 }
 0xdd8   :  { %12131 = vmatprep.subr.bf16.mxu1 %v13468_v59 }
 0xddb   :  { %12133 = vmatpush3.bf16.msra.mxu1 %v12132_v32 }
 0xddf   :  { %v9205_v48 = vpop.f32.mrb[212].mxu1 }
 0xde0   :  { %v9206_v5 = vadd.f32 %v11603_v1, %v9205_v48  ;;  %v12057_v44 = vpop.f32.mrb[213].mxu1 }
 0xde1   :  { %v9208_v38 = vpop.f32.mrb[214].mxu1 }
 0xde2   :  { %v9211_v27 = vadd.f32 %v9206_v5, %v8957_v10  ;;  %v12058_v9 = vpop.f32.mrb[215].mxu1 }
 0xded   :  { %v11655_v40 = vpop.f32.mrb[160].mxu0 }
 0xdee   :  { %v11656_v14 = vpop.f32.mrb[161].mxu0 }
 0xdef   :  { %v11657_v20 = vadd.f32 %v11656_v14, %v11655_v40  ;;  %v11658_v45 = vpop.f32.mrb[162].mxu0 }
 0xdf0   :  { %v11659_v24 = vpop.f32.mrb[163].mxu0 }
 0xdff   :  { %v11628_v35 = vpop.f32.mrb[216].mxu1 }
 0xe00   :  { %v11629_v62 = vpop.f32.mrb[217].mxu1 }
 0xe01   :  { %v11630_v11 = vadd.f32 %v11629_v62, %v11628_v35  ;;  %v11631_v47 = vpop.f32.mrb[218].mxu1 }
 0xe02   :  { %v11632_v16 = vpop.f32.mrb[219].mxu1 }
 0xe03   :  { %v9456_v22 = vadd.f32 %v11630_v11, %v9455_v19 }
 0xe05   :  { %v9461_v60 = vadd.f32 %v9456_v22, %v9211_v27 }
 0xe0f   :  { %v9705_v39 = vpop.f32.mrb[220].mxu1 }
 0xe10   :  { %v9706_v18 = vadd.f32 %v11657_v20, %v9705_v39  ;;  %v12081_v51 = vpop.f32.mrb[221].mxu1 }
 0xe11   :  { %v9708_v2 = vpop.f32.mrb[222].mxu1 }
 0xe12   :  { %v9711_v25 = vadd.f32 %v9706_v18, %v9461_v60  ;;  %v12082_v7 = vpop.f32.mrb[223].mxu1 }
 0xe14   :  { %v9719_v17 = vadd.f32 %v11141_v15, %v9711_v25 }
 0xe16   :  { %v9720_v28 = vmax.f32 %v9719_v17, 0.0 }
 0xe17   :  { %v9799_v30 = vpop.f32.mrb[224].mxu1 }
 0xe18   :  { %12103 = vmatmul.mubr.msk.f32.vlgmr.msra.gmra.mrb[164].mxu0 %vm241_vm0, %v9720_v28  ;;  %v12093_v33 = vpop.f32.mrb[225].mxu1 }
 0xeeb   :  { %v9872_v34 = vpop.f32.mrb[164].mxu0 }
 0xeec   :  { %v9873_v42 = vadd.f32 %v9872_v34, %v9799_v30  ;;  %v12104_v43 = vpop.f32.mrb[165].mxu0 }
 0xeee   :  { %v9883_v56 = vadd.f32 %v11144_v63, %v9873_v42 }
 0xef0   :  { %13360 = vtanh.f32 %v9883_v56 }
 0xefa   :  { %v13361_v61 = vpop.eup %13360 }
 0xefb   :  { %12114 = vmatmul.mubr.msk.f32.vlgmr.msra.gmra.mrb[226].mxu1 %vm241_vm0, %v13361_v61  ;;  %9886 = vst.msk [vmem:[#allocation8] sm:$0x3] %vm9885_vm8, %v13361_v61 }
 0xefc   :  { %13443 = shalt.err (!%p13440_p0)
}
 0xefd   :  { %s13444_s1 = scalar_lea.hbm %s15321_s23, 32 }
 0xefe   :  { %p13445_p1 = scmp.ne.s32.totalorder %s15321_s23, %s13444_s1  ;;  %p13448_p2 = scmp.lt.u32.totalorder %s13444_s1, %s15321_s23 }
 0xf00   :  { %p13450_p3 = pnand %p13448_p2, %p13445_p1 }
 0xf02   :  { %13453 = shalt.err (!%p13450_p3)
}
 0xf03   :  { %10007 = dma.vmem_to_hbm [thread:$0]  %s10005_s29, 32, %s15321_s23, [#allocation4]   ;;  %v11145_v59 = vld [vmem:[%s15318_s20] ss:$0 sm:$0xff]  ;;  %vm9994_vm9 = vcmask 9216  }
 0xf04   :  { %v9977_v1 = vld [vmem:[%s15319_s21] sm:$0x1] }
 0xf05   :  { %v9985_v8 = vsub.f32 1.0, %v9977_v1  ;;  %v9982_v12 = vrot.slane %v9977_v1, %v14126_v52 }
 0xf07   :  { %v9990_v19 = vrot.slane %v9985_v8, %v14126_v52 }
 0xfce   :  { %v9967_v49 = vpop.f32.mrb[226].mxu1 }
 0xfcf   :  { %v9968_v13 = vadd.f32 %v11145_v59, %v9967_v49  ;;  %v12115_v54 = vpop.f32.mrb[227].mxu1 }
 0xfd1   :  { %v9971_v31 = vsub.f32 0.0, %v9968_v13  ;;  %v9992_v37 = vmul.f32 %v9990_v19, %v9968_v13 }
 0xfd3   :  { %v9972_v0 = vmul.f32 1.442695, %v9971_v31 }
 0xfd5   :  { %13362 = vpow2.f32 %v9972_v0 }
 0xfdf   :  { %v13363_v29 = vpop.eup %13362 }
 0xfe0   :  { %v9974_v23 = vadd.f32 1.0, %v13363_v29 }
 0xfe2   :  { %13364 = vrcp.f32 %v9974_v23 }
 0xfec   :  { %v13365_v4 = vpop.eup %13364 }
 0xfed   :  { %v9984_v26 = vmul.f32 %v13365_v4, %v9982_v12 }
 0xfef   :  { %v9993_v6 = vadd.f32 %v9992_v37, %v9984_v26 }
 0xff1   :  { %9995 = vst.msk [vmem:[%s15320_s22] sm:$0x3] %vm9994_vm9, %v9993_v6 }
 0xff2   :  { %13458 = dma.done.wait [#allocation4], 32  }
 0xff3   :  { %13459 = vsyncadd [#allocation4], 4294967264 }
 0xff4   :  { %10013 = vsyncpa [#allocation3], 1 }
 0xff5   :  { %10014 = vsyncpa [#allocation6], 1 }
 0xff6   :  { %10015 = vsyncpa [#allocation4], 1 }

</bundles_post_ra>
